<compile_context>
chip_gen: v7x
topology: tpu7x:2x2x1
jax: 0.10.0
libtpu: 0.0.40
codegen_flags: <defaults>
</compile_context>

<pallas_src>
import functools

import jax
import jax.numpy as jnp
from jax.experimental import pallas as pl
from jax.experimental.pallas import tpu as pltpu

# Make the plain-JAX reference run at the same (pinned) matmul precision as the
# kernels; TPU's default matmul precision would otherwise dominate the comparison.
jax.config.update("jax_default_matmul_precision", "highest")

_HIGHEST = jax.lax.Precision.HIGHEST


def _round_up(x, m):
    return ((x + m - 1) // m) * m


def _tpu_vmem_capacity_bytes():
    try:
        cap = pltpu.get_tpu_info().vmem_capacity_bytes
        if cap:
            return int(cap)
    except Exception:
        pass
    return 64 * 1024 * 1024  # conservative (v7x-sized) fallback


# ---------------------------------------------------------------------------
# Kernel 1: interatomic MLP  h = silu(q @ W1 + b1) @ W2 + b2, tiled over atoms.
# (Hoisted out of the pair loop per perf review.)
# ---------------------------------------------------------------------------
def mlp_kernel(q_ref, w1_ref, b1_ref, w2_ref, b2_ref, h_ref):
    q = q_ref[...]                                                        # [TA, Fp]
    h1 = jnp.dot(q, w1_ref[...], preferred_element_type=jnp.float32,
                 precision=_HIGHEST) + b1_ref[...]
    h1 = h1 * jax.nn.sigmoid(h1)                                          # SiLU (EUP)
    h_ref[...] = jnp.dot(h1, w2_ref[...], preferred_element_type=jnp.float32,
                         precision=_HIGHEST) + b2_ref[...]                # [TA, 3Fp]


# ---------------------------------------------------------------------------
# Kernel 2: pair-tiled one-hot gather / filter / fused scatter-add.
# ---------------------------------------------------------------------------
def message_kernel(h_ref, mu_ref, wij_ref, dir_ref, idx_i_ref, idx_j_ref,
                   out_ref, *, use_bf16):
    p = pl.program_id(0)
    TP = wij_ref.shape[0]
    Np, F3 = h_ref.shape
    Fp = F3 // 3

    cdt = jnp.bfloat16 if use_bf16 else jnp.float32
    prec = jax.lax.Precision.DEFAULT if use_bf16 else _HIGHEST

    @pl.when(p == 0)
    def _init():
        out_ref[...] = jnp.zeros_like(out_ref)

    # Per-tile one-hot gather (g_j: sender idx on sublanes) and pre-transposed scatter
    # (g_i_t: receiver idx on lanes) matrices. Padded pairs carry index -1 -> all-zero
    # rows/cols (free masking); no XLU transpose is ever emitted.
    iota_lane = jax.lax.broadcasted_iota(jnp.int32, (TP, Np), 1)
    g_j = (idx_j_ref[...] == iota_lane).astype(cdt)                       # [TP, Np]
    iota_sub = jax.lax.broadcasted_iota(jnp.int32, (Np, TP), 0)
    g_i_t = (idx_i_ref[...] == iota_sub).astype(cdt)                      # [Np, TP]

    # Gather sender scalars (all three filter slabs at once) and sender vectors.
    s_j = jnp.dot(g_j, h_ref[...], preferred_element_type=jnp.float32,
                  precision=prec)                                         # [TP, 3Fp]
    v_j = jnp.dot(g_j, mu_ref[...], preferred_element_type=jnp.float32,
                  precision=prec)                                         # [TP, 3Fp]

    weighted = wij_ref[...].astype(jnp.float32) * s_j                     # [TP, 3Fp]
    ds1 = weighted[:, :Fp]
    ds2 = weighted[:, Fp:2 * Fp]
    ds3 = weighted[:, 2 * Fp:]

    # dmu slab-by-slab: dir_k broadcast from a single lane of the small [TP,128] dir
    # block — no [TP, 3Fp] repeat temporaries are materialized.
    dirv = dir_ref[...].astype(jnp.float32)                               # [TP, 128]
    slabs = [ds1]
    for k in range(3):
        slabs.append(dirv[:, k:k + 1] * ds2 + ds3 * v_j[:, k * Fp:(k + 1) * Fp])
    payload = jnp.concatenate(slabs, axis=1).astype(cdt)                  # [TP, 4Fp]

    # Single fused scatter-add into the resident [Np, 4Fp] accumulator.
    out_ref[...] += jnp.dot(g_i_t, payload, preferred_element_type=jnp.float32,
                            precision=prec)


# ---------------------------------------------------------------------------
# Wrapper
# ---------------------------------------------------------------------------
def message_forward(per_atom_scalar, per_atom_vector, W_ij, dir_ij, pairlist, params,
                    *, tile_p=None, use_bf16=False):
    """per_atom_scalar: [N,1,F], per_atom_vector: [N,3,F], W_ij: [P,3F],
       dir_ij: [P,3], pairlist: [2,P] int. Returns (q, mu) with PyTorch shapes."""
    W1, b1, W2, b2 = params
    N, _, F = per_atom_scalar.shape
    P = W_ij.shape[0]

    f32 = jnp.float32
    cdt = jnp.bfloat16 if use_bf16 else f32

    Fp = _round_up(F, 128)                 # lane-dense feature slabs
    Np = _round_up(N, 128)                 # lane-dense one-hots / MXU-friendly K dim
    F3, F4 = 3 * Fp, 4 * Fp

    vmem_cap = _tpu_vmem_capacity_bytes()
    if tile_p is None:
        tile_p = 1024 if vmem_cap >= 96 * (1 << 20) else 512
    TP = _round_up(min(tile_p, _round_up(P, 128)), 128)
    # Keep the two [TP, Np] one-hot temporaries within ~1/4 of physical VMEM.
    max_tp = max(128, (vmem_cap // (32 * Np)) // 128 * 128)
    TP = max(128, min(TP, max_tp))
    Pp = _round_up(P, TP)
    n_tiles = Pp // TP
    vmem_limit = max(32 * (1 << 20), min(int(vmem_cap * 0.7), 96 * (1 << 20)))

    def slab_pad(x):
        # [..., 3F] -> [..., 3Fp] with each F-slab starting at k*Fp (128-aligned).
        lead = x.shape[:-1]
        x3 = x.reshape(lead + (3, F))
        x3 = jnp.pad(x3, [(0, 0)] * len(lead) + [(0, 0), (0, Fp - F)])
        return x3.reshape(lead + (F3,))

    # --- padded activations / pair data ---
    q2 = jnp.pad(per_atom_scalar[:, 0, :].astype(f32), ((0, Np - N), (0, Fp - F)))
    mu2 = jnp.pad(per_atom_vector.astype(f32),
                  ((0, Np - N), (0, 0), (0, Fp - F))).reshape(Np, F3)
    wij2 = jnp.pad(slab_pad(W_ij.astype(f32)), ((0, Pp - P), (0, 0)))
    dir2 = jnp.pad(dir_ij.astype(f32), ((0, Pp - P), (0, 128 - 3)))       # [Pp, 128]
    idx_i = jnp.pad(pairlist[0].astype(jnp.int32), (0, Pp - P), constant_values=-1)
    idx_j = jnp.pad(pairlist[1].astype(jnp.int32), (0, Pp - P), constant_values=-1)
    idx_i_row = idx_i[None, :]             # receiver idx on the lane axis  -> [1, Pp]
    idx_j_col = idx_j[:, None]             # sender idx on the sublane axis -> [Pp, 1]

    # --- MLP params, zero-padded (keeps padded feature lanes exactly zero) ---
    W1p = jnp.pad(W1.astype(f32), ((0, Fp - F), (0, Fp - F)))
    b1p = jnp.pad(b1.astype(f32).reshape(1, F), ((0, 0), (0, Fp - F)))
    W2p = jnp.pad(slab_pad(W2.astype(f32)), ((0, Fp - F), (0, 0)))
    b2p = slab_pad(b2.astype(f32).reshape(1, 3 * F))

    const = lambda shape: pl.BlockSpec(shape, lambda i: (0,) * len(shape))

    # --- 1) interatomic MLP, hoisted out of the pair loop (tiled over atoms) ---
    TA = 128
    h = pl.pallas_call(
        mlp_kernel,
        grid_spec=pltpu.PrefetchScalarGridSpec(
            num_scalar_prefetch=0,
            grid=(Np // TA,),
            in_specs=[pl.BlockSpec((TA, Fp), lambda a: (a, 0)),
                      const((Fp, Fp)), const((1, Fp)),
                      const((Fp, F3)), const((1, F3))],
            out_specs=pl.BlockSpec((TA, F3), lambda a: (a, 0)),
        ),
        out_shape=jax.ShapeDtypeStruct((Np, F3), f32),
        compiler_params=pltpu.CompilerParams(dimension_semantics=("parallel",)),
    )(q2, W1p, b1p, W2p, b2p)
    # NOTE: padded atom rows of h are nonzero (silu(b1)@W2 + b2). Harmless: padded
    # pairs use index -1 and real pairs never reference padded atoms.

    # --- 2) pair-tiled gather / scatter message kernel ---
    grid_spec = pltpu.PrefetchScalarGridSpec(
        num_scalar_prefetch=0,
        grid=(n_tiles,),
        in_specs=[
            const((Np, F3)),                              # h         (resident)
            const((Np, F3)),                              # mu fused  (resident)
            pl.BlockSpec((TP, F3), lambda t: (t, 0)),     # W_ij tile (pipelined)
            pl.BlockSpec((TP, 128), lambda t: (t, 0)),    # dir tile  (pipelined, small)
            pl.BlockSpec((1, TP), lambda t: (0, t)),      # idx_i tile
            pl.BlockSpec((TP, 1), lambda t: (t, 0)),      # idx_j tile
        ],
        out_specs=const((Np, F4)),                        # resident accumulator
    )

    delta = pl.pallas_call(
        functools.partial(message_kernel, use_bf16=use_bf16),
        grid_spec=grid_spec,
        out_shape=jax.ShapeDtypeStruct((Np, F4), f32),
        compiler_params=pltpu.CompilerParams(
            dimension_semantics=("arbitrary",),
            vmem_limit_bytes=vmem_limit,
        ),
    )(h.astype(cdt), mu2.astype(cdt), wij2.astype(cdt), dir2.astype(cdt),
      idx_i_row, idx_j_col)

    dq = delta[:N, :F][:, None, :]                         # [N, 1, F]
    dmu = delta[:, Fp:].reshape(Np, 3, Fp)[:N, :, :F]      # [N, 3, F]
    q_final = per_atom_scalar + dq.astype(per_atom_scalar.dtype)
    mu_final = per_atom_vector + dmu.astype(per_atom_vector.dtype)
    return q_final, mu_final


def message_ref(per_atom_scalar, per_atom_vector, W_ij, dir_ij, pairlist, params):
    """Plain-JAX reference mirroring the PyTorch forward exactly."""
    W1, b1, W2, b2 = params
    idx_i, idx_j = pairlist[0], pairlist[1]
    h = jax.nn.silu(per_atom_scalar @ W1 + b1) @ W2 + b2             # [N,1,3F]
    s_j = h[idx_j]                                                   # [P,1,3F]
    weighted = W_ij[:, None, :] * s_j                                # [P,1,3F]
    ds1, ds2, ds3 = jnp.split(weighted, 3, axis=-1)
    ds_i = jnp.zeros_like(per_atom_scalar).at[idx_i].add(ds1)
    q_out = per_atom_scalar + ds_i
    v_j = per_atom_vector[idx_j]                                     # [P,3,F]
    dmu = ds2 * dir_ij[:, :, None] + ds3 * v_j                       # [P,3,F]
    dv_i = jnp.zeros_like(per_atom_vector).at[idx_i].add(dmu)
    return q_out, per_atom_vector + dv_i


if __name__ == "__main__":
    N, F, P = 20, 32, 200   # nr_atoms, nr_atom_basis, nr_pairs (exercises all padding)

    key = jax.random.PRNGKey(0)
    ks = jax.random.split(key, 9)

    per_atom_scalar = jax.random.normal(ks[0], (N, 1, F), jnp.float32)
    per_atom_vector = jax.random.normal(ks[1], (N, 3, F), jnp.float32)
    W_ij = jax.random.normal(ks[2], (P, 3 * F), jnp.float32)
    dir_ij = jax.random.normal(ks[3], (P, 3), jnp.float32)
    pairlist = jax.random.randint(ks[4], (2, P), 0, N, jnp.int32)

    # Deterministic "DenseWithCustomDist" params (Linear F->F + SiLU, Linear F->3F).
    scale1 = 1.0 / jnp.sqrt(F)
    W1 = jax.random.normal(ks[5], (F, F), jnp.float32) * scale1
    b1 = jax.random.normal(ks[6], (1, F), jnp.float32) * 0.1
    W2 = jax.random.normal(ks[7], (F, 3 * F), jnp.float32) * scale1
    b2 = jax.random.normal(ks[8], (1, 3 * F), jnp.float32) * 0.1
    params = (W1, b1, W2, b2)

    q_ref, mu_ref = message_ref(per_atom_scalar, per_atom_vector, W_ij, dir_ij,
                                pairlist, params)

    # f32 path; tile_p=128 -> 2 pair tiles: exercises cross-tile accumulation & masking.
    q_out, mu_out = message_forward(per_atom_scalar, per_atom_vector, W_ij, dir_ij,
                                    pairlist, params, tile_p=128)
    jax.block_until_ready((q_out, mu_out))
    assert q_out.shape == (N, 1, F) and mu_out.shape == (N, 3, F)
    assert jnp.allclose(q_out, q_ref, atol=1e-3, rtol=1e-3), "scalar mismatch (f32)"
    assert jnp.allclose(mu_out, mu_ref, atol=1e-3, rtol=1e-3), "vector mismatch (f32)"

    # bf16 fast-path smoke test (exact 0/1 one-hots, bf16 streams, f32 accumulation).
    q_bf, mu_bf = message_forward(per_atom_scalar, per_atom_vector, W_ij, dir_ij,
                                  pairlist, params, tile_p=128, use_bf16=True)
    jax.block_until_ready((q_bf, mu_bf))

    def rel_err(a, b):
        return float(jnp.linalg.norm(a - b) / (jnp.linalg.norm(b) + 1e-6))

    assert bool(jnp.all(jnp.isfinite(q_bf))) and bool(jnp.all(jnp.isfinite(mu_bf)))
    assert rel_err(q_bf, q_ref) < 5e-2 and rel_err(mu_bf, mu_ref) < 5e-2, "bf16 smoke"

    print("KERNEL_OK")
</pallas_src>

<mosaic_0001>
module attributes {stable_mosaic.version = 11 : i64} {
  func.func @mlp_kernel(%arg0: i32, %arg1: memref<128x128xf32, #tpu.memory_space<vmem>>, %arg2: memref<128x128xf32, #tpu.memory_space<vmem>>, %arg3: memref<1x128xf32, #tpu.memory_space<vmem>>, %arg4: memref<128x384xf32, #tpu.memory_space<vmem>>, %arg5: memref<1x384xf32, #tpu.memory_space<vmem>>, %arg6: memref<128x384xf32, #tpu.memory_space<vmem>>) attributes {dimension_semantics = [#tpu.dimension_semantics<parallel>], iteration_bounds = array<i64: 1>, scalar_prefetch = 0 : i64, scratch_operands = 0 : i64, tpu.core_type = #tpu.core_type<tc>, window_params = [{transform_indices = @transform_0, window_bounds = array<i64: 128, 128>}, {pipeline_mode = #tpu.pipeline_mode<synchronous>, transform_indices = @transform_1, window_bounds = array<i64: 128, 128>}, {pipeline_mode = #tpu.pipeline_mode<synchronous>, transform_indices = @transform_2, window_bounds = array<i64: 1, 128>}, {pipeline_mode = #tpu.pipeline_mode<synchronous>, transform_indices = @transform_3, window_bounds = array<i64: 128, 384>}, {pipeline_mode = #tpu.pipeline_mode<synchronous>, transform_indices = @transform_4, window_bounds = array<i64: 1, 384>}, {transform_indices = @transform_5, window_bounds = array<i64: 128, 384>}]} {
    %c0 = arith.constant 0 : index
    %c0_0 = arith.constant 0 : index
    %0 = vector.load %arg1[%c0, %c0_0] : memref<128x128xf32, #tpu.memory_space<vmem>>, vector<128x128xf32>
    %c0_1 = arith.constant 0 : index
    %c0_2 = arith.constant 0 : index
    %1 = vector.load %arg2[%c0_1, %c0_2] : memref<128x128xf32, #tpu.memory_space<vmem>>, vector<128x128xf32>
    %cst = arith.constant dense<0.000000e+00> : vector<128x128xf32>
    %2 = tpu.matmul %0, %1, %cst {dimension_numbers = #tpu.dot_dimension_numbers<[1], [0], [0], [1], [0, 0, 1, 1], [], []>, precision = #tpu.contract_precision<fp32>} : vector<128x128xf32>, vector<128x128xf32>, vector<128x128xf32> -> vector<128x128xf32>
    %c0_3 = arith.constant 0 : index
    %c0_4 = arith.constant 0 : index
    %3 = vector.load %arg3[%c0_3, %c0_4] : memref<1x128xf32, #tpu.memory_space<vmem>>, vector<1x128xf32>
    %4 = vector.broadcast %3 : vector<1x128xf32> to vector<128x128xf32>
    %5 = arith.addf %2, %4 : vector<128x128xf32>
    %6 = arith.negf %5 : vector<128x128xf32>
    %7 = math.exp %6 : vector<128x128xf32>
    %cst_5 = arith.constant 1.000000e+00 : f32
    %8 = vector.broadcast %cst_5 : f32 to vector<128x128xf32>
    %9 = arith.addf %8, %7 : vector<128x128xf32>
    %10 = arith.divf %8, %9 : vector<128x128xf32>
    %11 = arith.mulf %5, %10 : vector<128x128xf32>
    %c0_6 = arith.constant 0 : index
    %c0_7 = arith.constant 0 : index
    %12 = vector.load %arg4[%c0_6, %c0_7] : memref<128x384xf32, #tpu.memory_space<vmem>>, vector<128x384xf32>
    %cst_8 = arith.constant dense<0.000000e+00> : vector<128x384xf32>
    %13 = tpu.matmul %11, %12, %cst_8 {dimension_numbers = #tpu.dot_dimension_numbers<[1], [0], [0], [1], [0, 0, 1, 1], [], []>, precision = #tpu.contract_precision<fp32>} : vector<128x128xf32>, vector<128x384xf32>, vector<128x384xf32> -> vector<128x384xf32>
    %c0_9 = arith.constant 0 : index
    %c0_10 = arith.constant 0 : index
    %14 = vector.load %arg5[%c0_9, %c0_10] : memref<1x384xf32, #tpu.memory_space<vmem>>, vector<1x384xf32>
    %15 = vector.broadcast %14 : vector<1x384xf32> to vector<128x384xf32>
    %16 = arith.addf %13, %15 : vector<128x384xf32>
    %c0_11 = arith.constant 0 : index
    %c0_12 = arith.constant 0 : index
    %17 = vector.load %arg6[%c0_11, %c0_12] : memref<128x384xf32, #tpu.memory_space<vmem>>, vector<128x384xf32>
    tpu.vector_store %arg6[%c0_11, %c0_12], %16 {strides = array<i32>} : memref<128x384xf32, #tpu.memory_space<vmem>>, vector<128x384xf32>,
    return
  }
  func.func @transform_0(%arg0: i32) -> (i32, i32) {
    %c0_i32 = arith.constant 0 : i32
    %c0_i32_0 = arith.constant 0 : i32
    return %arg0, %c0_i32 : i32, i32
  }
  func.func @transform_1(%arg0: i32) -> (i32, i32) {
    %c0_i32 = arith.constant 0 : i32
    %c0_i32_0 = arith.constant 0 : i32
    %c0_i32_1 = arith.constant 0 : i32
    return %c0_i32, %c0_i32_0 : i32, i32
  }
  func.func @transform_2(%arg0: i32) -> (i32, i32) {
    %c0_i32 = arith.constant 0 : i32
    %c0_i32_0 = arith.constant 0 : i32
    %c0_i32_1 = arith.constant 0 : i32
    return %c0_i32, %c0_i32_0 : i32, i32
  }
  func.func @transform_3(%arg0: i32) -> (i32, i32) {
    %c0_i32 = arith.constant 0 : i32
    %c0_i32_0 = arith.constant 0 : i32
    %c0_i32_1 = arith.constant 0 : i32
    return %c0_i32, %c0_i32_0 : i32, i32
  }
  func.func @transform_4(%arg0: i32) -> (i32, i32) {
    %c0_i32 = arith.constant 0 : i32
    %c0_i32_0 = arith.constant 0 : i32
    %c0_i32_1 = arith.constant 0 : i32
    return %c0_i32, %c0_i32_0 : i32, i32
  }
  func.func @transform_5(%arg0: i32) -> (i32, i32) {
    %c0_i32 = arith.constant 0 : i32
    %c0_i32_0 = arith.constant 0 : i32
    return %arg0, %c0_i32 : i32, i32
  }
}

</mosaic_0001>

<bundles_post_ra>
// kernel: tpu_custom_call.1
= control target key start
LH: loop header
LB: loop body
LE: loop exit
PB: predicated region body
PF: predicated region fallthrough
CT: control target
= control target key end

     0   :  { %10 = vsyncpa [#allocation3], 0  ;;  %s9048_s0 = inlined_call_operand.hbm [shape: f32[128,128], index: 0, kind: input, shape index: {}]   ;;  %s9049_s1 = inlined_call_operand.hbm [shape: f32[128,128], index: 1, kind: input, shape index: {}]   ;;  %s9050_s2 = inlined_call_operand.vmem [shape: f32[1,128], index: 2, kind: input, shape index: {}]   ;;  %s9051_s3 = inlined_call_operand.hbm [shape: f32[128,384], index: 3, kind: input, shape index: {}]   ;;  %s9052_s4 = inlined_call_operand.vmem [shape: f32[1,384], index: 4, kind: input, shape index: {}]   ;;  %s9053_s5 = inlined_call_operand.hbm [shape: f32[128,384], index: 5, kind: output, shape index: {}]  }
   0x1   :  { %11 = vsyncpa [#allocation6], 0 }
   0x2   :  { %12 = vsyncpa [#allocation4], 0  ;;  %s6706_s18 = smov [#allocation5]   ;;  %s6707_s20 = smov [#allocation2]  }
   0x3   :  { %s30_s19 = sshll.u32 %s6706_s18, 4  ;;  %s18_s21 = sshll.u32 %s6707_s20, 4  ;;  %s31_s19 = int_to_ptr.vmem [resolvable:$true] %s30_s19  ;;  %s6745_s21 = int_to_ptr.vmem [resolvable:$true] %s18_s21 }
   0x4   :  { %s6612_s24 = scalar_lea.hbm %s9049_s1, 2048 }
   0x5   :  { %p6613_p0 = scmp.ne.s32.totalorder %s9049_s1, %s6612_s24  ;;  %p6616_p1 = scmp.lt.u32.totalorder %s6612_s24, %s9049_s1 }
   0x7   :  { %p6618_p2 = pnand %p6616_p1, %p6613_p0 }
   0x9   :  { %6621 = shalt.err (!%p6618_p2)
}
   0xa   :  { %s6622_s29 = scalar_lea.vmem %s31_s19, 2048  ;;  %p6627_p4 = scmp.lt.s32.totalorder %s31_s19, %s31_s19 }
   0xb   :  { %p6623_p3 = scmp.ne.s32.totalorder %s31_s19, %s6622_s29  ;;  %p6628_p5 = scmp.lt.s32.totalorder %s6622_s29, %s6622_s29 }
   0xd   :  { %p6629_p6 = por %p6628_p5, %p6627_p4 }
   0xf   :  { %p6630_p7 = pnand %p6629_p6, %p6623_p3 }
  0x11   :  { %6633 = shalt.err (!%p6630_p7)
}
  0x12   :  { %s6708_s30 = smov 128   ;;  %s6709_s6 = smov 8  }
  0x13   :  { %36 = dma.hbm_to_vmem [thread:$0]  %s9049_s1, 2048, %s31_s19, [#allocation6], %s6708_s30, %s6708_s30, %s6709_s6  }
  0x14   :  { %s6634_s11 = scalar_lea.hbm %s9048_s0, 2048 }
  0x15   :  { %p6635_p8 = scmp.ne.s32.totalorder %s9048_s0, %s6634_s11  ;;  %p6638_p9 = scmp.lt.u32.totalorder %s6634_s11, %s9048_s0 }
  0x17   :  { %p6640_p10 = pnand %p6638_p9, %p6635_p8 }
  0x19   :  { %6643 = shalt.err (!%p6640_p10)
}
  0x1a   :  { %s6644_s16 = scalar_lea.vmem %s6745_s21, 2048  ;;  %p6649_p12 = scmp.lt.s32.totalorder %s6745_s21, %s6745_s21 }
  0x1b   :  { %p6645_p11 = scmp.ne.s32.totalorder %s6745_s21, %s6644_s16  ;;  %p6650_p13 = scmp.lt.s32.totalorder %s6644_s16, %s6644_s16 }
  0x1d   :  { %p6651_p0 = por %p6650_p13, %p6649_p12 }
  0x1f   :  { %p6652_p1 = pnand %p6651_p0, %p6645_p11 }
  0x21   :  { %6655 = shalt.err (!%p6652_p1)
}
  0x22   :  { %24 = dma.hbm_to_vmem [thread:$0]  %s9048_s0, 2048, %s6745_s21, [#allocation3], %s6708_s30, %s6708_s30, %s6709_s6  }
  0x23   :  { %s6710_s18 = smov [#allocation7]   ;;  %s6656_s23 = scalar_lea.hbm %s9051_s3, 6144 }
  0x24   :  { %s44_s19 = sshll.u32 %s6710_s18, 4  ;;  %p6657_p2 = scmp.ne.s32.totalorder %s9051_s3, %s6656_s23  ;;  %s45_s19 = int_to_ptr.vmem [resolvable:$true] %s44_s19 }
  0x25   :  { %p6660_p3 = scmp.lt.u32.totalorder %s6656_s23, %s9051_s3 }
  0x27   :  { %p6662_p4 = pnand %p6660_p3, %p6657_p2 }
  0x29   :  { %6665 = shalt.err (!%p6662_p4)
}
  0x2a   :  { %s6666_s28 = scalar_lea.vmem %s45_s19, 6144  ;;  %p6671_p6 = scmp.lt.s32.totalorder %s45_s19, %s45_s19 }
  0x2b   :  { %p6667_p5 = scmp.ne.s32.totalorder %s45_s19, %s6666_s28  ;;  %p6672_p7 = scmp.lt.s32.totalorder %s6666_s28, %s6666_s28 }
  0x2d   :  { %p6673_p8 = por %p6672_p7, %p6671_p6 }
  0x2f   :  { %p6674_p9 = pnand %p6673_p8, %p6667_p5 }
  0x31   :  { %6677 = shalt.err (!%p6674_p9)
}
  0x32   :  { %s6711_s0 = smov 384   ;;  %s6712_s21 = smov 24  }
  0x33   :  { %50 = dma.hbm_to_vmem [thread:$0]  %s9051_s3, 6144, %s45_s19, [#allocation6], %s6711_s0, %s6711_s0, %s6712_s21  }
  0x34   :  { %6700 = dma.done.wait [#allocation3], 2048  }
  0x35   :  { %6701 = vsyncadd [#allocation3], 4294965248 }
  0x36   :  { %6702 = dma.done.wait [#allocation6], 8192  }
  0x37   :  { %6703 = vsyncadd [#allocation6], 4294959104  ;;  %v78_v0 = vld [vmem:[#allocation5] sm:$0xff]  ;;  %v79_v1 = vld [vmem:[#allocation5 + $0x8] sm:$0xff] }
  0x38   :  { %v80_v2 = vld [vmem:[#allocation5 + $0x10] sm:$0xff]  ;;  %v102_v3 = vand.u32 4294901760, %v78_v0  ;;  %v105_v4 = vand.u32 4294901760, %v79_v1  ;;  %v81_v5 = vld [vmem:[#allocation5 + $0x18] sm:$0xff]  ;;  %v6791_v7 = vld [vmem:[#allocation5 + $0x20] sm:$0xff] }
  0x39   :  { %v108_v6 = vand.u32 4294901760, %v80_v2  ;;  %v6793_v8 = vld [vmem:[#allocation5 + $0x28] sm:$0xff]  ;;  %v111_v9 = vand.u32 4294901760, %v81_v5  ;;  %v114_v11 = vand.u32 4294901760, %v6791_v7  ;;  %v6801_v14 = vld [vmem:[#allocation5 + $0x30] sm:$0xff]  ;;  %v6803_v15 = vld [vmem:[#allocation5 + $0x38] sm:$0xff] }
  0x3a   :  { %v6795_v10 = vpack.c.bf16 %v105_v4, %v102_v3  ;;  %v117_v12 = vand.u32 4294901760, %v6793_v8  ;;  %v62_v16 = vld [vmem:[#allocation2] sm:$0xff]  ;;  %v63_v17 = vld [vmem:[#allocation2 + $0x8] sm:$0xff]  ;;  %v120_v20 = vand.u32 4294901760, %v6801_v14  ;;  %v123_v21 = vand.u32 4294901760, %v6803_v15  ;;  %v64_v26 = vld [vmem:[#allocation2 + $0x10] sm:$0xff] }
  0x3b   :  { %v6799_v13 = vpack.c.bf16 %v111_v9, %v108_v6  ;;  %v6807_v18 = vand.u32 4294901760, %v62_v16  ;;  %v6818_v22 = vld [vmem:[#allocation5 + $0x40] sm:$0xff]  ;;  %v6820_v23 = vld [vmem:[#allocation5 + $0x48] sm:$0xff]  ;;  %v6825_v25 = vand.u32 4294901760, %v63_v17  ;;  %v65_v27 = vld [vmem:[#allocation2 + $0x18] sm:$0xff]  ;;  %v6840_v33 = vsub.f32 %v78_v0, %v102_v3 }
  0x3c   :  { %9365 = vst [vmem:[#allocation12_spill] sm:$0xff] %v6795_v10  ;;  %5580 = vmatprep.subr.bf16.mxu0 %v6795_v10  ;;  %v6814_v19 = vpack.c.bf16 %v117_v12, %v114_v11  ;;  %v126_v28 = vand.u32 4294901760, %v6818_v22  ;;  %v6835_v30 = vpack.c.bf16 %v123_v21, %v120_v20  ;;  %v129_v31 = vand.u32 4294901760, %v6820_v23  ;;  %v6838_v32 = vld [vmem:[#allocation5 + $0x50] sm:$0xff]  ;;  %v6844_v35 = vld [vmem:[#allocation5 + $0x58] sm:$0xff]  ;;  %v6860_v42 = vld [vmem:[#allocation5 + $0x60] sm:$0xff] }
  0x3d   :  { %9366 = vst [vmem:[#allocation13_spill] sm:$0xff] %v6799_v13  ;;  %5582 = vmatpush3.bf16.msra.mxu0 %v6795_v10  ;;  %v6823_v24 = vsub.f32 %v62_v16, %v6807_v18  ;;  %v6842_v34 = vsub.f32 %v79_v1, %v105_v4  ;;  %v6850_v37 = vsub.f32 %v63_v17, %v6825_v25  ;;  %v6852_v38 = vand.u32 4294901760, %v64_v26  ;;  %v6862_v43 = vld [vmem:[#allocation5 + $0x68] sm:$0xff]  ;;  %v6872_v47 = vld [vmem:[#allocation5 + $0x70] sm:$0xff]  ;;  %v66_v50 = vld [vmem:[#allocation2 + $0x20] sm:$0xff] }
  0x3e   :  { %5584 = vmatprep.subr.bf16.mxu0 %v6799_v13  ;;  %9367 = vst [vmem:[#allocation14_spill] sm:$0xff] %v6814_v19  ;;  %9369 = vst [vmem:[#allocation16_spill] sm:$0xff] %v6835_v30  ;;  %v6854_v39 = vand.u32 4294901760, %v65_v27  ;;  %v6856_v40 = vsub.f32 %v80_v2, %v108_v6  ;;  %v9067_v41 = vand.u32 4294901760, %v6838_v32  ;;  %v6869_v45 = vpack.c.bf16 %v129_v31, %v126_v28  ;;  %v67_v51 = vld [vmem:[#allocation2 + $0x28] sm:$0xff]  ;;  %v6877_v52 = vld [vmem:[#allocation5 + $0x78] sm:$0xff] }
  0x3f   :  { %9368 = vst [vmem:[#allocation15_spill] sm:$0xff] %v6823_v24  ;;  %v9055_v29 = vand.u32 4294901760, %v6823_v24  ;;  %9370 = vst [vmem:[#allocation17_spill] sm:$0xff] %v6850_v37  ;;  %v9066_v46 = vand.u32 4294901760, %v6844_v35  ;;  %v9058_v48 = vand.u32 4294901760, %v6840_v33  ;;  %v6875_v49 = vsub.f32 %v81_v5, %v111_v9  ;;  %v68_v3 = vld [vmem:[#allocation2 + $0x30] sm:$0xff] }
  0x40   :  { %9371 = vst [vmem:[#allocation18_spill] sm:$0xff] %v6869_v45  ;;  %v9054_v53 = vand.u32 4294901760, %v6850_v37  ;;  %v9057_v54 = vand.u32 4294901760, %v6842_v34  ;;  %v6882_v55 = vsub.f32 %v64_v26, %v6852_v38  ;;  %v6885_v56 = vsub.f32 %v65_v27, %v6854_v39 }
  0x41   :  { %5586 = vmatpush3.bf16.msra.mxu0 %v6799_v13  ;;  %v185_v36 = vsub.f32 %v6823_v24, %v9055_v29  ;;  %v9065_v57 = vand.u32 4294901760, %v6860_v42  ;;  %v9056_v58 = vand.u32 4294901760, %v6856_v40  ;;  %v9064_v59 = vand.u32 4294901760, %v6862_v43 }
  0x42   :  { %5588 = vmatprep.subr.bf16.mxu0 %v6814_v19  ;;  %9372 = vst [vmem:[#allocation19_spill] sm:$0xff] %v6882_v55  ;;  %9373 = vst [vmem:[#allocation20_spill] sm:$0xff] %v6885_v56  ;;  %v9061_v60 = vand.u32 4294901760, %v6872_v47  ;;  %v6892_v61 = vand.u32 4294901760, %v66_v50  ;;  %v6894_v62 = vand.u32 4294901760, %v67_v51  ;;  %v6901_v63 = vpack.c.bf16 %v9066_v46, %v9067_v41 }
  0x43   :  { %v186_v44 = vand.u32 4294901760, %v185_v36  ;;  %v9059_v0 = vand.u32 4294901760, %v6877_v52  ;;  %v346_v1 = vsub.f32 %v6840_v33, %v9058_v48  ;;  %v9060_v2 = vand.u32 4294901760, %v6875_v49  ;;  %v71_v48 = vld [vmem:[#allocation2 + $0x48] sm:$0xff] }
  0x44   :  { %9374 = vst [vmem:[#allocation21_spill] sm:$0xff] %v6901_v63  ;;  %v6911_v4 = vsub.f32 %v6850_v37, %v9054_v53  ;;  %v353_v5 = vsub.f32 %v6842_v34, %v9057_v54  ;;  %v9062_v6 = vand.u32 4294901760, %v6882_v55  ;;  %v9063_v9 = vand.u32 4294901760, %v6885_v56  ;;  %v69_v53 = vld [vmem:[#allocation2 + $0x38] sm:$0xff]  ;;  %v70_v54 = vld [vmem:[#allocation2 + $0x40] sm:$0xff] }
  0x45   :  { %5590 = vmatpush3.bf16.msra.mxu0 %v6814_v19  ;;  %4939 = vmatprep.mubr.f32.mxu0 %v186_v44  ;;  %v360_v16 = vsub.f32 %v6856_v40, %v9056_v58  ;;  %v6924_v17 = vsub.f32 %v6791_v7, %v114_v11  ;;  %v6929_v26 = vsub.f32 %v6793_v8, %v117_v12  ;;  %v6938_v44 = vand.u32 4294901760, %v68_v3 }
  0x46   :  { %5592 = vmatprep.subr.bf16.mxu0 %v6835_v30  ;;  %v6933_v27 = vsub.f32 %v66_v50, %v6892_v61  ;;  %v6936_v36 = vsub.f32 %v67_v51, %v6894_v62  ;;  %v6945_v7 = vpack.c.bf16 %v9064_v59, %v9065_v57  ;;  %v6951_v8 = vpack.c.bf16 %v9059_v0, %v9061_v60 }
  0x47   :  { %v347_v11 = vand.u32 4294901760, %v346_v1  ;;  %v367_v12 = vsub.f32 %v6875_v49, %v9060_v2  ;;  %v196_v50 = vand.u32 4294901760, %v6911_v4  ;;  %v354_v51 = vand.u32 4294901760, %v353_v5 }
  0x48   :  { %9375 = vst [vmem:[#allocation22_spill] sm:$0xff] %v6933_v27  ;;  %9376 = vst [vmem:[#allocation23_spill] sm:$0xff] %v6936_v36  ;;  %v6960_v29 = vsub.f32 %v6882_v55, %v9062_v6  ;;  %v6965_v58 = vsub.f32 %v6885_v56, %v9063_v9  ;;  %v361_v1 = vand.u32 4294901760, %v360_v16  ;;  %v9071_v0 = vand.u32 4294901760, %v6924_v17 }
  0x49   :  { %5594 = vmatpush3.bf16.msra.mxu0 %v6835_v30  ;;  %9377 = vst [vmem:[#allocation24_spill] sm:$0xff] %v6945_v7  ;;  %9378 = vst [vmem:[#allocation25_spill] sm:$0xff] %v6951_v8  ;;  %v9068_v2 = vand.u32 4294901760, %v6929_v26  ;;  %v6969_v60 = vand.u32 4294901760, %v69_v53  ;;  %v9069_v4 = vand.u32 4294901760, %v6933_v27  ;;  %v9070_v5 = vand.u32 4294901760, %v6936_v36 }
  0x4a   :  { %5596 = vmatprep.subr.bf16.mxu0 %v6869_v45  ;;  %v6975_v6 = vsub.f32 %v68_v3, %v6938_v44  ;;  %v6980_v9 = vsub.f32 %v6801_v14, %v120_v20  ;;  %v368_v16 = vand.u32 4294901760, %v367_v12  ;;  %v6986_v59 = vsub.f32 %v6803_v15, %v123_v21 }
  0x4b   :  { %v6988_v57 = vand.u32 4294901760, %v70_v54  ;;  %v6990_v46 = vand.u32 4294901760, %v71_v48  ;;  %v5611_v41 = vpack.c.bf16 %v354_v51, %v347_v11  ;;  %v206_v3 = vand.u32 4294901760, %v6960_v29 }
  0x4c   :  { %9379 = vst [vmem:[#allocation26_spill] sm:$0xff] %v6975_v6  ;;  %v6996_v14 = vsub.f32 %v6818_v22, %v126_v28  ;;  %v7001_v20 = vsub.f32 %v6820_v23, %v129_v31  ;;  %v216_v15 = vand.u32 4294901760, %v6965_v58  ;;  %v374_v21 = vsub.f32 %v6924_v17, %v9071_v0  ;;  %v72_v22 = vld [vmem:[#allocation2 + $0x50] sm:$0xff]  ;;  %v73_v31 = vld [vmem:[#allocation2 + $0x58] sm:$0xff] }
  0x4d   :  { %5598 = vmatpush3.bf16.msra.mxu0 %v6869_v45  ;;  %v381_v29 = vsub.f32 %v6929_v26, %v9068_v2  ;;  %v7011_v11 = vsub.f32 %v69_v53, %v6969_v60  ;;  %v225_v23 = vsub.f32 %v6933_v27, %v9069_v4  ;;  %v7020_v28 = vsub.f32 %v6936_v36, %v9070_v5 }
  0x4e   :  { %5600 = vmatprep.subr.bf16.mxu0 %v6901_v63  ;;  %v5615_v53 = vpack.c.bf16 %v368_v16, %v361_v1  ;;  %v7027_v51 = vsub.f32 %v70_v54, %v6988_v57  ;;  %v7030_v2 = vsub.f32 %v71_v48, %v6990_v46  ;;  %v7034_v0 = vand.u32 4294901760, %v72_v22 }
  0x4f   :  { %9380 = vst [vmem:[#allocation27_spill] sm:$0xff] %v7011_v11  ;;  %v9383_v58 = vand.u32 4294901760, %v6838_v32  ;;  %v375_v1 = vand.u32 4294901760, %v374_v21  ;;  %v382_v16 = vand.u32 4294901760, %v381_v29  ;;  %v9384_v12 = vand.u32 4294901760, %v6844_v35  ;;  %v74_v29 = vld [vmem:[#allocation2 + $0x60] sm:$0xff] }
  0x50   :  { %9381 = vst [vmem:[#allocation28_spill] sm:$0xff] %v7027_v51  ;;  %9382 = vst [vmem:[#allocation29_spill] sm:$0xff] %v7030_v2  ;;  %v226_v5 = vand.u32 4294901760, %v225_v23  ;;  %v236_v4 = vand.u32 4294901760, %v7020_v28  ;;  %v7060_v54 = vand.u32 4294901760, %v73_v31  ;;  %v9388_v28 = vand.u32 4294901760, %v6996_v14 }
  0x51   :  { %5602 = vmatpush3.bf16.msra.mxu0 %v6901_v63  ;;  %v7045_v48 = vsub.f32 %v6844_v35, %v9384_v12  ;;  %v9385_v63 = vand.u32 4294901760, %v6975_v6  ;;  %v7069_v30 = vsub.f32 %v72_v22, %v7034_v0  ;;  %v9391_v12 = vand.u32 4294901760, %v7011_v11 }
  0x52   :  { %5604 = vmatprep.subr.bf16.mxu0 %v6945_v7  ;;  %v7076_v19 = vand.u32 4294901760, %v74_v29  ;;  %v9392_v22 = vand.u32 4294901760, %v6860_v42 }
  0x53   :  { %v245_v45 = vsub.f32 %v6975_v6, %v9385_v63  ;;  %v402_v63 = vsub.f32 %v6996_v14, %v9388_v28  ;;  %9390 = vst [vmem:[#allocation30_spill] sm:$0xff] %v7069_v30  ;;  %v255_v23 = vsub.f32 %v7011_v11, %v9391_v12  ;;  %v422_v36 = vand.u32 4294901760, %v7045_v48 }
  0x54   :  { %v7081_v56 = vsub.f32 %v6860_v42, %v9392_v22  ;;  %v9394_v12 = vand.u32 4294901760, %v7027_v51  ;;  %v76_v42 = vld [vmem:[#allocation2 + $0x70] sm:$0xff]  ;;  %v9399_v37 = vand.u32 4294901760, %v7069_v30 }
  0x55   :  { %5606 = vmatpush3.bf16.msra.mxu0 %v6945_v7  ;;  %v7039_v7 = vsub.f32 %v6838_v32, %v9383_v58  ;;  %v9386_v32 = vand.u32 4294901760, %v6980_v9  ;;  %v9387_v58 = vand.u32 4294901760, %v6986_v59  ;;  %v246_v28 = vand.u32 4294901760, %v245_v45 }
  0x56   :  { %5608 = vmatprep.subr.bf16.mxu0 %v6951_v8  ;;  %v9395_v45 = vand.u32 4294901760, %v7030_v2  ;;  %v403_v22 = vand.u32 4294901760, %v402_v63  ;;  %v256_v11 = vand.u32 4294901760, %v255_v23  ;;  %v285_v10 = vsub.f32 %v7069_v30, %v9399_v37 }
  0x57   :  { %v388_v21 = vsub.f32 %v6980_v9, %v9386_v32  ;;  %v395_v35 = vsub.f32 %v6986_v59, %v9387_v58  ;;  %v5619_v58 = vpack.c.bf16 %v382_v16, %v375_v1  ;;  %v9409_v30 = vand.u32 4294901760, %v6980_v9 }
  0x59   :  { %5610 = vmatpush3.bf16.msra.mxu0 %v6951_v8  ;;  %v9389_v8 = vand.u32 4294901760, %v7001_v20  ;;  %v389_v27 = vand.u32 4294901760, %v388_v21  ;;  %v396_v16 = vand.u32 4294901760, %v395_v35  ;;  %v7097_v21 = vsub.f32 %v73_v31, %v7060_v54 }
  0x5a   :  { %5612 = vmatprep.subr.bf16.mxu0 %v5611_v41  ;;  %v429_v31 = vand.u32 4294901760, %v7081_v56 }
  0x5b   :  { %v409_v32 = vsub.f32 %v7001_v20, %v9389_v8  ;;  %v75_v8 = vld [vmem:[#allocation2 + $0x68] sm:$0xff]  ;;  %v5623_v23 = vpack.c.bf16 %v396_v16, %v389_v27 }
  0x5c   :  { %4940 = vmatmul.mubr.f32.vlgmr.msra.gmra.mrb[0].mxu0 %v196_v50  ;;  %v9393_v50 = vand.u32 4294901760, %v6862_v43 }
  0x5d   :  { %5614 = vmatpush3.bf16.msra.mxu0 %v5611_v41  ;;  %4942 = vmatprep.mubr.f32.mxu0 %v206_v3  ;;  %v265_v41 = vsub.f32 %v7027_v51, %v9394_v12  ;;  %v7094_v3 = vsub.f32 %v7030_v2, %v9395_v45  ;;  %v410_v6 = vand.u32 4294901760, %v409_v32  ;;  %v423_v12 = vsub.f32 %v7045_v48, %v422_v36 }
  0x5e   :  { %v7086_v1 = vsub.f32 %v6862_v43, %v9393_v50  ;;  %5616 = vmatprep.subr.bf16.mxu0 %v5615_v53  ;;  %v9396_v50 = vand.u32 4294901760, %v7039_v7  ;;  %v7105_v51 = vsub.f32 %v74_v29, %v7076_v19  ;;  %v7107_v45 = vand.u32 4294901760, %v75_v8  ;;  %v77_v43 = vld [vmem:[#allocation2 + $0x78] sm:$0xff] }
  0x5f   :  { %v7111_v32 = vand.u32 4294901760, %v76_v42  ;;  %v266_v29 = vand.u32 4294901760, %v265_v41  ;;  %v9112_v2 = vand.u32 4294901760, %v7097_v21  ;;  %v276_v13 = vand.u32 4294901760, %v7094_v3 }
  0x60   :  { %v416_v35 = vsub.f32 %v7039_v7, %v9396_v50  ;;  %4943 = vmatmul.mubr.f32.gmra.mrb[2].mxu0 %v216_v15  ;;  %v436_v63 = vand.u32 4294901760, %v7086_v1  ;;  %v9397_v50 = vand.u32 4294901760, %v6872_v47  ;;  %v5627_v55 = vpack.c.bf16 %v410_v6, %v403_v22 }
  0x61   :  { %5618 = vmatpush3.bf16.msra.mxu0 %v5615_v53  ;;  %4945 = vmatprep.mubr.f32.mxu0 %v226_v5  ;;  %v9398_v53 = vand.u32 4294901760, %v6877_v52  ;;  %v7130_v16 = vsub.f32 %v75_v8, %v7107_v45  ;;  %v7132_v41 = vand.u32 4294901760, %v77_v43  ;;  %v7137_v3 = vsub.f32 %v76_v42, %v7111_v32 }
  0x62   :  { %v7116_v15 = vsub.f32 %v6872_v47, %v9397_v50  ;;  %5620 = vmatprep.subr.bf16.mxu0 %v5619_v58  ;;  %v417_v24 = vand.u32 4294901760, %v416_v35  ;;  %v424_v47 = vand.u32 4294901760, %v423_v12  ;;  %v437_v6 = vsub.f32 %v7086_v1, %v436_v63 }
  0x63   :  { %v7122_v5 = vsub.f32 %v6877_v52, %v9398_v53  ;;  %v430_v52 = vsub.f32 %v7081_v56, %v429_v31  ;;  %v9400_v22 = vand.u32 4294901760, %v6840_v33  ;;  %v9401_v8 = vand.u32 4294901760, %v6842_v34 }
  0x64   :  { %4946 = vmatmul.mubr.f32.gmra.mrb[4].mxu0 %v236_v4  ;;  %v443_v37 = vand.u32 4294901760, %v7116_v15  ;;  %v9406_v42 = vand.u32 4294901760, %v6924_v17  ;;  %v9407_v50 = vand.u32 4294901760, %v6929_v26  ;;  %v295_v27 = vsub.f32 %v7097_v21, %v9112_v2 }
  0x65   :  { %5622 = vmatpush3.bf16.msra.mxu0 %v5619_v58  ;;  %4948 = vmatprep.mubr.f32.mxu0 %v246_v28  ;;  %v450_v4 = vand.u32 4294901760, %v7122_v5  ;;  %v7145_v35 = vpack.c.bf16 %v9401_v8, %v9400_v22  ;;  %v9403_v58 = vand.u32 4294901760, %v6856_v40  ;;  %v9404_v28 = vand.u32 4294901760, %v6875_v49 }
  0x66   :  { %5624 = vmatprep.subr.bf16.mxu0 %v5623_v23  ;;  %v7157_v53 = vpack.c.bf16 %v9407_v50, %v9406_v42  ;;  %v9410_v22 = vand.u32 4294901760, %v6986_v59  ;;  %v314_v50 = vand.u32 4294901760, %v7130_v16  ;;  %v7180_v2 = vsub.f32 %v77_v43, %v7132_v41 }
  0x67   :  { %9402 = vst [vmem:[#allocation31_spill] sm:$0xff] %v7145_v35  ;;  %v7151_v12 = vpack.c.bf16 %v9404_v28, %v9403_v58  ;;  %v9412_v35 = vand.u32 4294901760, %v6996_v14  ;;  %v9413_v58 = vand.u32 4294901760, %v7001_v20  ;;  %v444_v43 = vsub.f32 %v7116_v15, %v443_v37 }
  0x68   :  { %9408 = vst [vmem:[#allocation33_spill] sm:$0xff] %v7157_v53  ;;  %v7166_v8 = vpack.c.bf16 %v9410_v22, %v9409_v30  ;;  %4949 = vmatmul.mubr.f32.gmra.mrb[6].mxu0 %v256_v11  ;;  %v7182_v53 = vpack.c.bf16 %v436_v63, %v429_v31  ;;  %v7184_v30 = vpack.c.bf16 %v450_v4, %v443_v37  ;;  %v286_v22 = vand.u32 4294901760, %v285_v10 }
  0x69   :  { %9405 = vst [vmem:[#allocation32_spill] sm:$0xff] %v7151_v12  ;;  %v7172_v28 = vpack.c.bf16 %v9413_v58, %v9412_v35  ;;  %v9414_v12 = vand.u32 4294901760, %v7039_v7  ;;  %5626 = vmatpush3.bf16.msra.mxu0 %v5623_v23  ;;  %4951 = vmatprep.mubr.f32.mxu0 %v266_v29  ;;  %v9415_v35 = vand.u32 4294901760, %v7105_v51  ;;  %v431_v11 = vand.u32 4294901760, %v430_v52 }
  0x6a   :  { %9411 = vst [vmem:[#allocation34_spill] sm:$0xff] %v7166_v8  ;;  %v5631_v8 = vpack.c.bf16 %v424_v47, %v417_v24  ;;  %5628 = vmatprep.subr.bf16.mxu0 %v5627_v55  ;;  %v451_v31 = vsub.f32 %v7122_v5, %v450_v4  ;;  %v296_v63 = vand.u32 4294901760, %v295_v27  ;;  %v315_v10 = vsub.f32 %v7130_v16, %v314_v50 }
  0x6b   :  { %v7176_v42 = vpack.c.bf16 %v422_v36, %v9414_v12  ;;  %v305_v58 = vsub.f32 %v7105_v51, %v9415_v35  ;;  %v324_v36 = vand.u32 4294901760, %v7137_v3  ;;  %v438_v12 = vand.u32 4294901760, %v437_v6 }
  0x6c   :  { %4952 = vmatmul.mubr.f32.gmra.mrb[8].mxu0 %v276_v13  ;;  %v334_v24 = vand.u32 4294901760, %v7180_v2  ;;  %v445_v52 = vand.u32 4294901760, %v444_v43  ;;  %v452_v6 = vand.u32 4294901760, %v451_v31  ;;  %v316_v13 = vand.u32 4294901760, %v315_v10  ;;  %v9430_v43 = vld [vmem:[#allocation29_spill] sm:$0xff]  ;;  %v9431_v31 = vld [vmem:[#allocation30_spill] sm:$0xff] }
  0x6d   :  { %5630 = vmatpush3.bf16.msra.mxu0 %v5627_v55  ;;  %4954 = vmatprep.mubr.f32.mxu0 %v286_v22  ;;  %v306_v23 = vand.u32 4294901760, %v305_v58  ;;  %v325_v29 = vsub.f32 %v7137_v3, %v324_v36  ;;  %v5635_v47 = vpack.c.bf16 %v438_v12, %v431_v11  ;;  %v5643_v22 = vpack.c.bf16 %v6842_v34, %v6840_v33  ;;  %v9427_v58 = vld [vmem:[#allocation27_spill] sm:$0xff]  ;;  %v9428_v11 = vld [vmem:[#allocation28_spill] sm:$0xff]  ;;  %v9429_v12 = vld [vmem:[#allocation18_spill] sm:$0xff] }
  0x6e   :  { %5632 = vmatprep.subr.bf16.mxu0 %v5631_v8  ;;  %v335_v27 = vsub.f32 %v7180_v2, %v334_v24  ;;  %v5639_v55 = vpack.c.bf16 %v452_v6, %v445_v52  ;;  %v5651_v35 = vpack.c.bf16 %v6929_v26, %v6924_v17  ;;  %v5655_v33 = vpack.c.bf16 %v6986_v59, %v6980_v9  ;;  %v9416_v9 = vld [vmem:[#allocation15_spill] sm:$0xff]  ;;  %v9418_v17 = vld [vmem:[#allocation17_spill] sm:$0xff]  ;;  %v9433_v10 = vld [vmem:[#allocation24_spill] sm:$0xff] }
  0x6f   :  { %v326_v37 = vand.u32 4294901760, %v325_v29  ;;  %v5659_v34 = vpack.c.bf16 %v7001_v20, %v6996_v14  ;;  %v5671_v59 = vpack.c.bf16 %v7122_v5, %v7116_v15  ;;  %v9419_v26 = vld [vmem:[#allocation19_spill] sm:$0xff]  ;;  %v9421_v14 = vld [vmem:[#allocation20_spill] sm:$0xff]  ;;  %v9422_v20 = vld [vmem:[#allocation22_spill] sm:$0xff]  ;;  %v9435_v29 = vand.u32 4294901760, %v9416_v9 }
  0x70   :  { %4955 = vmatmul.mubr.f32.gmra.mrb[10].mxu0 %v296_v63  ;;  %v336_v4 = vand.u32 4294901760, %v335_v27  ;;  %v9425_v15 = vld [vmem:[#allocation26_spill] sm:$0xff]  ;;  %v9426_v5 = vld [vmem:[#allocation16_spill] sm:$0xff]  ;;  %v9432_v63 = vld [vmem:[#allocation21_spill] sm:$0xff]  ;;  %v9437_v52 = vand.u32 4294901760, %v9418_v17  ;;  %v9438_v6 = vand.u32 4294901760, %v9419_v26 }
  0x71   :  { %5634 = vmatpush3.bf16.msra.mxu0 %v5631_v8  ;;  %4957 = vmatprep.mubr.f32.mxu0 %v306_v23  ;;  %v5647_v8 = vpack.c.bf16 %v6875_v49, %v6856_v40  ;;  %v5663_v40 = vpack.c.bf16 %v7045_v48, %v7039_v7  ;;  %v5667_v49 = vpack.c.bf16 %v7086_v1, %v7081_v56  ;;  %v9417_v56 = vld [vmem:[#allocation12_spill] sm:$0xff]  ;;  %v9420_v7 = vld [vmem:[#allocation13_spill] sm:$0xff]  ;;  %v9423_v48 = vld [vmem:[#allocation14_spill] sm:$0xff]  ;;  %v9440_v27 = vand.u32 4294901760, %v9421_v14 }
  0x72   :  { %5636 = vmatprep.subr.bf16.mxu0 %v5635_v47  ;;  %v9424_v1 = vld [vmem:[#allocation23_spill] sm:$0xff]  ;;  %v9434_v23 = vld [vmem:[#allocation25_spill] sm:$0xff] }
  0x74   :  { %4958 = vmatmul.mubr.f32.gmra.mrb[12].mxu0 %v316_v13  ;;  %v9439_v13 = vld [vmem:[#allocation32_spill] sm:$0xff] }
  0x75   :  { %5638 = vmatpush3.bf16.msra.mxu0 %v5635_v47  ;;  %4960 = vmatprep.mubr.f32.mxu0 %v326_v37  ;;  %v9436_v47 = vld [vmem:[#allocation31_spill] sm:$0xff]  ;;  %v9441_v37 = vand.u32 4294901760, %v9422_v20 }
  0x76   :  { %5640 = vmatprep.subr.bf16.mxu0 %v5639_v55 }
  0x78   :  { %4961 = vmatmul.mubr.f32.gmra.mrb[14].mxu0 %v336_v4  ;;  %v9443_v4 = vand.u32 4294901760, %v9424_v1 }
  0x79   :  { %5642 = vmatpush3.bf16.msra.mxu0 %v5639_v55  ;;  %4995 = vmatprep.mubr.f32.mxu0 %v6807_v18  ;;  %v9442_v55 = vld [vmem:[#allocation33_spill] sm:$0xff] }
  0x7a   :  { %5644 = vmatprep.subr.bf16.mxu0 %v5643_v22 }
  0x7c   :  { %4996 = vmatmul.mubr.f32.vlgmr.msra.gmra.mrb[0].mxu0 %v6825_v25 }
  0x7d   :  { %5646 = vmatpush3.bf16.msra.mxu0 %v5643_v22  ;;  %4998 = vmatprep.mubr.f32.mxu0 %v6852_v38  ;;  %v9444_v22 = vand.u32 4294901760, %v9425_v15 }
  0x7e   :  { %5648 = vmatprep.subr.bf16.mxu0 %v5647_v8 }
  0x80   :  { %4999 = vmatmul.mubr.f32.gmra.mrb[2].mxu0 %v6854_v39 }
  0x81   :  { %5650 = vmatpush3.bf16.msra.mxu0 %v5647_v8  ;;  %5001 = vmatprep.mubr.f32.mxu0 %v6892_v61  ;;  %v9445_v8 = vld [vmem:[#allocation34_spill] sm:$0xff] }
  0x82   :  { %5652 = vmatprep.subr.bf16.mxu0 %v5651_v35 }
  0x84   :  { %5002 = vmatmul.mubr.f32.gmra.mrb[4].mxu0 %v6894_v62 }
  0x85   :  { %5654 = vmatpush3.bf16.msra.mxu0 %v5651_v35  ;;  %5004 = vmatprep.mubr.f32.mxu0 %v6938_v44  ;;  %v9446_v35 = vand.u32 4294901760, %v9427_v58 }
  0x86   :  { %5656 = vmatprep.subr.bf16.mxu0 %v5655_v33 }
  0x88   :  { %5005 = vmatmul.mubr.f32.gmra.mrb[6].mxu0 %v6969_v60 }
  0x89   :  { %5658 = vmatpush3.bf16.msra.mxu0 %v5655_v33  ;;  %5007 = vmatprep.mubr.f32.mxu0 %v6988_v57  ;;  %v9447_v33 = vand.u32 4294901760, %v9428_v11 }
  0x8a   :  { %5660 = vmatprep.subr.bf16.mxu0 %v5659_v34 }
  0x8c   :  { %5008 = vmatmul.mubr.f32.gmra.mrb[8].mxu0 %v6990_v46 }
  0x8d   :  { %5662 = vmatpush3.bf16.msra.mxu0 %v5659_v34  ;;  %5010 = vmatprep.mubr.f32.mxu0 %v7034_v0  ;;  %v9448_v34 = vand.u32 4294901760, %v9430_v43 }
  0x8e   :  { %5664 = vmatprep.subr.bf16.mxu0 %v5663_v40 }
  0x90   :  { %5011 = vmatmul.mubr.f32.gmra.mrb[10].mxu0 %v7060_v54 }
  0x91   :  { %5666 = vmatpush3.bf16.msra.mxu0 %v5663_v40  ;;  %5013 = vmatprep.mubr.f32.mxu0 %v7076_v19  ;;  %v9449_v40 = vand.u32 4294901760, %v9431_v31 }
  0x92   :  { %5668 = vmatprep.subr.bf16.mxu0 %v5667_v49 }
  0x94   :  { %5014 = vmatmul.mubr.f32.gmra.mrb[12].mxu0 %v7107_v45 }
  0x95   :  { %5670 = vmatpush3.bf16.msra.mxu0 %v5667_v49  ;;  %5016 = vmatprep.mubr.f32.mxu0 %v7111_v32  ;;  %v9450_v49 = vand.u32 4294901760, %v7097_v21 }
  0x96   :  { %5672 = vmatprep.subr.bf16.mxu0 %v5671_v59 }
  0x98   :  { %5017 = vmatmul.mubr.f32.gmra.mrb[14].mxu0 %v7132_v41 }
  0x99   :  { %5674 = vmatpush3.bf16.msra.mxu0 %v5671_v59  ;;  %5051 = vmatprep.mubr.f32.mxu0 %v9416_v9  ;;  %v9451_v59 = vand.u32 4294901760, %v7105_v51 }
  0x9a   :  { %5676 = vmatprep.subr.bf16.mxu0 %v9417_v56 }
  0x9c   :  { %5052 = vmatmul.mubr.f32.vlgmr.msra.gmra.mrb[0].mxu0 %v9418_v17  ;;  %v7434_v17 = vld [vmem:[#allocation7 + $0x80] sm:$0xff] }
  0x9d   :  { %5678 = vmatpush3.bf16.msra.mxu0 %v9417_v56  ;;  %5054 = vmatprep.mubr.f32.mxu0 %v9419_v26 }
  0x9e   :  { %5680 = vmatprep.subr.bf16.mxu0 %v9420_v7 }
  0xa0   :  { %5055 = vmatmul.mubr.f32.gmra.mrb[2].mxu0 %v9421_v14  ;;  %v9123_v14 = vand.u32 4294901760, %v7434_v17 }
  0xa1   :  { %5682 = vmatpush3.bf16.msra.mxu0 %v9420_v7  ;;  %5057 = vmatprep.mubr.f32.mxu0 %v9422_v20  ;;  %v7445_v20 = vld [vmem:[#allocation7 + $0x60] sm:$0xff] }
  0xa2   :  { %5684 = vmatprep.subr.bf16.mxu0 %v9423_v48 }
  0xa4   :  { %5058 = vmatmul.mubr.f32.gmra.mrb[4].mxu0 %v9424_v1  ;;  %v7449_v1 = vld [vmem:[#allocation7 + $0x70] sm:$0xff] }
  0xa5   :  { %5686 = vmatpush3.bf16.msra.mxu0 %v9423_v48  ;;  %5060 = vmatprep.mubr.f32.mxu0 %v9425_v15  ;;  %v9122_v15 = vand.u32 4294901760, %v7445_v20 }
  0xa6   :  { %5688 = vmatprep.subr.bf16.mxu0 %v9426_v5 }
  0xa8   :  { %5061 = vmatmul.mubr.f32.gmra.mrb[6].mxu0 %v9427_v58  ;;  %v7454_v58 = vld [vmem:[#allocation7 + $0x88] sm:$0xff] }
  0xa9   :  { %5690 = vmatpush3.bf16.msra.mxu0 %v9426_v5  ;;  %5063 = vmatprep.mubr.f32.mxu0 %v9428_v11  ;;  %v9138_v11 = vand.u32 4294901760, %v7449_v1 }
  0xaa   :  { %5692 = vmatprep.subr.bf16.mxu0 %v9429_v12 }
  0xac   :  { %5064 = vmatmul.mubr.f32.gmra.mrb[8].mxu0 %v9430_v43  ;;  %v9135_v43 = vand.u32 4294901760, %v7454_v58 }
  0xad   :  { %5694 = vmatpush3.bf16.msra.mxu0 %v9429_v12  ;;  %5066 = vmatprep.mubr.f32.mxu0 %v9431_v31 }
  0xae   :  { %5696 = vmatprep.subr.bf16.mxu0 %v9432_v63 }
  0xb0   :  { %5067 = vmatmul.mubr.f32.gmra.mrb[10].mxu0 %v7097_v21  ;;  %v7400_v21 = vld [vmem:[#allocation7 + $0x38] sm:$0xff] }
  0xb1   :  { %5698 = vmatpush3.bf16.msra.mxu0 %v9432_v63  ;;  %5069 = vmatprep.mubr.f32.mxu0 %v7105_v51 }
  0xb2   :  { %5700 = vmatprep.subr.bf16.mxu0 %v9433_v10 }
  0xb4   :  { %5070 = vmatmul.mubr.f32.gmra.mrb[12].mxu0 %v7130_v16 }
  0xb5   :  { %5702 = vmatpush3.bf16.msra.mxu0 %v9433_v10  ;;  %5072 = vmatprep.mubr.f32.mxu0 %v7137_v3  ;;  %v7409_v3 = vld [vmem:[#allocation7 + $0x48] sm:$0xff] }
  0xb6   :  { %5704 = vmatprep.subr.bf16.mxu0 %v9434_v23 }
  0xb8   :  { %5073 = vmatmul.mubr.f32.gmra.mrb[14].mxu0 %v7180_v2 }
  0xb9   :  { %5706 = vmatpush3.bf16.msra.mxu0 %v9434_v23  ;;  %5107 = vmatprep.mubr.f32.mxu0 %v9435_v29 }
  0xba   :  { %5708 = vmatprep.subr.bf16.mxu0 %v9436_v47 }
  0xbc   :  { %5108 = vmatmul.mubr.f32.vlgmr.msra.gmra.mrb[0].mxu0 %v9437_v52  ;;  %v7485_v52 = vld [vmem:[#allocation7 + $0x90] sm:$0xff] }
  0xbd   :  { %5710 = vmatpush3.bf16.msra.mxu0 %v9436_v47  ;;  %5110 = vmatprep.mubr.f32.mxu0 %v9438_v6  ;;  %v7487_v6 = vld [vmem:[#allocation7 + $0xa8] sm:$0xff] }
  0xbe   :  { %5712 = vmatprep.subr.bf16.mxu0 %v9439_v13 }
  0xc0   :  { %5111 = vmatmul.mubr.f32.gmra.mrb[2].mxu0 %v9440_v27  ;;  %v9118_v27 = vand.u32 4294901760, %v7485_v52 }
  0xc1   :  { %5714 = vmatpush3.bf16.msra.mxu0 %v9439_v13  ;;  %5113 = vmatprep.mubr.f32.mxu0 %v9441_v37  ;;  %v7489_v13 = vld [vmem:[#allocation7 + $0xa0] sm:$0xff]  ;;  %v9117_v37 = vand.u32 4294901760, %v7487_v6 }
  0xc2   :  { %5716 = vmatprep.subr.bf16.mxu0 %v9442_v55 }
  0xc4   :  { %5114 = vmatmul.mubr.f32.gmra.mrb[4].mxu0 %v9443_v4  ;;  %v9134_v4 = vand.u32 4294901760, %v7489_v13 }
  0xc5   :  { %5718 = vmatpush3.bf16.msra.mxu0 %v9442_v55  ;;  %5116 = vmatprep.mubr.f32.mxu0 %v9444_v22  ;;  %v7494_v55 = vld [vmem:[#allocation7 + $0xb8] sm:$0xff] }
  0xc6   :  { %5720 = vmatprep.subr.bf16.mxu0 %v9445_v8 }
  0xc8   :  { %5117 = vmatmul.mubr.f32.gmra.mrb[6].mxu0 %v9446_v35  ;;  %v7510_v35 = vpack.c.bf16 %v9117_v37, %v9118_v27  ;;  %v7529_v37 = vld [vmem:[#allocation7 + $0xd0] sm:$0xff] }
  0xc9   :  { %5722 = vmatpush3.bf16.msra.mxu0 %v9445_v8  ;;  %5119 = vmatprep.mubr.f32.mxu0 %v9447_v33  ;;  %v9133_v8 = vand.u32 4294901760, %v7494_v55  ;;  %v7512_v33 = vld [vmem:[#allocation7 + $0xc8] sm:$0xff] }
  0xca   :  { %5724 = vmatprep.subr.bf16.mxu0 %v7172_v28  ;;  %9462 = vst [vmem:[#allocation16_spill] sm:$0xff] %v7510_v35 }
  0xcc   :  { %5120 = vmatmul.mubr.f32.gmra.mrb[8].mxu0 %v9448_v34  ;;  %v7514_v34 = vld [vmem:[#allocation7 + $0xe0] sm:$0xff] }
  0xcd   :  { %5726 = vmatpush3.bf16.msra.mxu0 %v7172_v28  ;;  %5122 = vmatprep.mubr.f32.mxu0 %v9449_v40  ;;  %v7521_v40 = vpack.c.bf16 %v9133_v8, %v9134_v4 }
  0xce   :  { %5728 = vmatprep.subr.bf16.mxu0 %v7176_v42 }
  0xcf   :  { %9463 = vst [vmem:[#allocation27_spill] sm:$0xff] %v7521_v40 }
  0xd0   :  { %5123 = vmatmul.mubr.f32.gmra.mrb[10].mxu0 %v9450_v49  ;;  %v9128_v49 = vand.u32 4294901760, %v7512_v33 }
  0xd1   :  { %5730 = vmatpush3.bf16.msra.mxu0 %v7176_v42  ;;  %5125 = vmatprep.mubr.f32.mxu0 %v9451_v59  ;;  %v9125_v42 = vand.u32 4294901760, %v7409_v3  ;;  %v9127_v59 = vand.u32 4294901760, %v7514_v34 }
  0xd2   :  { %5732 = vmatprep.subr.bf16.mxu0 %v7182_v53 }
  0xd4   :  { %5126 = vmatmul.mubr.f32.gmra.mrb[12].mxu0 %v314_v50  ;;  %v7416_v50 = vld [vmem:[#allocation7 + $0x58] sm:$0xff] }
  0xd5   :  { %5734 = vmatpush3.bf16.msra.mxu0 %v7182_v53  ;;  %5128 = vmatprep.mubr.f32.mxu0 %v324_v36  ;;  %v7411_v53 = vld [vmem:[#allocation7 + $0x40] sm:$0xff] }
  0xd6   :  { %5736 = vmatprep.subr.bf16.mxu0 %v7184_v30 }
  0xd8   :  { %5129 = vmatmul.mubr.f32.gmra.mrb[14].mxu0 %v334_v24  ;;  %v9141_v24 = vand.u32 4294901760, %v7416_v50 }
  0xd9   :  { %5738 = vmatpush3.bf16.msra.mxu0 %v7184_v30  ;;  %5163 = vmatprep.mubr.f32.mxu0 %v6807_v18  ;;  %v9144_v30 = vand.u32 4294901760, %v7411_v53 }
  0xda   :  { %5740 = vmatprep.subr.bf16.mxu0 %v9417_v56 }
  0xdb   :  { %v7441_v26 = vpack.c.bf16 %v9141_v24, %v9144_v30  ;;  %v7594_v24 = vld [vmem:[#allocation7 + $0x140] sm:$0xff] }
  0xdc   :  { %5164 = vmatmul.mubr.f32.vlgmr.msra.gmra.mrb[0].mxu0 %v6825_v25  ;;  %v9165_v30 = vand.u32 4294901760, %v7594_v24 }
  0xdd   :  { %5742 = vmatpush3.bf16.msra.mxu0 %v9417_v56  ;;  %5166 = vmatprep.mubr.f32.mxu0 %v6852_v38  ;;  %v7432_v56 = vld [vmem:[#allocation7 + $0x68] sm:$0xff]  ;;  %9457 = vst [vmem:[#allocation20_spill] sm:$0xff] %v7441_v26 }
  0xde   :  { %5744 = vmatprep.subr.bf16.mxu0 %v9420_v7 }
  0xe0   :  { %5167 = vmatmul.mubr.f32.gmra.mrb[2].mxu0 %v6854_v39 }
  0xe1   :  { %5746 = vmatpush3.bf16.msra.mxu0 %v9420_v7  ;;  %5169 = vmatprep.mubr.f32.mxu0 %v6892_v61  ;;  %v9124_v7 = vand.u32 4294901760, %v7432_v56 }
  0xe2   :  { %5748 = vmatprep.subr.bf16.mxu0 %v9423_v48 }
  0xe4   :  { %5170 = vmatmul.mubr.f32.gmra.mrb[4].mxu0 %v6894_v62 }
  0xe5   :  { %5750 = vmatpush3.bf16.msra.mxu0 %v9423_v48  ;;  %5172 = vmatprep.mubr.f32.mxu0 %v6938_v44  ;;  %v7447_v48 = vld [vmem:[#allocation7 + $0x78] sm:$0xff] }
  0xe6   :  { %5752 = vmatprep.subr.bf16.mxu0 %v9426_v5 }
  0xe8   :  { %5173 = vmatmul.mubr.f32.gmra.mrb[6].mxu0 %v6969_v60 }
  0xe9   :  { %5754 = vmatpush3.bf16.msra.mxu0 %v9426_v5  ;;  %5175 = vmatprep.mubr.f32.mxu0 %v6988_v57  ;;  %v9121_v5 = vand.u32 4294901760, %v7447_v48 }
  0xea   :  { %5756 = vmatprep.subr.bf16.mxu0 %v9429_v12 }
  0xeb   :  { %v7470_v31 = vpack.c.bf16 %v9121_v5, %v9122_v15  ;;  %v9137_v5 = vand.u32 4294901760, %v7529_v37  ;;  %v7542_v15 = vpack.c.bf16 %v9127_v59, %v9128_v49 }
  0xec   :  { %5176 = vmatmul.mubr.f32.gmra.mrb[8].mxu0 %v6990_v46 }
  0xed   :  { %5758 = vmatpush3.bf16.msra.mxu0 %v9429_v12  ;;  %5178 = vmatprep.mubr.f32.mxu0 %v7034_v0  ;;  %v7462_v12 = vpack.c.bf16 %v9123_v14, %v9124_v7  ;;  %9459 = vst [vmem:[#allocation14_spill] sm:$0xff] %v7470_v31  ;;  %9464 = vst [vmem:[#allocation28_spill] sm:$0xff] %v7542_v15 }
  0xee   :  { %5760 = vmatprep.subr.bf16.mxu0 %v9432_v63 }
  0xef   :  { %9458 = vst [vmem:[#allocation22_spill] sm:$0xff] %v7462_v12 }
  0xf0   :  { %5179 = vmatmul.mubr.f32.gmra.mrb[10].mxu0 %v7060_v54 }
  0xf1   :  { %5762 = vmatpush3.bf16.msra.mxu0 %v9432_v63  ;;  %5181 = vmatprep.mubr.f32.mxu0 %v7076_v19  ;;  %v7472_v63 = vld [vmem:[#allocation7 + $0x98] sm:$0xff] }
  0xf2   :  { %5764 = vmatprep.subr.bf16.mxu0 %v9433_v10  ;;  %v9120_v29 = vand.u32 4294901760, %v7472_v63 }
  0xf4   :  { %5182 = vmatmul.mubr.f32.gmra.mrb[12].mxu0 %v7107_v45 }
  0xf5   :  { %5766 = vmatpush3.bf16.msra.mxu0 %v9433_v10  ;;  %5184 = vmatprep.mubr.f32.mxu0 %v7111_v32  ;;  %v7474_v10 = vld [vmem:[#allocation7 + $0xb0] sm:$0xff] }
  0xf6   :  { %5768 = vmatprep.subr.bf16.mxu0 %v9434_v23  ;;  %v9119_v47 = vand.u32 4294901760, %v7474_v10 }
  0xf8   :  { %5185 = vmatmul.mubr.f32.gmra.mrb[14].mxu0 %v7132_v41  ;;  %v7502_v22 = vpack.c.bf16 %v9119_v47, %v9120_v29  ;;  %v7534_v29 = vld [vmem:[#allocation7 + $0xe8] sm:$0xff] }
  0xf9   :  { %5770 = vmatpush3.bf16.msra.mxu0 %v9434_v23  ;;  %5219 = vmatprep.mubr.f32.mxu0 %v6807_v18  ;;  %v7362_v18 = vld [vmem:[#allocation7 + $0x8] sm:$0xff]  ;;  %v7481_v23 = vpack.c.bf16 %v9135_v43, %v9138_v11  ;;  %v9136_v14 = vand.u32 4294901760, %v7534_v29  ;;  %v7574_v43 = vld [vmem:[#allocation7 + $0x118] sm:$0xff] }
  0xfa   :  { %9461 = vst [vmem:[#allocation26_spill] sm:$0xff] %v7502_v22  ;;  %v9153_v11 = vand.u32 4294901760, %v7574_v43 }
  0xfb   :  { %9460 = vst [vmem:[#allocation23_spill] sm:$0xff] %v7481_v23  ;;  %v7561_v59 = vpack.c.bf16 %v9136_v14, %v9137_v5 }
  0xfc   :  { %5220 = vmatmul.mubr.f32.vlgmr.msra.gmra.mrb[0].mxu0 %v6825_v25  ;;  %v7364_v25 = vld [vmem:[#allocation7 + $0x20] sm:$0xff] }
  0xfd   :  { %5222 = vmatprep.mubr.f32.mxu0 %v6852_v38  ;;  %v9116_v38 = vand.u32 4294901760, %v7362_v18  ;;  %9466 = vst [vmem:[#allocation29_spill] sm:$0xff] %v7561_v59 }
 0x100   :  { %5223 = vmatmul.mubr.f32.gmra.mrb[2].mxu0 %v6854_v39  ;;  %v9115_v39 = vand.u32 4294901760, %v7364_v25 }
 0x101   :  { %5225 = vmatprep.mubr.f32.mxu0 %v6892_v61 }
 0x102   :  { %v7383_v2 = vpack.c.bf16 %v9115_v39, %v9116_v38  ;;  %v7525_v39 = vld [vmem:[#allocation7 + $0xc0] sm:$0xff]  ;;  %v7527_v38 = vld [vmem:[#allocation7 + $0xd8] sm:$0xff] }
 0x103   :  { %v9132_v27 = vand.u32 4294901760, %v7525_v39  ;;  %v9131_v47 = vand.u32 4294901760, %v7527_v38 }
 0x104   :  { %5226 = vmatmul.mubr.f32.gmra.mrb[4].mxu0 %v6894_v62  ;;  %v7376_v62 = vld [vmem:[#allocation7 + $0x28] sm:$0xff]  ;;  %9452 = vst [vmem:[#allocation15_spill] sm:$0xff] %v7383_v2  ;;  %5772 = vmatprep.subr.bf16.mxu1 %v7383_v2 }
 0x105   :  { %5228 = vmatprep.mubr.f32.mxu0 %v6938_v44  ;;  %v9145_v44 = vand.u32 4294901760, %v7376_v62  ;;  %v7550_v7 = vpack.c.bf16 %v9131_v47, %v9132_v27  ;;  %v7567_v47 = vld [vmem:[#allocation7 + $0x108] sm:$0xff]  ;;  %v7569_v27 = vld [vmem:[#allocation7 + $0x100] sm:$0xff] }
 0x106   :  { %v9146_v4 = vand.u32 4294901760, %v7567_v47  ;;  %v9154_v14 = vand.u32 4294901760, %v7569_v27 }
 0x107   :  { %9465 = vst [vmem:[#allocation18_spill] sm:$0xff] %v7550_v7 }
 0x108   :  { %5229 = vmatmul.mubr.f32.gmra.mrb[6].mxu0 %v6969_v60  ;;  %v7372_v60 = vld [vmem:[#allocation7 + $0x10] sm:$0xff] }
 0x109   :  { %5231 = vmatprep.mubr.f32.mxu0 %v6988_v57  ;;  %v7370_v57 = vld [vmem:[#allocation7 + $0x18] sm:$0xff] }
 0x10a   :  { %v9139_v61 = vand.u32 4294901760, %v7370_v57 }
 0x10c   :  { %5232 = vmatmul.mubr.f32.gmra.mrb[8].mxu0 %v6990_v46  ;;  %v7368_v46 = vld [vmem:[#allocation7] sm:$0xff] }
 0x10d   :  { %5234 = vmatprep.mubr.f32.mxu0 %v7034_v0  ;;  %v9148_v0 = vand.u32 4294901760, %v7372_v60 }
 0x110   :  { %5235 = vmatmul.mubr.f32.gmra.mrb[10].mxu0 %v7060_v54  ;;  %v7397_v54 = vpack.c.bf16 %v9145_v44, %v9148_v0  ;;  %v7605_v44 = vld [vmem:[#allocation7 + $0x120] sm:$0xff] }
 0x111   :  { %5237 = vmatprep.mubr.f32.mxu0 %v7076_v19  ;;  %v9140_v19 = vand.u32 4294901760, %v7368_v46  ;;  %v9168_v0 = vand.u32 4294901760, %v7605_v44 }
 0x112   :  { %9454 = vst [vmem:[#allocation17_spill] sm:$0xff] %v7397_v54  ;;  %5964 = vmatprep.subr.bf16.mxu0 %v7397_v54 }
 0x113   :  { %v7390_v51 = vpack.c.bf16 %v9139_v61, %v9140_v19  ;;  %5966 = vmatpush3.bf16.msra.mxu0 %v7397_v54  ;;  %v7592_v19 = vld [vmem:[#allocation7 + $0x128] sm:$0xff] }
 0x114   :  { %5238 = vmatmul.mubr.f32.gmra.mrb[12].mxu0 %v7107_v45  ;;  %v7402_v45 = vld [vmem:[#allocation7 + $0x50] sm:$0xff]  ;;  %5968 = vmatprep.subr.bf16.mxu0 %v7441_v26 }
 0x115   :  { %5240 = vmatprep.mubr.f32.mxu0 %v7111_v32  ;;  %9453 = vst [vmem:[#allocation12_spill] sm:$0xff] %v7390_v51  ;;  %5774 = vmatpush1.bf16.msra.mxu1 %v7390_v51  ;;  %v9130_v32 = vand.u32 4294901760, %v7400_v21  ;;  %v9129_v16 = vand.u32 4294901760, %v7402_v45 }
 0x117   :  { %v7423_v36 = vpack.c.bf16 %v9129_v16, %v9130_v32  ;;  %5970 = vmatpush3.bf16.msra.mxu0 %v7441_v26  ;;  %v7565_v32 = vld [vmem:[#allocation7 + $0xf0] sm:$0xff] }
 0x118   :  { %5241 = vmatmul.mubr.f32.gmra.mrb[14].mxu0 %v7132_v41  ;;  %v7407_v41 = vld [vmem:[#allocation7 + $0x30] sm:$0xff]  ;;  %5972 = vmatprep.subr.bf16.mxu0 %v7481_v23  ;;  %v9147_v8 = vand.u32 4294901760, %v7565_v32 }
 0x119   :  { %v9126_v28 = vand.u32 4294901760, %v7407_v41  ;;  %9455 = vst [vmem:[#allocation19_spill] sm:$0xff] %v7423_v36  ;;  %5776 = vmatprep.subr.bf16.mxu1 %v7423_v36  ;;  %v7655_v36 = vld [vmem:[#allocation7 + $0x150] sm:$0xff] }
 0x11a   :  { %v7590_v61 = vpack.c.bf16 %v9146_v4, %v9147_v8  ;;  %v7607_v4 = vld [vmem:[#allocation7 + $0x138] sm:$0xff]  ;;  %v7609_v8 = vld [vmem:[#allocation7 + $0x130] sm:$0xff] }
 0x11b   :  { %v7430_v9 = vpack.c.bf16 %v9125_v42, %v9126_v28  ;;  %5974 = vmatpush3.bf16.msra.mxu0 %v7481_v23  ;;  %v7552_v42 = vld [vmem:[#allocation7 + $0xf8] sm:$0xff]  ;;  %v7554_v28 = vld [vmem:[#allocation7 + $0x110] sm:$0xff] }
 0x11c   :  { %5976 = vmatprep.subr.bf16.mxu0 %v7521_v40  ;;  %v9143_v49 = vand.u32 4294901760, %v7552_v42  ;;  %v9142_v16 = vand.u32 4294901760, %v7554_v28  ;;  %9468 = vst [vmem:[#allocation21_spill] sm:$0xff] %v7590_v61 }
 0x11d   :  { %9456 = vst [vmem:[#allocation13_spill] sm:$0xff] %v7430_v9  ;;  %5778 = vmatpush1.bf16.msra.mxu1 %v7430_v9 }
 0x11e   :  { %5780 = vmatprep.subr.bf16.mxu1 %v7462_v12  ;;  %v7582_v5 = vpack.c.bf16 %v9142_v16, %v9143_v49  ;;  %v7601_v16 = vpack.c.bf16 %v9153_v11, %v9154_v14  ;;  %v9166_v49 = vand.u32 4294901760, %v7592_v19  ;;  %v7634_v11 = vld [vmem:[#allocation7 + $0x170] sm:$0xff] }
 0x11f   :  { %5978 = vmatpush3.bf16.msra.mxu0 %v7521_v40  ;;  %v9187_v9 = vand.u32 4294901760, %v7634_v11  ;;  %v9493_v40 = vand.u32 4294901760, %v7370_v57 }
 0x120   :  { %5980 = vmatprep.subr.bf16.mxu0 %v7561_v59  ;;  %9467 = vst [vmem:[#allocation30_spill] sm:$0xff] %v7582_v5  ;;  %9469 = vst [vmem:[#allocation24_spill] sm:$0xff] %v7601_v16  ;;  %v7622_v14 = vpack.c.bf16 %v9165_v30, %v9166_v49  ;;  %v9474_v30 = vand.u32 4294901760, %v7376_v62 }
 0x121   :  { %5782 = vmatpush1.bf16.msra.mxu1 %v7470_v31 }
 0x122   :  { %5784 = vmatprep.subr.bf16.mxu1 %v7502_v22  ;;  %9470 = vst [vmem:[#allocation25_spill] sm:$0xff] %v7622_v14  ;;  %v9472_v22 = vand.u32 4294901760, %v7372_v60  ;;  %v7644_v49 = vsub.f32 %v7376_v62, %v9474_v30  ;;  %v9480_v30 = vand.u32 4294901760, %v7655_v36 }
 0x123   :  { %5982 = vmatpush3.bf16.msra.mxu0 %v7561_v59  ;;  %v9483_v59 = vand.u32 4294901760, %v7411_v53 }
 0x124   :  { %5984 = vmatprep.subr.bf16.mxu0 %v7601_v16  ;;  %v7639_v31 = vsub.f32 %v7372_v60, %v9472_v22  ;;  %9475 = vst [vmem:[#allocation33_spill] sm:$0xff] %v7644_v49  ;;  %v7657_v60 = vld [vmem:[#allocation7 + $0x168] sm:$0xff]  ;;  %v7659_v22 = vld [vmem:[#allocation7 + $0x160] sm:$0xff] }
 0x125   :  { %5786 = vmatpush1.bf16.msra.mxu1 %v7510_v35  ;;  %v7632_v35 = vld [vmem:[#allocation7 + $0x158] sm:$0xff] }
 0x126   :  { %5788 = vmatprep.subr.bf16.mxu1 %v7542_v15  ;;  %9473 = vst [vmem:[#allocation32_spill] sm:$0xff] %v7639_v31  ;;  %v9476_v15 = vand.u32 4294901760, %v7609_v8  ;;  %v9188_v12 = vand.u32 4294901760, %v7632_v35 }
 0x127   :  { %5986 = vmatpush3.bf16.msra.mxu0 %v7601_v16 }
 0x128   :  { %v7673_v51 = vpack.c.bf16 %v9187_v9, %v9188_v12  ;;  %v7690_v9 = vsub.f32 %v7411_v53, %v9483_v59  ;;  %v9485_v12 = vand.u32 4294901760, %v7416_v50 }
 0x129   :  { %5790 = vmatpush1.bf16.msra.mxu1 %v7550_v7  ;;  %v7614_v7 = vld [vmem:[#allocation7 + $0x148] sm:$0xff] }
 0x12a   :  { %5792 = vmatprep.subr.bf16.mxu1 %v7582_v5  ;;  %v9167_v5 = vand.u32 4294901760, %v7607_v4  ;;  %9479 = vst [vmem:[#allocation35_spill] sm:$0xff] %v7673_v51  ;;  %9484 = vst [vmem:[#allocation37_spill] sm:$0xff] %v7690_v9  ;;  %v7695_v62 = vsub.f32 %v7416_v50, %v9485_v12  ;;  %v9198_v59 = vand.u32 4294901760, %v7690_v9  ;;  %v9491_v12 = vand.u32 4294901760, %v7368_v46 }
 0x12c   :  { %9486 = vst [vmem:[#allocation38_spill] sm:$0xff] %v7695_v62  ;;  %v9203_v50 = vand.u32 4294901760, %v7695_v62 }
 0x12d   :  { %5794 = vmatpush1.bf16.msra.mxu1 %v7590_v61  ;;  %v7630_v61 = vpack.c.bf16 %v9167_v5, %v9168_v0  ;;  %v9477_v5 = vand.u32 4294901760, %v7614_v7 }
 0x12e   :  { %5796 = vmatprep.subr.bf16.mxu1 %v7622_v14  ;;  %v7664_v14 = vld [vmem:[#allocation7 + $0x178] sm:$0xff] }
 0x12f   :  { %9471 = vst [vmem:[#allocation31_spill] sm:$0xff] %v7630_v61  ;;  %v7651_v0 = vpack.c.bf16 %v9477_v5, %v9476_v15  ;;  %v9189_v5 = vand.u32 4294901760, %v7639_v31  ;;  %v9481_v15 = vand.u32 4294901760, %v7657_v60 }
 0x131   :  { %9478 = vst [vmem:[#allocation34_spill] sm:$0xff] %v7651_v0  ;;  %5798 = vmatpush1.bf16.msra.mxu1 %v7630_v61  ;;  %5988 = vmatprep.subr.bf16.mxu0 %v7651_v0  ;;  %v7682_v2 = vpack.c.bf16 %v9481_v15, %v9480_v30  ;;  %v3399_v16 = vsub.f32 %v7639_v31, %v9189_v5  ;;  %v9487_v61 = vand.u32 4294901760, %v7659_v22  ;;  %v9488_v30 = vand.u32 4294901760, %v7664_v14 }
 0x132   :  { %5990 = vmatpush3.bf16.msra.mxu0 %v7651_v0  ;;  %5800 = vmatprep.subr.bf16.mxu1 %v7673_v51  ;;  %v9490_v5 = vand.u32 4294901760, %v7644_v49  ;;  %v7713_v51 = vsub.f32 %v7368_v46, %v9491_v12  ;;  %v9204_v46 = vmov 0.0   ;;  %v9495_v12 = vand.u32 4294901760, %v7449_v1 }
 0x133   :  { %9482 = vst [vmem:[#allocation36_spill] sm:$0xff] %v7682_v2  ;;  %v7702_v15 = vpack.c.bf16 %v9488_v30, %v9487_v61  ;;  %v3400_v53 = vand.u32 4294901760, %v3399_v16  ;;  %v7718_v61 = vsub.f32 %v7370_v57, %v9493_v40  ;;  %v3413_v16 = vsub.f32 %v7690_v9, %v9198_v59  ;;  %1660 = vmatprep.mubr.f32.mxu1 %v9204_v46 }
 0x134   :  { %v3406_v0 = vsub.f32 %v7644_v49, %v9490_v5  ;;  %9492 = vst [vmem:[#allocation40_spill] sm:$0xff] %v7713_v51  ;;  %v3420_v30 = vsub.f32 %v7695_v62, %v9203_v50  ;;  %v7732_v57 = vsub.f32 %v7449_v1, %v9495_v12  ;;  %v9497_v40 = vand.u32 4294901760, %v7454_v58 }
 0x135   :  { %9489 = vst [vmem:[#allocation39_spill] sm:$0xff] %v7702_v15  ;;  %5802 = vmatpush1.bf16.msra.mxu1 %v7682_v2  ;;  %9494 = vst [vmem:[#allocation41_spill] sm:$0xff] %v7718_v61  ;;  %5992 = vmatprep.subr.bf16.mxu0 %v7702_v15  ;;  %v3414_v59 = vand.u32 4294901760, %v3413_v16  ;;  %v9501_v1 = vand.u32 4294901760, %v7489_v13 }
 0x136   :  { %5994 = vmatpush3.bf16.msra.mxu0 %v7702_v15  ;;  %v3407_v5 = vand.u32 4294901760, %v3406_v0  ;;  %9496 = vst [vmem:[#allocation42_spill] sm:$0xff] %v7732_v57  ;;  %v7737_v0 = vsub.f32 %v7454_v58, %v9497_v40  ;;  %v3421_v15 = vand.u32 4294901760, %v3420_v30  ;;  %v9207_v23 = vand.u32 4294901760, %v7732_v57 }
 0x137   :  { %v7749_v12 = vsub.f32 %v7489_v13, %v9501_v1  ;;  %v9503_v58 = vand.u32 4294901760, %v7494_v55  ;;  %v9507_v30 = vand.u32 4294901760, %v7402_v45  ;;  %v9511_v40 = vand.u32 4294901760, %v7409_v3 }
 0x138   :  { %9498 = vst [vmem:[#allocation43_spill] sm:$0xff] %v7737_v0  ;;  %v7739_v2 = vpack.c.bf16 %v3407_v5, %v3400_v53  ;;  %v9206_v50 = vand.u32 4294901760, %v7737_v0  ;;  %v7744_v46 = vpack.c.bf16 %v3421_v15, %v3414_v59  ;;  %v9505_v5 = vand.u32 4294901760, %v7400_v21 }
 0x139   :  { %9502 = vst [vmem:[#allocation46_spill] sm:$0xff] %v7749_v12  ;;  %v7754_v53 = vsub.f32 %v7494_v55, %v9503_v58  ;;  %v7764_v15 = vsub.f32 %v7402_v45, %v9507_v30  ;;  %v9509_v59 = vand.u32 4294901760, %v7407_v41  ;;  %v7774_v55 = vsub.f32 %v7409_v3, %v9511_v40 }
 0x13a   :  { %9499 = vst [vmem:[#allocation44_spill] sm:$0xff] %v7739_v2  ;;  %5996 = vmatprep.subr.bf16.mxu0 %v7739_v2  ;;  %9500 = vst [vmem:[#allocation45_spill] sm:$0xff] %v7744_v46  ;;  %v7759_v16 = vsub.f32 %v7400_v21, %v9505_v5  ;;  %v3427_v21 = vsub.f32 %v7732_v57, %v9207_v23  ;;  %v3434_v1 = vsub.f32 %v7737_v0, %v9206_v50 }
 0x13b   :  { %9504 = vst [vmem:[#allocation47_spill] sm:$0xff] %v7754_v53  ;;  %9508 = vst [vmem:[#allocation49_spill] sm:$0xff] %v7764_v15  ;;  %v7769_v13 = vsub.f32 %v7407_v41, %v9509_v59  ;;  %v9208_v45 = vand.u32 4294901760, %v7749_v12  ;;  %v9211_v58 = vand.u32 4294901760, %v7754_v53  ;;  %v9513_v59 = vand.u32 4294901760, %v7432_v56 }
 0x13c   :  { %9506 = vst [vmem:[#allocation48_spill] sm:$0xff] %v7759_v16  ;;  %9512 = vst [vmem:[#allocation51_spill] sm:$0xff] %v7774_v55  ;;  %v3428_v5 = vand.u32 4294901760, %v3427_v21  ;;  %v3435_v41 = vand.u32 4294901760, %v3434_v1  ;;  %v9515_v50 = vand.u32 4294901760, %v7434_v17  ;;  %v9517_v21 = vand.u32 4294901760, %v7445_v20 }
 0x13d   :  { %9510 = vst [vmem:[#allocation50_spill] sm:$0xff] %v7769_v13  ;;  %v3441_v30 = vsub.f32 %v7749_v12, %v9208_v45  ;;  %v3448_v3 = vsub.f32 %v7754_v53, %v9211_v58  ;;  %v7793_v40 = vsub.f32 %v7432_v56, %v9513_v59  ;;  %v9519_v45 = vand.u32 4294901760, %v7447_v48 }
 0x13e   :  { %v7798_v23 = vsub.f32 %v7434_v17, %v9515_v50  ;;  %v7803_v1 = vsub.f32 %v7445_v20, %v9517_v21  ;;  %v7810_v58 = vpack.c.bf16 %v3435_v41, %v3428_v5  ;;  %v9522_v59 = vand.u32 4294901760, %v7529_v37 }
 0x13f   :  { %9514 = vst [vmem:[#allocation52_spill] sm:$0xff] %v7793_v40  ;;  %v7808_v26 = vsub.f32 %v7447_v48, %v9519_v45  ;;  %v3442_v54 = vand.u32 4294901760, %v3441_v30  ;;  %v3449_v56 = vand.u32 4294901760, %v3448_v3  ;;  %v9524_v17 = vand.u32 4294901760, %v7534_v29 }
 0x140   :  { %9516 = vst [vmem:[#allocation53_spill] sm:$0xff] %v7798_v23  ;;  %9518 = vst [vmem:[#allocation54_spill] sm:$0xff] %v7803_v1  ;;  %v7815_v46 = vsub.f32 %v7529_v37, %v9522_v59  ;;  %v9527_v48 = vand.u32 4294901760, %v7569_v27  ;;  %v9529_v5 = vand.u32 4294901760, %v7574_v43  ;;  %v9531_v37 = vand.u32 4294901760, %v7472_v63 }
 0x141   :  { %9520 = vst [vmem:[#allocation55_spill] sm:$0xff] %v7808_v26  ;;  %9521 = vst [vmem:[#allocation56_spill] sm:$0xff] %v7810_v58  ;;  %v7820_v50 = vsub.f32 %v7534_v29, %v9524_v17  ;;  %v7822_v20 = vpack.c.bf16 %v3449_v56, %v3442_v54  ;;  %v9533_v54 = vand.u32 4294901760, %v7474_v10  ;;  %v9535_v3 = vand.u32 4294901760, %v7485_v52 }
 0x142   :  { %9523 = vst [vmem:[#allocation57_spill] sm:$0xff] %v7815_v46  ;;  %v9217_v21 = vand.u32 4294901760, %v7815_v46  ;;  %v7828_v45 = vsub.f32 %v7569_v27, %v9527_v48  ;;  %v7833_v41 = vsub.f32 %v7574_v43, %v9529_v5  ;;  %v7838_v30 = vsub.f32 %v7472_v63, %v9531_v37 }
 0x143   :  { %9525 = vst [vmem:[#allocation58_spill] sm:$0xff] %v7820_v50  ;;  %9526 = vst [vmem:[#allocation59_spill] sm:$0xff] %v7822_v20  ;;  %v7843_v29 = vsub.f32 %v7474_v10, %v9533_v54  ;;  %v7848_v27 = vsub.f32 %v7485_v52, %v9535_v3  ;;  %v9537_v56 = vand.u32 4294901760, %v7487_v6  ;;  %v9215_v59 = vand.u32 4294901760, %v7820_v50 }
 0x144   :  { %9528 = vst [vmem:[#allocation60_spill] sm:$0xff] %v7828_v45  ;;  %9530 = vst [vmem:[#allocation61_spill] sm:$0xff] %v7833_v41  ;;  %v9216_v63 = vand.u32 4294901760, %v7828_v45  ;;  %v9218_v17 = vand.u32 4294901760, %v7833_v41  ;;  %v7861_v10 = vsub.f32 %v7815_v46, %v9217_v21  ;;  %v9539_v48 = vand.u32 4294901760, %v7512_v33 }
 0x145   :  { %9532 = vst [vmem:[#allocation62_spill] sm:$0xff] %v7838_v30  ;;  %9534 = vst [vmem:[#allocation63_spill] sm:$0xff] %v7843_v29  ;;  %v7853_v43 = vsub.f32 %v7487_v6, %v9537_v56  ;;  %v9541_v5 = vand.u32 4294901760, %v7514_v34  ;;  %v9543_v37 = vand.u32 4294901760, %v7525_v39  ;;  %v9545_v3 = vand.u32 4294901760, %v7527_v38 }
 0x146   :  { %9536 = vst [vmem:[#allocation64_spill] sm:$0xff] %v7848_v27  ;;  %v7866_v52 = vsub.f32 %v7512_v33, %v9539_v48  ;;  %v7886_v33 = vsub.f32 %v7820_v50, %v9215_v59  ;;  %v9547_v48 = vand.u32 4294901760, %v7362_v18  ;;  %v9555_v58 = vand.u32 4294901760, %v7659_v22 }
 0x147   :  { %9538 = vst [vmem:[#allocation65_spill] sm:$0xff] %v7853_v43  ;;  %v7871_v6 = vsub.f32 %v7514_v34, %v9541_v5  ;;  %v7876_v54 = vsub.f32 %v7525_v39, %v9543_v37  ;;  %v7881_v56 = vsub.f32 %v7527_v38, %v9545_v3  ;;  %v7891_v34 = vsub.f32 %v7828_v45, %v9216_v63 }
 0x148   :  { %9540 = vst [vmem:[#allocation66_spill] sm:$0xff] %v7866_v52  ;;  %v3476_v39 = vsub.f32 %v7833_v41, %v9218_v17  ;;  %v7899_v5 = vsub.f32 %v7362_v18, %v9547_v48  ;;  %v9549_v38 = vand.u32 4294901760, %v7364_v25  ;;  %v9551_v3 = vand.u32 4294901760, %v7609_v8 }
 0x149   :  { %9542 = vst [vmem:[#allocation67_spill] sm:$0xff] %v7871_v6  ;;  %9544 = vst [vmem:[#allocation68_spill] sm:$0xff] %v7876_v54  ;;  %v9553_v63 = vand.u32 4294901760, %v7614_v7  ;;  %v3456_v17 = vand.u32 4294901760, %v7861_v10  ;;  %v3463_v18 = vand.u32 4294901760, %v7886_v33  ;;  %v3470_v48 = vand.u32 4294901760, %v7891_v34 }
 0x14a   :  { %9546 = vst [vmem:[#allocation69_spill] sm:$0xff] %v7881_v56  ;;  %9548 = vst [vmem:[#allocation70_spill] sm:$0xff] %v7899_v5  ;;  %v7904_v37 = vsub.f32 %v7364_v25, %v9549_v38  ;;  %v7909_v59 = vsub.f32 %v7609_v8, %v9551_v3  ;;  %v3477_v20 = vand.u32 4294901760, %v3476_v39  ;;  %v7924_v8 = vsub.f32 %v7659_v22, %v9555_v58 }
 0x14b   :  { %v7914_v21 = vsub.f32 %v7614_v7, %v9553_v63  ;;  %v9557_v3 = vand.u32 4294901760, %v7664_v14  ;;  %v9559_v63 = vand.u32 4294901760, %v7552_v42  ;;  %v9561_v33 = vand.u32 4294901760, %v7554_v28 }
 0x14c   :  { %9550 = vst [vmem:[#allocation71_spill] sm:$0xff] %v7904_v37  ;;  %9552 = vst [vmem:[#allocation72_spill] sm:$0xff] %v7909_v59  ;;  %v9563_v39 = vand.u32 4294901760, %v7565_v32  ;;  %v9565_v58 = vand.u32 4294901760, %v7567_v47  ;;  %v9232_v38 = vand.u32 4294901760, %v7718_v61  ;;  %v9584_v2 = vand.u32 4294901760, %v7769_v13 }
 0x14d   :  { %9554 = vst [vmem:[#allocation73_spill] sm:$0xff] %v7914_v21  ;;  %9556 = vst [vmem:[#allocation74_spill] sm:$0xff] %v7924_v8  ;;  %v7929_v7 = vsub.f32 %v7664_v14, %v9557_v3  ;;  %v7934_v10 = vsub.f32 %v7552_v42, %v9559_v63  ;;  %v7939_v34 = vsub.f32 %v7554_v28, %v9561_v33  ;;  %v9567_v3 = vand.u32 4294901760, %v7592_v19 }
 0x14e   :  { %v7944_v22 = vsub.f32 %v7565_v32, %v9563_v39  ;;  %v7949_v14 = vsub.f32 %v7567_v47, %v9565_v58  ;;  %v9569_v63 = vand.u32 4294901760, %v7594_v24  ;;  %v9571_v33 = vand.u32 4294901760, %v7605_v44 }
 0x14f   :  { %9558 = vst [vmem:[#allocation75_spill] sm:$0xff] %v7929_v7  ;;  %9560 = vst [vmem:[#allocation76_spill] sm:$0xff] %v7934_v10  ;;  %v7954_v42 = vsub.f32 %v7592_v19, %v9567_v3  ;;  %v9573_v39 = vand.u32 4294901760, %v7607_v4  ;;  %v9575_v58 = vand.u32 4294901760, %v7632_v35  ;;  %v9577_v3 = vand.u32 4294901760, %v7634_v11 }
 0x150   :  { %9562 = vst [vmem:[#allocation77_spill] sm:$0xff] %v7939_v34  ;;  %9564 = vst [vmem:[#allocation78_spill] sm:$0xff] %v7944_v22  ;;  %v7959_v28 = vsub.f32 %v7594_v24, %v9569_v63  ;;  %v7964_v32 = vsub.f32 %v7605_v44, %v9571_v33  ;;  %v9579_v63 = vand.u32 4294901760, %v7655_v36  ;;  %v9581_v33 = vand.u32 4294901760, %v7657_v60 }
 0x151   :  { %9566 = vst [vmem:[#allocation79_spill] sm:$0xff] %v7949_v14  ;;  %9568 = vst [vmem:[#allocation80_spill] sm:$0xff] %v7954_v42  ;;  %v7969_v47 = vsub.f32 %v7607_v4, %v9573_v39  ;;  %v7974_v19 = vsub.f32 %v7632_v35, %v9575_v58  ;;  %v7979_v24 = vsub.f32 %v7634_v11, %v9577_v3  ;;  %v9221_v39 = vand.u32 4294901760, %v7899_v5 }
 0x152   :  { %9570 = vst [vmem:[#allocation81_spill] sm:$0xff] %v7959_v28  ;;  %9572 = vst [vmem:[#allocation82_spill] sm:$0xff] %v7964_v32  ;;  %v7984_v44 = vsub.f32 %v7655_v36, %v9579_v63  ;;  %v7989_v4 = vsub.f32 %v7657_v60, %v9581_v33  ;;  %v9223_v35 = vand.u32 4294901760, %v7904_v37  ;;  %v9226_v58 = vand.u32 4294901760, %v7713_v51 }
 0x153   :  { %9574 = vst [vmem:[#allocation83_spill] sm:$0xff] %v7969_v47  ;;  %9576 = vst [vmem:[#allocation84_spill] sm:$0xff] %v7974_v19  ;;  %v9237_v11 = vand.u32 4294901760, %v7759_v16  ;;  %v1840_v60 = vsub.f32 %v7899_v5, %v9221_v39  ;;  %v1858_v3 = vsub.f32 %v7718_v61, %v9232_v38  ;;  %v9583_v36 = vand.u32 4294901760, %v7764_v15 }
 0x154   :  { %9578 = vst [vmem:[#allocation85_spill] sm:$0xff] %v7979_v24  ;;  %9580 = vst [vmem:[#allocation86_spill] sm:$0xff] %v7984_v44  ;;  %v1852_v33 = vsub.f32 %v7904_v37, %v9223_v35  ;;  %v1846_v25 = vsub.f32 %v7713_v51, %v9226_v58  ;;  %v1870_v35 = vsub.f32 %v7769_v13, %v9584_v2  ;;  %v9585_v37 = vand.u32 4294901760, %v7774_v55 }
 0x155   :  { %9582 = vst [vmem:[#allocation87_spill] sm:$0xff] %v7989_v4  ;;  %v1864_v63 = vsub.f32 %v7759_v16, %v9237_v11  ;;  %v1876_v39 = vsub.f32 %v7764_v15, %v9583_v36  ;;  %v1841_v51 = vand.u32 4294901760, %v1840_v60  ;;  %v1859_v38 = vand.u32 4294901760, %v1858_v3 }
 0x156   :  { %v1882_v58 = vsub.f32 %v7774_v55, %v9585_v37  ;;  %v1853_v5 = vand.u32 4294901760, %v1852_v33  ;;  %v1847_v4 = vand.u32 4294901760, %v1846_v25  ;;  %v1871_v24 = vand.u32 4294901760, %v1870_v35 }
 0x157   :  { %v1865_v61 = vand.u32 4294901760, %v1864_v63  ;;  %v1877_v44 = vand.u32 4294901760, %v1876_v39  ;;  %v9254_v36 = vand.u32 4294901760, %v7793_v40  ;;  %v9251_v15 = vand.u32 4294901760, %v7798_v23 }
 0x158   :  { %v1883_v11 = vand.u32 4294901760, %v1882_v58  ;;  %v5803_v16 = vpack.c.bf16 %v1853_v5, %v1841_v51  ;;  %v8023_v19 = vpack.c.bf16 %v1859_v38, %v1847_v4  ;;  %v9249_v37 = vand.u32 4294901760, %v7803_v1 }
 0x159   :  { %v8027_v2 = vpack.c.bf16 %v1877_v44, %v1865_v61  ;;  %v9247_v25 = vand.u32 4294901760, %v7808_v26  ;;  %v1888_v39 = vsub.f32 %v7793_v40, %v9254_v36  ;;  %v1900_v51 = vsub.f32 %v7798_v23, %v9251_v15 }
 0x15a   :  { %v8029_v13 = vpack.c.bf16 %v1883_v11, %v1871_v24  ;;  %5804 = vmatprep.subr.bf16.mxu1 %v5803_v16  ;;  %v8039_v5 = vpack.c.bf16 %v3463_v18, %v3456_v17  ;;  %v8041_v38 = vpack.c.bf16 %v3477_v20, %v3470_v48  ;;  %v1894_v61 = vsub.f32 %v7803_v1, %v9249_v37 }
 0x15b   :  { %v1906_v16 = vsub.f32 %v7808_v26, %v9247_v25  ;;  %v9246_v24 = vand.u32 4294901760, %v7838_v30  ;;  %v9245_v44 = vand.u32 4294901760, %v7843_v29  ;;  %v1889_v4 = vand.u32 4294901760, %v1888_v39 }
 0x15c   :  { %v1901_v35 = vand.u32 4294901760, %v1900_v51  ;;  %v9248_v58 = vand.u32 4294901760, %v7848_v27  ;;  %v9250_v17 = vand.u32 4294901760, %v7853_v43  ;;  %v1895_v20 = vand.u32 4294901760, %v1894_v61 }
 0x15d   :  { %v1907_v18 = vand.u32 4294901760, %v1906_v16  ;;  %v1912_v48 = vsub.f32 %v7838_v30, %v9246_v24  ;;  %v1924_v11 = vsub.f32 %v7843_v29, %v9245_v44  ;;  %v9586_v33 = vand.u32 4294901760, %v7909_v59 }
 0x15e   :  { %v8059_v3 = vpack.c.bf16 %v1901_v35, %v1889_v4  ;;  %v1918_v63 = vsub.f32 %v7848_v27, %v9248_v58  ;;  %v1930_v60 = vsub.f32 %v7853_v43, %v9250_v17  ;;  %v9587_v44 = vand.u32 4294901760, %v7914_v21 }
 0x15f   :  { %v3483_v39 = vsub.f32 %v7909_v59, %v9586_v33  ;;  %v8070_v51 = vpack.c.bf16 %v1907_v18, %v1895_v20  ;;  %v1913_v61 = vand.u32 4294901760, %v1912_v48  ;;  %v1925_v16 = vand.u32 4294901760, %v1924_v11 }
 0x160   :  { %v3490_v4 = vsub.f32 %v7914_v21, %v9587_v44  ;;  %v1919_v35 = vand.u32 4294901760, %v1918_v63  ;;  %v1931_v24 = vand.u32 4294901760, %v1930_v60  ;;  %v9257_v58 = vand.u32 4294901760, %v7924_v8 }
 0x161   :  { %v3484_v25 = vand.u32 4294901760, %v3483_v39  ;;  %v8076_v37 = vpack.c.bf16 %v1925_v16, %v1913_v61  ;;  %v9256_v15 = vand.u32 4294901760, %v7929_v7  ;;  %v9252_v33 = vand.u32 4294901760, %v7866_v52 }
 0x162   :  { %v3491_v17 = vand.u32 4294901760, %v3490_v4  ;;  %v8080_v20 = vpack.c.bf16 %v1931_v24, %v1919_v35  ;;  %v3497_v18 = vsub.f32 %v7924_v8, %v9257_v58  ;;  %v9253_v44 = vand.u32 4294901760, %v7871_v6 }
 0x163   :  { %v9255_v48 = vand.u32 4294901760, %v7876_v54  ;;  %v3504_v63 = vsub.f32 %v7929_v7, %v9256_v15  ;;  %v1936_v60 = vsub.f32 %v7866_v52, %v9252_v33  ;;  %v9259_v24 = vand.u32 4294901760, %v7881_v56 }
 0x164   :  { %v8087_v11 = vpack.c.bf16 %v3491_v17, %v3484_v25  ;;  %v3498_v39 = vand.u32 4294901760, %v3497_v18  ;;  %v1948_v61 = vsub.f32 %v7871_v6, %v9253_v44  ;;  %v8104_v17 = vpack.c.bf16 %v7644_v49, %v7639_v31  ;;  %v9595_v31 = vld [vmem:[#allocation86_spill] sm:$0xff] }
 0x165   :  { %v1942_v25 = vsub.f32 %v7876_v54, %v9255_v48  ;;  %v3505_v16 = vand.u32 4294901760, %v3504_v63  ;;  %v1937_v4 = vand.u32 4294901760, %v1936_v60  ;;  %v1954_v35 = vsub.f32 %v7881_v56, %v9259_v24 }
 0x166   :  { %v8111_v18 = vpack.c.bf16 %v7695_v62, %v7690_v9  ;;  %v1949_v33 = vand.u32 4294901760, %v1948_v61  ;;  %v9261_v36 = vand.u32 4294901760, %v7934_v10  ;;  %v9260_v48 = vand.u32 4294901760, %v7939_v34 }
 0x167   :  { %v1943_v44 = vand.u32 4294901760, %v1942_v25  ;;  %v8115_v15 = vpack.c.bf16 %v3505_v16, %v3498_v39  ;;  %v1955_v58 = vand.u32 4294901760, %v1954_v35  ;;  %v9264_v63 = vand.u32 4294901760, %v7944_v22 }
 0x168   :  { %9588 = vst [vmem:[#allocation88_spill] sm:$0xff] %v8111_v18  ;;  %v9266_v60 = vand.u32 4294901760, %v7949_v14  ;;  %v8119_v49 = vpack.c.bf16 %v1949_v33, %v1937_v4  ;;  %v1960_v24 = vsub.f32 %v7934_v10, %v9261_v36  ;;  %v1972_v61 = vsub.f32 %v7939_v34, %v9260_v48 }
 0x169   :  { %v8129_v25 = vpack.c.bf16 %v7737_v0, %v7732_v57  ;;  %v8131_v39 = vpack.c.bf16 %v1955_v58, %v1943_v44  ;;  %v1966_v16 = vsub.f32 %v7944_v22, %v9264_v63  ;;  %v8141_v4 = vpack.c.bf16 %v7754_v53, %v7749_v12 }
 0x16a   :  { %v1978_v33 = vsub.f32 %v7949_v14, %v9266_v60  ;;  %v1961_v35 = vand.u32 4294901760, %v1960_v24  ;;  %v1973_v48 = vand.u32 4294901760, %v1972_v61  ;;  %v9267_v36 = vand.u32 4294901760, %v7954_v42 }
 0x16b   :  { %9589 = vst [vmem:[#allocation89_spill] sm:$0xff] %v8129_v25  ;;  %9590 = vst [vmem:[#allocation90_spill] sm:$0xff] %v8141_v4  ;;  %v9269_v0 = vand.u32 4294901760, %v7959_v28  ;;  %v1967_v58 = vand.u32 4294901760, %v1966_v16  ;;  %v9275_v57 = vand.u32 4294901760, %v7964_v32  ;;  %v9280_v63 = vand.u32 4294901760, %v7969_v47 }
 0x16c   :  { %v1979_v44 = vand.u32 4294901760, %v1978_v33  ;;  %v8147_v62 = vpack.c.bf16 %v1973_v48, %v1961_v35  ;;  %v1984_v60 = vsub.f32 %v7954_v42, %v9267_v36  ;;  %v8157_v61 = vpack.c.bf16 %v7820_v50, %v7815_v46  ;;  %v9593_v50 = vld [vmem:[#allocation84_spill] sm:$0xff] }
 0x16d   :  { %v1996_v24 = vsub.f32 %v7959_v28, %v9269_v0  ;;  %v1990_v33 = vsub.f32 %v7964_v32, %v9275_v57  ;;  %v2002_v48 = vsub.f32 %v7969_v47, %v9280_v63  ;;  %v8169_v53 = vpack.c.bf16 %v7833_v41, %v7828_v45  ;;  %v9599_v45 = vld [vmem:[#allocation71_spill] sm:$0xff] }
 0x16e   :  { %9591 = vst [vmem:[#allocation91_spill] sm:$0xff] %v8157_v61  ;;  %v8159_v16 = vpack.c.bf16 %v1979_v44, %v1967_v58  ;;  %v1985_v35 = vand.u32 4294901760, %v1984_v60  ;;  %v9279_v46 = vand.u32 4294901760, %v9593_v50  ;;  %v9594_v58 = vld [vmem:[#allocation85_spill] sm:$0xff]  ;;  %v9283_v57 = vand.u32 4294901760, %v9595_v31  ;;  %v9596_v61 = vld [vmem:[#allocation87_spill] sm:$0xff] }
 0x16f   :  { %v1997_v36 = vand.u32 4294901760, %v1996_v24  ;;  %9592 = vst [vmem:[#allocation92_spill] sm:$0xff] %v8169_v53  ;;  %v1991_v0 = vand.u32 4294901760, %v1990_v33  ;;  %v2003_v12 = vand.u32 4294901760, %v2002_v48  ;;  %v9282_v44 = vand.u32 4294901760, %v9594_v58 }
 0x170   :  { %v9286_v4 = vand.u32 4294901760, %v9596_v61  ;;  %v2008_v60 = vsub.f32 %v9593_v50, %v9279_v46  ;;  %v2014_v33 = vsub.f32 %v9595_v31, %v9283_v57  ;;  %v9598_v57 = vld [vmem:[#allocation70_spill] sm:$0xff] }
 0x171   :  { %v8173_v9 = vpack.c.bf16 %v1997_v36, %v1985_v35  ;;  %v8177_v25 = vpack.c.bf16 %v2003_v12, %v1991_v0  ;;  %v2020_v24 = vsub.f32 %v9594_v58, %v9282_v44  ;;  %v8193_v0 = vpack.c.bf16 %v7914_v21, %v7909_v59 }
 0x172   :  { %v2026_v36 = vsub.f32 %v9596_v61, %v9286_v4  ;;  %v2009_v12 = vand.u32 4294901760, %v2008_v60  ;;  %v2015_v35 = vand.u32 4294901760, %v2014_v33  ;;  %v8201_v44 = vpack.c.bf16 %v7929_v7, %v7924_v8  ;;  %v9617_v61 = vld [vmem:[#allocation56_spill] sm:$0xff] }
 0x173   :  { %9597 = vst [vmem:[#allocation93_spill] sm:$0xff] %v8177_v25  ;;  %v2021_v48 = vand.u32 4294901760, %v2020_v24 }
 0x174   :  { %v2027_v46 = vand.u32 4294901760, %v2026_v36 }
 0x175   :  { %v8195_v63 = vpack.c.bf16 %v2021_v48, %v2009_v12  ;;  %v8218_v12 = vld [vmem:[%s9050_s2] ss:$0 sm:$0xff] }
 0x176   :  { %v8197_v41 = vpack.c.bf16 %v2027_v46, %v2015_v35 }
 0x1cf   :  { %v5221_v48 = vpop.f32.mrb[0].mxu0 }
 0x1d0   :  { %v8221_v35 = vadd.f32 %v5221_v48, %v8218_v12  ;;  %v1293_v25 = vpop.f32.mrb[1].mxu0 }
 0x1d1   :  { %v8224_v60 = vadd.f32 %v8218_v12, %v1293_v25 }
 0x1d2   :  { %v4508_v33 = vmul.f32 -1.442695, %v8221_v35 }
 0x1d3   :  { %v4507_v53 = vmul.f32 -1.442695, %v8224_v60  ;;  %v5224_v7 = vpop.f32.mrb[2].mxu0 }
 0x1d4   :  { %6548 = vpow2.f32 %v4508_v33  ;;  %v8233_v8 = vadd.f32 %v5224_v7, %v8218_v12  ;;  %v1305_v48 = vpop.f32.mrb[3].mxu0 }
 0x1d5   :  { %6550 = vpow2.f32 %v4507_v53  ;;  %v8236_v25 = vadd.f32 %v8218_v12, %v1305_v48 }
 0x1d6   :  { %v4510_v1 = vmul.f32 -1.442695, %v8233_v8 }
 0x1d7   :  { %v4509_v26 = vmul.f32 -1.442695, %v8236_v25  ;;  %v5227_v46 = vpop.f32.mrb[4].mxu0 }
 0x1d8   :  { %6552 = vpow2.f32 %v4510_v1  ;;  %v8241_v36 = vadd.f32 %v5227_v46, %v8218_v12  ;;  %v1317_v27 = vpop.f32.mrb[5].mxu0 }
 0x1d9   :  { %6554 = vpow2.f32 %v4509_v26  ;;  %v8244_v33 = vadd.f32 %v8218_v12, %v1317_v27 }
 0x1da   :  { %v4512_v7 = vmul.f32 -1.442695, %v8241_v36 }
 0x1db   :  { %v4511_v43 = vmul.f32 -1.442695, %v8244_v33  ;;  %v5230_v30 = vpop.f32.mrb[6].mxu0 }
 0x1dc   :  { %6556 = vpow2.f32 %v4512_v7  ;;  %v8253_v1 = vadd.f32 %v5230_v30, %v8218_v12  ;;  %v1329_v46 = vpop.f32.mrb[7].mxu0 }
 0x1dd   :  { %6558 = vpow2.f32 %v4511_v43  ;;  %v8256_v26 = vadd.f32 %v8218_v12, %v1329_v46 }
 0x1de   :  { %v6549_v27 = vpop.eup %6548  ;;  %v4514_v29 = vmul.f32 -1.442695, %v8253_v1 }
 0x1df   :  { %v6551_v40 = vpop.eup %6550  ;;  %v1436_v53 = vadd.f32 1.0, %v6549_v27  ;;  %v4513_v52 = vmul.f32 -1.442695, %v8256_v26  ;;  %v5233_v48 = vpop.f32.mrb[8].mxu0 }
 0x1e0   :  { %v1435_v54 = vadd.f32 1.0, %v6551_v40  ;;  %6560 = vpow2.f32 %v4514_v29  ;;  %v8261_v7 = vadd.f32 %v5233_v48, %v8218_v12  ;;  %v1341_v30 = vpop.f32.mrb[9].mxu0 }
 0x1e1   :  { %6562 = vrcp.f32 %v1436_v53  ;;  %v8264_v43 = vadd.f32 %v8218_v12, %v1341_v30 }
 0x1e2   :  { %v6553_v46 = vpop.eup %6552  ;;  %6564 = vrcp.f32 %v1435_v54  ;;  %v4516_v56 = vmul.f32 -1.442695, %v8261_v7 }
 0x1e3   :  { %v6555_v40 = vpop.eup %6554  ;;  %v1438_v29 = vadd.f32 1.0, %v6553_v46  ;;  %6566 = vpow2.f32 %v4513_v52  ;;  %v4515_v48 = vmul.f32 -1.442695, %v8264_v43  ;;  %v5236_v23 = vpop.f32.mrb[10].mxu0 }
 0x1e4   :  { %v1437_v53 = vadd.f32 1.0, %v6555_v40  ;;  %6568 = vpow2.f32 %v4516_v56  ;;  %v8273_v30 = vadd.f32 %v5236_v23, %v8218_v12  ;;  %v1353_v54 = vpop.f32.mrb[11].mxu0 }
 0x1e5   :  { %6570 = vrcp.f32 %v1438_v29  ;;  %v8276_v24 = vadd.f32 %v8218_v12, %v1353_v54 }
 0x1e6   :  { %v6557_v27 = vpop.eup %6556  ;;  %6572 = vrcp.f32 %v1437_v53  ;;  %v4518_v6 = vmul.f32 -1.442695, %v8273_v30 }
 0x1e7   :  { %v6559_v22 = vpop.eup %6558  ;;  %v1440_v46 = vadd.f32 1.0, %v6557_v27  ;;  %6574 = vpow2.f32 %v4515_v48  ;;  %v4517_v52 = vmul.f32 -1.442695, %v8276_v24  ;;  %v5239_v14 = vpop.f32.mrb[12].mxu0 }
 0x1e8   :  { %v1439_v40 = vadd.f32 1.0, %v6559_v22  ;;  %6576 = vpow2.f32 %v4518_v6  ;;  %v8281_v23 = vadd.f32 %v5239_v14, %v8218_v12  ;;  %v1365_v56 = vpop.f32.mrb[13].mxu0 }
 0x1e9   :  { %6578 = vrcp.f32 %v1440_v46  ;;  %v8284_v29 = vadd.f32 %v8218_v12, %v1365_v56 }
 0x1ea   :  { %v6561_v54 = vpop.eup %6560  ;;  %6580 = vrcp.f32 %v1439_v40  ;;  %v4520_v53 = vmul.f32 -1.442695, %v8281_v23 }
 0x1eb   :  { %v6563_v22 = vpop.eup %6562  ;;  %v1442_v6 = vadd.f32 1.0, %v6561_v54  ;;  %6582 = vpow2.f32 %v4517_v52  ;;  %v4519_v14 = vmul.f32 -1.442695, %v8284_v29  ;;  %v5242_v10 = vpop.f32.mrb[14].mxu0 }
 0x1ec   :  { %v6565_v46 = vpop.eup %6564  ;;  %v1484_v56 = vmul.f32 %v6563_v22, %v8221_v35  ;;  %6584 = vpow2.f32 %v4520_v53  ;;  %v8294_v40 = vadd.f32 %v5242_v10, %v8218_v12  ;;  %v1377_v34 = vpop.f32.mrb[15].mxu0 }
 0x1ed   :  { %v6567_v55 = vpop.eup %6566  ;;  %v1483_v27 = vmul.f32 %v6565_v46, %v8224_v60  ;;  %6586 = vrcp.f32 %v1442_v6  ;;  %v8298_v48 = vadd.f32 %v8218_v12, %v1377_v34 }
 0x1ee   :  { %v6569_v54 = vpop.eup %6568  ;;  %v8300_v52 = vand.u32 4294901760, %v1484_v56  ;;  %v1441_v32 = vadd.f32 1.0, %v6567_v55  ;;  %6588 = vpow2.f32 %v4519_v14  ;;  %v4522_v47 = vmul.f32 -1.442695, %v8294_v40 }
 0x1ef   :  { %v6571_v35 = vpop.eup %6570  ;;  %v8303_v53 = vand.u32 4294901760, %v1483_v27  ;;  %v1444_v10 = vadd.f32 1.0, %v6569_v54  ;;  %v4521_v22 = vmul.f32 -1.442695, %v8298_v48 }
 0x1f0   :  { %v6573_v42 = vpop.eup %6572  ;;  %v8307_v60 = vsub.f32 %v1484_v56, %v8300_v52  ;;  %v1486_v34 = vmul.f32 %v6571_v35, %v8233_v8  ;;  %6590 = vrcp.f32 %v1441_v32 }
 0x1f1   :  { %v6575_v12 = vpop.eup %6574  ;;  %v8311_v6 = vsub.f32 %v1483_v27, %v8303_v53  ;;  %v1485_v55 = vmul.f32 %v6573_v42, %v8236_v25  ;;  %6592 = vrcp.f32 %v1444_v10 }
 0x1f2   :  { %9605 = vst [vmem:[#allocation70_spill] sm:$0xff] %v8307_v60  ;;  %v6577_v14 = vpop.eup %6576  ;;  %v8315_v46 = vand.u32 4294901760, %v8307_v60  ;;  %v8317_v54 = vand.u32 4294901760, %v1486_v34  ;;  %v1443_v28 = vadd.f32 1.0, %v6575_v12  ;;  %6594 = vpow2.f32 %v4522_v47 }
 0x1f3   :  { %v6579_v56 = vpop.eup %6578  ;;  %v8319_v21 = vand.u32 4294901760, %v1485_v55  ;;  %v1446_v8 = vadd.f32 1.0, %v6577_v14  ;;  %6596 = vpow2.f32 %v4521_v22  ;;  %v8322_v32 = vand.u32 4294901760, %v8311_v6 }
 0x1f4   :  { %9606 = vst [vmem:[#allocation71_spill] sm:$0xff] %v8315_v46  ;;  %v6581_v27 = vpop.eup %6580  ;;  %v8325_v42 = vsub.f32 %v1486_v34, %v8317_v54  ;;  %v1488_v25 = vmul.f32 %v6579_v56, %v8241_v36  ;;  %6598 = vrcp.f32 %v1443_v28  ;;  %v1675_v35 = vsub.f32 %v8307_v60, %v8315_v46 }
 0x1f5   :  { %9607 = vst [vmem:[#allocation94_spill] sm:$0xff] %v8322_v32  ;;  %v6583_v10 = vpop.eup %6582  ;;  %v8331_v47 = vsub.f32 %v1485_v55, %v8319_v21  ;;  %v1487_v12 = vmul.f32 %v6581_v27, %v8244_v33  ;;  %6600 = vrcp.f32 %v1446_v8  ;;  %v1664_v22 = vsub.f32 %v8311_v6, %v8322_v32 }
 0x1f6   :  { %9608 = vst [vmem:[#allocation95_spill] sm:$0xff] %v8325_v42  ;;  %v6585_v14 = vpop.eup %6584  ;;  %v8336_v59 = vand.u32 4294901760, %v1488_v25  ;;  %v1445_v34 = vadd.f32 1.0, %v6583_v10  ;;  %v1676_v4 = vand.u32 4294901760, %v1675_v35  ;;  %v8339_v28 = vand.u32 4294901760, %v8325_v42 }
 0x1f7   :  { %v6587_v36 = vpop.eup %6586  ;;  %v8341_v56 = vand.u32 4294901760, %v1487_v12  ;;  %v1448_v46 = vadd.f32 1.0, %v6585_v14  ;;  %v1665_v55 = vand.u32 4294901760, %v1664_v22  ;;  %v8344_v60 = vand.u32 4294901760, %v8331_v47 }
 0x1f8   :  { %9609 = vst [vmem:[#allocation96_spill] sm:$0xff] %v8339_v28  ;;  %v6589_v33 = vpop.eup %6588  ;;  %v8347_v8 = vsub.f32 %v1488_v25, %v8336_v59  ;;  %v1490_v27 = vmul.f32 %v6587_v36, %v8253_v1  ;;  %6602 = vrcp.f32 %v1445_v34  ;;  %v1697_v35 = vsub.f32 %v8325_v42, %v8339_v28  ;;  %v9612_v34 = vld [vmem:[#allocation44_spill] sm:$0xff]  ;;  %v9615_v25 = vld [vmem:[#allocation45_spill] sm:$0xff] }
 0x1f9   :  { %9610 = vst [vmem:[#allocation97_spill] sm:$0xff] %v8344_v60  ;;  %v8353_v10 = vsub.f32 %v1487_v12, %v8341_v56  ;;  %6604 = vrcp.f32 %v1448_v46  ;;  %v1447_v32 = vadd.f32 1.0, %v6589_v33  ;;  %1666 = vmatmul.mubr.f32.vlgmr.msra.gmra.mrb[0].mxu1 %v1665_v55  ;;  %5275 = vmatprep.mubr.f32.mxu0 %v1665_v55  ;;  %v1686_v22 = vsub.f32 %v8331_v47, %v8344_v60 }
 0x1fa   :  { %v6591_v14 = vpop.eup %6590  ;;  %v8357_v18 = vand.u32 4294901760, %v1490_v27  ;;  %5806 = vmatpush1.bf16.msra.mxu1 %v8023_v19  ;;  %5276 = vmatmul.mubr.f32.vlgmr.msra.gmra.mrb[16].mxu0 %v1676_v4  ;;  %v8361_v1 = vand.u32 4294901760, %v8347_v8  ;;  %v9613_v36 = vmov 0.0   ;;  %v1698_v42 = vand.u32 4294901760, %v1697_v35 }
 0x1fb   :  { %v6593_v12 = vpop.eup %6592  ;;  %v1489_v46 = vmul.f32 %v6591_v14, %v8256_v26  ;;  %6606 = vrcp.f32 %v1447_v32  ;;  %5998 = vmatpush3.bf16.msra.mxu0 %v9612_v34  ;;  %1671 = vmatprep.mubr.f32.mxu1 %v9613_v36  ;;  %v1687_v55 = vand.u32 4294901760, %v1686_v22  ;;  %v8369_v33 = vand.u32 4294901760, %v8353_v10 }
 0x1fc   :  { %9611 = vst [vmem:[#allocation98_spill] sm:$0xff] %v8361_v1  ;;  %v6595_v19 = vpop.eup %6594  ;;  %v8372_v28 = vsub.f32 %v1490_v27, %v8357_v18  ;;  %v1492_v60 = vmul.f32 %v6593_v12, %v8261_v7  ;;  %6000 = vmatprep.subr.bf16.mxu0 %v9615_v25  ;;  %5808 = vmatprep.subr.bf16.mxu1 %v8027_v2 }
 0x1fd   :  { %9614 = vst [vmem:[#allocation44_spill] sm:$0xff] %v8369_v33  ;;  %v1719_v26 = vsub.f32 %v8347_v8, %v8361_v1  ;;  %v6597_v32 = vpop.eup %6596  ;;  %v8379_v14 = vand.u32 4294901760, %v1489_v46  ;;  %v1450_v22 = vadd.f32 1.0, %v6595_v19  ;;  %1677 = vmatmul.mubr.f32.gmra.mrb[2].mxu1 %v1676_v4  ;;  %5278 = vmatprep.mubr.f32.mxu0 %v1687_v55  ;;  %v1708_v27 = vsub.f32 %v8353_v10, %v8369_v33 }
 0x1fe   :  { %v6599_v35 = vpop.eup %6598  ;;  %v8385_v12 = vand.u32 4294901760, %v1492_v60  ;;  %v1449_v34 = vadd.f32 1.0, %v6597_v32  ;;  %5279 = vmatmul.mubr.f32.gmra.mrb[18].mxu0 %v1698_v42  ;;  %1682 = vmatprep.mubr.f32.mxu1 %v9613_v36  ;;  %v8389_v2 = vand.u32 4294901760, %v8372_v28 }
 0x1ff   :  { %v6601_v1 = vpop.eup %6600  ;;  %v8392_v4 = vsub.f32 %v1489_v46, %v8379_v14  ;;  %v1491_v19 = vmul.f32 %v6599_v35, %v8264_v43  ;;  %6608 = vrcp.f32 %v1450_v22  ;;  %6002 = vmatpush3.bf16.msra.mxu0 %v9615_v25  ;;  %v1709_v7 = vand.u32 4294901760, %v1708_v27  ;;  %5810 = vmatpush1.bf16.msra.mxu1 %v8029_v13  ;;  %v9620_v35 = vld [vmem:[#allocation59_spill] sm:$0xff] }
 0x200   :  { %9616 = vst [vmem:[#allocation45_spill] sm:$0xff] %v8389_v2  ;;  %v8398_v32 = vsub.f32 %v1492_v60, %v8385_v12  ;;  %v1494_v33 = vmul.f32 %v6601_v1, %v8273_v30  ;;  %6610 = vrcp.f32 %v1449_v34  ;;  %v1720_v31 = vand.u32 4294901760, %v1719_v26  ;;  %6004 = vmatprep.subr.bf16.mxu0 %v9617_v61  ;;  %5812 = vmatprep.subr.bf16.mxu1 %v8059_v3 }
 0x201   :  { %v8403_v46 = vand.u32 4294901760, %v1491_v19  ;;  %1688 = vmatmul.mubr.f32.gmra.mrb[4].mxu1 %v1687_v55  ;;  %5281 = vmatprep.mubr.f32.mxu0 %v1709_v7  ;;  %v8406_v43 = vand.u32 4294901760, %v8392_v4  ;;  %v1741_v30 = vsub.f32 %v8372_v28, %v8389_v2 }
 0x202   :  { %v6603_v25 = vpop.eup %6602  ;;  %v8408_v13 = vand.u32 4294901760, %v1494_v33  ;;  %5282 = vmatmul.mubr.f32.gmra.mrb[20].mxu0 %v1720_v31  ;;  %1693 = vmatprep.mubr.f32.mxu1 %v9613_v36  ;;  %v8414_v60 = vand.u32 4294901760, %v8398_v32 }
 0x203   :  { %9618 = vst [vmem:[#allocation56_spill] sm:$0xff] %v8406_v43  ;;  %v6605_v3 = vpop.eup %6604  ;;  %v8417_v1 = vsub.f32 %v1491_v19, %v8403_v46  ;;  %v1493_v55 = vmul.f32 %v6603_v25, %v8276_v24  ;;  %6006 = vmatpush3.bf16.msra.mxu0 %v9617_v61  ;;  %v1730_v26 = vsub.f32 %v8392_v4, %v8406_v43 }
 0x204   :  { %9619 = vst [vmem:[#allocation99_spill] sm:$0xff] %v8414_v60  ;;  %5814 = vmatpush1.bf16.msra.mxu1 %v8070_v51  ;;  %v8425_v22 = vsub.f32 %v1494_v33, %v8408_v13  ;;  %v1496_v27 = vmul.f32 %v6605_v3, %v8281_v23  ;;  %6008 = vmatprep.subr.bf16.mxu0 %v9620_v35  ;;  %v1742_v23 = vand.u32 4294901760, %v1741_v30 }
 0x205   :  { %5816 = vmatprep.subr.bf16.mxu1 %v8076_v37  ;;  %v6607_v34 = vpop.eup %6606  ;;  %v8430_v19 = vand.u32 4294901760, %v1493_v55  ;;  %1699 = vmatmul.mubr.f32.gmra.mrb[6].mxu1 %v1698_v42  ;;  %v1731_v24 = vand.u32 4294901760, %v1730_v26  ;;  %v8433_v61 = vand.u32 4294901760, %v8417_v1  ;;  %v1763_v51 = vsub.f32 %v8398_v32, %v8414_v60 }
 0x206   :  { %v8437_v25 = vand.u32 4294901760, %v1496_v27  ;;  %v1495_v33 = vmul.f32 %v6607_v34, %v8284_v29  ;;  %1704 = vmatprep.mubr.f32.mxu1 %v9613_v36  ;;  %v8442_v37 = vand.u32 4294901760, %v8425_v22 }
 0x207   :  { %9621 = vst [vmem:[#allocation59_spill] sm:$0xff] %v8433_v61  ;;  %v8445_v3 = vsub.f32 %v1493_v55, %v8430_v19  ;;  %5284 = vmatprep.mubr.f32.mxu0 %v1731_v24  ;;  %6010 = vmatpush3.bf16.msra.mxu0 %v9620_v35  ;;  %v1752_v42 = vsub.f32 %v8417_v1, %v8433_v61  ;;  %v1764_v34 = vand.u32 4294901760, %v1763_v51 }
 0x208   :  { %9622 = vst [vmem:[#allocation100_spill] sm:$0xff] %v8442_v37  ;;  %v8451_v26 = vsub.f32 %v1496_v27, %v8437_v25  ;;  %v8453_v60 = vand.u32 4294901760, %v1495_v33  ;;  %5285 = vmatmul.mubr.f32.gmra.mrb[22].mxu0 %v1742_v23  ;;  %6012 = vmatprep.subr.bf16.mxu0 %v8039_v5  ;;  %v1785_v27 = vsub.f32 %v8425_v22, %v8442_v37 }
 0x209   :  { %v6609_v29 = vpop.eup %6608  ;;  %1710 = vmatmul.mubr.f32.gmra.mrb[8].mxu1 %v1709_v7  ;;  %v1753_v30 = vand.u32 4294901760, %v1752_v42  ;;  %v8457_v55 = vand.u32 4294901760, %v8445_v3 }
 0x20a   :  { %v6611_v2 = vpop.eup %6610  ;;  %v8460_v35 = vsub.f32 %v1495_v33, %v8453_v60  ;;  %v1498_v61 = vmul.f32 %v6609_v29, %v8294_v40  ;;  %1715 = vmatprep.mubr.f32.mxu1 %v9613_v36  ;;  %5818 = vmatpush1.bf16.msra.mxu1 %v8080_v20  ;;  %v8468_v7 = vand.u32 4294901760, %v8451_v26 }
 0x20b   :  { %9623 = vst [vmem:[#allocation101_spill] sm:$0xff] %v8457_v55  ;;  %v1497_v51 = vmul.f32 %v6611_v2, %v8298_v48  ;;  %5287 = vmatprep.mubr.f32.mxu0 %v1753_v30  ;;  %6014 = vmatpush3.bf16.msra.mxu0 %v8039_v5  ;;  %v1774_v33 = vsub.f32 %v8445_v3, %v8457_v55  ;;  %v1786_v5 = vand.u32 4294901760, %v1785_v27 }
 0x20c   :  { %v8474_v42 = vand.u32 4294901760, %v1498_v61  ;;  %5288 = vmatmul.mubr.f32.gmra.mrb[24].mxu0 %v1764_v34  ;;  %6016 = vmatprep.subr.bf16.mxu0 %v8041_v38  ;;  %v8478_v40 = vand.u32 4294901760, %v8460_v35  ;;  %v1807_v37 = vsub.f32 %v8451_v26, %v8468_v7 }
 0x20d   :  { %v8480_v20 = vand.u32 4294901760, %v1497_v51  ;;  %1721 = vmatmul.mubr.f32.gmra.mrb[10].mxu1 %v1720_v31  ;;  %v1775_v29 = vand.u32 4294901760, %v1774_v33  ;;  %5820 = vmatprep.subr.bf16.mxu1 %v8119_v49  ;;  %v9637_v33 = vld [vmem:[#allocation48_spill] sm:$0xff] }
 0x20e   :  { %v8484_v48 = vsub.f32 %v1498_v61, %v8474_v42  ;;  %1726 = vmatprep.mubr.f32.mxu1 %v9613_v36  ;;  %v1796_v2 = vsub.f32 %v8460_v35, %v8478_v40  ;;  %5822 = vmatpush1.bf16.msra.mxu1 %v8131_v39  ;;  %v1808_v39 = vand.u32 4294901760, %v1807_v37  ;;  %v9632_v37 = vld [vmem:[#allocation41_spill] sm:$0xff] }
 0x20f   :  { %v8493_v55 = vsub.f32 %v1497_v51, %v8480_v20  ;;  %5290 = vmatprep.mubr.f32.mxu0 %v1775_v29  ;;  %6018 = vmatpush3.bf16.msra.mxu0 %v8041_v38  ;;  %v9636_v51 = vld [vmem:[#allocation49_spill] sm:$0xff] }
 0x210   :  { %5291 = vmatmul.mubr.f32.gmra.mrb[26].mxu0 %v1786_v5  ;;  %v1797_v31 = vand.u32 4294901760, %v1796_v2  ;;  %6020 = vmatprep.subr.bf16.mxu0 %v8087_v11  ;;  %v8498_v49 = vand.u32 4294901760, %v8484_v48  ;;  %v9641_v2 = vld [vmem:[#allocation50_spill] sm:$0xff] }
 0x211   :  { %1732 = vmatmul.mubr.f32.gmra.mrb[12].mxu1 %v1731_v24  ;;  %v8501_v61 = vand.u32 4294901760, %v8493_v55  ;;  %5824 = vmatprep.subr.bf16.mxu1 %v8147_v62 }
 0x212   :  { %5293 = vmatprep.mubr.f32.mxu0 %v1797_v31  ;;  %1737 = vmatprep.mubr.f32.mxu1 %v9613_v36  ;;  %v1829_v38 = vsub.f32 %v8484_v48, %v8498_v49 }
 0x213   :  { %6022 = vmatpush3.bf16.msra.mxu0 %v8087_v11  ;;  %v1818_v27 = vsub.f32 %v8493_v55, %v8501_v61  ;;  %5826 = vmatpush1.bf16.msra.mxu1 %v8159_v16  ;;  %v9624_v11 = vld [vmem:[#allocation93_spill] sm:$0xff]  ;;  %v9630_v16 = vld [vmem:[#allocation92_spill] sm:$0xff] }
 0x214   :  { %5294 = vmatmul.mubr.f32.gmra.mrb[28].mxu0 %v1808_v39  ;;  %6024 = vmatprep.subr.bf16.mxu0 %v8115_v15  ;;  %v1830_v62 = vand.u32 4294901760, %v1829_v38  ;;  %v9644_v38 = vld [vmem:[#allocation53_spill] sm:$0xff] }
 0x215   :  { %1743 = vmatmul.mubr.f32.gmra.mrb[14].mxu1 %v1742_v23  ;;  %v1819_v24 = vand.u32 4294901760, %v1818_v27  ;;  %5828 = vmatprep.subr.bf16.mxu1 %v8173_v9  ;;  %v9625_v9 = vld [vmem:[#allocation88_spill] sm:$0xff]  ;;  %v9631_v23 = vld [vmem:[#allocation17_spill] sm:$0xff] }
 0x216   :  { %1748 = vmatprep.mubr.f32.mxu1 %v9613_v36  ;;  %v9645_v27 = vld [vmem:[#allocation52_spill] sm:$0xff] }
 0x217   :  { %5296 = vmatprep.mubr.f32.mxu0 %v1819_v24  ;;  %6026 = vmatpush3.bf16.msra.mxu0 %v8115_v15  ;;  %v9626_v15 = vpack.c.bf16 %v9599_v45, %v9598_v57 }
 0x218   :  { %5297 = vmatmul.mubr.f32.gmra.mrb[30].mxu0 %v1830_v62  ;;  %6028 = vmatprep.subr.bf16.mxu0 %v8104_v17 }
 0x219   :  { %5331 = vmatprep.mubr.f32.mxu0 %v8303_v53  ;;  %1754 = vmatmul.mubr.f32.gmra.mrb[16].mxu1 %v1753_v30  ;;  %v9633_v30 = vld [vmem:[#allocation40_spill] sm:$0xff] }
 0x21a   :  { %1759 = vmatprep.mubr.f32.mxu1 %v9613_v36  ;;  %5830 = vmatpush1.bf16.msra.mxu1 %v9624_v11  ;;  %v9648_v11 = vld [vmem:[#allocation55_spill] sm:$0xff] }
 0x21b   :  { %5832 = vmatprep.subr.bf16.mxu1 %v8195_v63  ;;  %v9627_v63 = vld [vmem:[#allocation89_spill] sm:$0xff] }
 0x21c   :  { %5332 = vmatmul.mubr.f32.vlgmr.msra.gmra.mrb[16].mxu0 %v8300_v52 }
 0x21d   :  { %5334 = vmatprep.mubr.f32.mxu0 %v8319_v21  ;;  %6030 = vmatpush3.bf16.msra.mxu0 %v8104_v17  ;;  %v9629_v17 = vld [vmem:[#allocation91_spill] sm:$0xff] }
 0x21e   :  { %1765 = vmatmul.mubr.f32.gmra.mrb[18].mxu1 %v1764_v34  ;;  %6032 = vmatprep.subr.bf16.mxu0 %v9625_v9  ;;  %v9634_v34 = vpack.c.bf16 %v9632_v37, %v9633_v30 }
 0x21f   :  { %1770 = vmatprep.mubr.f32.mxu1 %v9613_v36  ;;  %5834 = vmatpush1.bf16.msra.mxu1 %v8197_v41  ;;  %v9628_v41 = vld [vmem:[#allocation90_spill] sm:$0xff] }
 0x220   :  { %5335 = vmatmul.mubr.f32.gmra.mrb[18].mxu0 %v8317_v54  ;;  %5836 = vmatprep.subr.bf16.mxu1 %v9626_v15 }
 0x221   :  { %5337 = vmatprep.mubr.f32.mxu0 %v8341_v56  ;;  %6034 = vmatpush3.bf16.msra.mxu0 %v9625_v9  ;;  %v9649_v9 = vld [vmem:[#allocation54_spill] sm:$0xff] }
 0x222   :  { %1776 = vmatmul.mubr.f32.gmra.mrb[20].mxu1 %v1775_v29  ;;  %6036 = vmatprep.subr.bf16.mxu0 %v9627_v63  ;;  %v9638_v29 = vpack.c.bf16 %v9636_v51, %v9637_v33  ;;  %v9650_v15 = vpack.c.bf16 %v9648_v11, %v9649_v9  ;;  %v9663_v11 = vld [vmem:[#allocation68_spill] sm:$0xff]  ;;  %v9670_v9 = vld [vmem:[#allocation78_spill] sm:$0xff] }
 0x223   :  { %1781 = vmatprep.mubr.f32.mxu1 %v9613_v36 }
 0x224   :  { %5338 = vmatmul.mubr.f32.gmra.mrb[20].mxu0 %v8336_v59 }
 0x225   :  { %5340 = vmatprep.mubr.f32.mxu0 %v8379_v14  ;;  %6038 = vmatpush3.bf16.msra.mxu0 %v9627_v63  ;;  %v9651_v63 = vld [vmem:[#allocation63_spill] sm:$0xff] }
 0x226   :  { %1787 = vmatmul.mubr.f32.gmra.mrb[22].mxu1 %v1786_v5  ;;  %6040 = vmatprep.subr.bf16.mxu0 %v9628_v41  ;;  %v9640_v5 = vld [vmem:[#allocation51_spill] sm:$0xff] }
 0x227   :  { %1792 = vmatprep.mubr.f32.mxu1 %v9613_v36 }
 0x228   :  { %5341 = vmatmul.mubr.f32.gmra.mrb[22].mxu0 %v8357_v18 }
 0x229   :  { %5343 = vmatprep.mubr.f32.mxu0 %v8403_v46  ;;  %6042 = vmatpush3.bf16.msra.mxu0 %v9628_v41  ;;  %v9652_v41 = vld [vmem:[#allocation62_spill] sm:$0xff] }
 0x22a   :  { %1798 = vmatmul.mubr.f32.gmra.mrb[24].mxu1 %v1797_v31  ;;  %6044 = vmatprep.subr.bf16.mxu0 %v9629_v17  ;;  %v9642_v31 = vpack.c.bf16 %v9640_v5, %v9641_v2  ;;  %v9698_v2 = vld [vmem:[#allocation43_spill] sm:$0xff] }
 0x22b   :  { %1803 = vmatprep.mubr.f32.mxu1 %v9613_v36 }
 0x22c   :  { %5344 = vmatmul.mubr.f32.gmra.mrb[24].mxu0 %v8385_v12 }
 0x22d   :  { %5346 = vmatprep.mubr.f32.mxu0 %v8430_v19  ;;  %6046 = vmatpush3.bf16.msra.mxu0 %v9629_v17  ;;  %v9653_v17 = vpack.c.bf16 %v9651_v63, %v9652_v41  ;;  %v9662_v41 = vld [vmem:[#allocation69_spill] sm:$0xff] }
 0x22e   :  { %1809 = vmatmul.mubr.f32.gmra.mrb[26].mxu1 %v1808_v39  ;;  %6048 = vmatprep.subr.bf16.mxu0 %v9630_v16  ;;  %v9643_v39 = vld [vmem:[#allocation95_spill] sm:$0xff] }
 0x22f   :  { %1814 = vmatprep.mubr.f32.mxu1 %v9613_v36 }
 0x230   :  { %5347 = vmatmul.mubr.f32.gmra.mrb[26].mxu0 %v8408_v13 }
 0x231   :  { %5349 = vmatprep.mubr.f32.mxu0 %v8453_v60  ;;  %6050 = vmatpush3.bf16.msra.mxu0 %v9630_v16  ;;  %v9654_v16 = vld [vmem:[#allocation27_spill] sm:$0xff] }
 0x232   :  { %1820 = vmatmul.mubr.f32.gmra.mrb[28].mxu1 %v1819_v24  ;;  %6052 = vmatprep.subr.bf16.mxu0 %v8193_v0  ;;  %v9646_v24 = vpack.c.bf16 %v9644_v38, %v9645_v27  ;;  %v9677_v38 = vld [vmem:[#allocation82_spill] sm:$0xff] }
 0x233   :  { %1825 = vmatprep.mubr.f32.mxu1 %v9613_v36 }
 0x234   :  { %5350 = vmatmul.mubr.f32.gmra.mrb[28].mxu0 %v8437_v25 }
 0x235   :  { %5352 = vmatprep.mubr.f32.mxu0 %v8480_v20  ;;  %6054 = vmatpush3.bf16.msra.mxu0 %v8193_v0  ;;  %v9635_v0 = vld [vmem:[#allocation70_spill] sm:$0xff] }
 0x236   :  { %1831 = vmatmul.mubr.f32.gmra.mrb[30].mxu1 %v1830_v62  ;;  %6056 = vmatprep.subr.bf16.mxu0 %v8201_v44  ;;  %v9647_v62 = vld [vmem:[#allocation23_spill] sm:$0xff] }
 0x237   :  { %2061 = vmatprep.mubr.f32.mxu1 %v9613_v36 }
 0x238   :  { %5353 = vmatmul.mubr.f32.gmra.mrb[30].mxu0 %v8474_v42 }
 0x239   :  { %6058 = vmatpush3.bf16.msra.mxu0 %v8201_v44  ;;  %5387 = vmatprep.mubr.f32.mxu0 %v8311_v6  ;;  %v9639_v44 = vld [vmem:[#allocation20_spill] sm:$0xff] }
 0x23a   :  { %2063 = vmatmul.mubr.f32.vlgmr.msra.gmra.mrb[0].mxu1 %v8303_v53  ;;  %6060 = vmatprep.subr.bf16.mxu0 %v9631_v23 }
 0x23b   :  { %5838 = vmatpush1.bf16.msra.mxu1 %v9634_v34  ;;  %2068 = vmatprep.mubr.f32.mxu1 %v9613_v36  ;;  %v9655_v34 = vld [vmem:[#allocation65_spill] sm:$0xff] }
 0x23c   :  { %5388 = vmatmul.mubr.f32.vlgmr.msra.gmra.mrb[16].mxu0 %v9635_v0  ;;  %5840 = vmatprep.subr.bf16.mxu1 %v9638_v29  ;;  %v9656_v29 = vld [vmem:[#allocation64_spill] sm:$0xff] }
 0x23d   :  { %5390 = vmatprep.mubr.f32.mxu0 %v8331_v47  ;;  %6062 = vmatpush3.bf16.msra.mxu0 %v9631_v23 }
 0x23e   :  { %2070 = vmatmul.mubr.f32.gmra.mrb[2].mxu1 %v8300_v52  ;;  %6064 = vmatprep.subr.bf16.mxu0 %v9639_v44 }
 0x23f   :  { %2075 = vmatprep.mubr.f32.mxu1 %v9613_v36  ;;  %5842 = vmatpush1.bf16.msra.mxu1 %v9642_v31  ;;  %v9657_v31 = vpack.c.bf16 %v9655_v34, %v9656_v29  ;;  %v9664_v34 = vpack.c.bf16 %v9662_v41, %v9663_v11  ;;  %v9666_v29 = vld [vmem:[#allocation76_spill] sm:$0xff] }
 0x240   :  { %5391 = vmatmul.mubr.f32.gmra.mrb[18].mxu0 %v9643_v39  ;;  %5844 = vmatprep.subr.bf16.mxu1 %v9646_v24  ;;  %v9658_v24 = vld [vmem:[#allocation67_spill] sm:$0xff]  ;;  %v9673_v11 = vld [vmem:[#allocation80_spill] sm:$0xff] }
 0x241   :  { %5393 = vmatprep.mubr.f32.mxu0 %v8353_v10  ;;  %6066 = vmatpush3.bf16.msra.mxu0 %v9639_v44 }
 0x242   :  { %2077 = vmatmul.mubr.f32.gmra.mrb[4].mxu1 %v8319_v21  ;;  %6068 = vmatprep.subr.bf16.mxu0 %v9647_v62 }
 0x243   :  { %2082 = vmatprep.mubr.f32.mxu1 %v9613_v36  ;;  %5846 = vmatpush1.bf16.msra.mxu1 %v9650_v15  ;;  %v9659_v15 = vld [vmem:[#allocation66_spill] sm:$0xff] }
 0x244   :  { %5394 = vmatmul.mubr.f32.gmra.mrb[20].mxu0 %v8347_v8  ;;  %5848 = vmatprep.subr.bf16.mxu1 %v9653_v17  ;;  %v9660_v63 = vpack.c.bf16 %v9658_v24, %v9659_v15  ;;  %v9661_v17 = vld [vmem:[#allocation29_spill] sm:$0xff]  ;;  %v9669_v15 = vld [vmem:[#allocation79_spill] sm:$0xff] }
 0x245   :  { %5396 = vmatprep.mubr.f32.mxu0 %v8392_v4  ;;  %6070 = vmatpush3.bf16.msra.mxu0 %v9647_v62  ;;  %v9671_v41 = vpack.c.bf16 %v9669_v15, %v9670_v9  ;;  %v9683_v9 = vld [vmem:[#allocation33_spill] sm:$0xff] }
 0x246   :  { %2084 = vmatmul.mubr.f32.gmra.mrb[6].mxu1 %v8317_v54  ;;  %6072 = vmatprep.subr.bf16.mxu0 %v9654_v16  ;;  %v9684_v27 = vand.u32 4294901760, %v9683_v9 }
 0x247   :  { %2089 = vmatprep.mubr.f32.mxu1 %v9613_v36  ;;  %5850 = vmatpush1.bf16.msra.mxu1 %v9657_v31  ;;  %v9665_v31 = vld [vmem:[#allocation77_spill] sm:$0xff] }
 0x248   :  { %5397 = vmatmul.mubr.f32.gmra.mrb[22].mxu0 %v8372_v28  ;;  %5852 = vmatprep.subr.bf16.mxu1 %v9660_v63  ;;  %v9667_v24 = vpack.c.bf16 %v9665_v31, %v9666_v29  ;;  %v9668_v63 = vld [vmem:[#allocation24_spill] sm:$0xff]  ;;  %v9676_v29 = vld [vmem:[#allocation83_spill] sm:$0xff] }
 0x249   :  { %5399 = vmatprep.mubr.f32.mxu0 %v8417_v1  ;;  %6074 = vmatpush3.bf16.msra.mxu0 %v9654_v16  ;;  %v9678_v15 = vpack.c.bf16 %v9676_v29, %v9677_v38  ;;  %v9686_v38 = vld [vmem:[#allocation86_spill] sm:$0xff] }
 0x24a   :  { %2091 = vmatmul.mubr.f32.gmra.mrb[8].mxu1 %v8341_v56  ;;  %6076 = vmatprep.subr.bf16.mxu0 %v9661_v17 }
 0x24b   :  { %2096 = vmatprep.mubr.f32.mxu1 %v9613_v36  ;;  %5854 = vmatpush1.bf16.msra.mxu1 %v9664_v34  ;;  %v9672_v34 = vld [vmem:[#allocation81_spill] sm:$0xff] }
 0x24c   :  { %5400 = vmatmul.mubr.f32.gmra.mrb[24].mxu0 %v8398_v32  ;;  %5856 = vmatprep.subr.bf16.mxu1 %v9667_v24  ;;  %v9674_v31 = vpack.c.bf16 %v9672_v34, %v9673_v11  ;;  %v9675_v24 = vld [vmem:[#allocation34_spill] sm:$0xff]  ;;  %v9681_v34 = vld [vmem:[#allocation32_spill] sm:$0xff] }
 0x24d   :  { %5402 = vmatprep.mubr.f32.mxu0 %v8445_v3  ;;  %6078 = vmatpush3.bf16.msra.mxu0 %v9661_v17  ;;  %v9682_v11 = vand.u32 4294901760, %v9681_v34  ;;  %v9690_v34 = vld [vmem:[#allocation37_spill] sm:$0xff] }
 0x24e   :  { %2098 = vmatmul.mubr.f32.gmra.mrb[10].mxu1 %v8336_v59  ;;  %6080 = vmatprep.subr.bf16.mxu0 %v9668_v63  ;;  %v9691_v9 = vand.u32 4294901760, %v9690_v34  ;;  %v9700_v34 = vld [vmem:[#allocation96_spill] sm:$0xff] }
 0x24f   :  { %2103 = vmatprep.mubr.f32.mxu1 %v9613_v36  ;;  %5858 = vmatpush1.bf16.msra.mxu1 %v9671_v41  ;;  %v9679_v41 = vpack.c.bf16 %v9594_v58, %v9593_v50  ;;  %v6091_v29 = vpack.c.bf16 %v9684_v27, %v9682_v11  ;;  %v9689_v58 = vld [vmem:[#allocation94_spill] sm:$0xff] }
 0x250   :  { %5403 = vmatmul.mubr.f32.gmra.mrb[26].mxu0 %v8425_v22  ;;  %5860 = vmatprep.subr.bf16.mxu1 %v9674_v31  ;;  %v9680_v31 = vld [vmem:[#allocation39_spill] sm:$0xff]  ;;  %v9692_v27 = vld [vmem:[#allocation38_spill] sm:$0xff] }
 0x251   :  { %5405 = vmatprep.mubr.f32.mxu0 %v8460_v35  ;;  %6082 = vmatpush3.bf16.msra.mxu0 %v9668_v63  ;;  %v9693_v11 = vand.u32 4294901760, %v9692_v27  ;;  %v9702_v27 = vld [vmem:[#allocation46_spill] sm:$0xff] }
 0x252   :  { %2105 = vmatmul.mubr.f32.gmra.mrb[12].mxu1 %v8379_v14  ;;  %6084 = vmatprep.subr.bf16.mxu0 %v9675_v24 }
 0x253   :  { %2110 = vmatprep.mubr.f32.mxu1 %v9613_v36  ;;  %5862 = vmatpush1.bf16.msra.mxu1 %v9678_v15  ;;  %v9685_v15 = vld [vmem:[#allocation87_spill] sm:$0xff]  ;;  %v6095_v50 = vpack.c.bf16 %v9693_v11, %v9691_v9  ;;  %v9701_v9 = vld [vmem:[#allocation44_spill] sm:$0xff] }
 0x254   :  { %5406 = vmatmul.mubr.f32.gmra.mrb[28].mxu0 %v8451_v26  ;;  %5864 = vmatprep.subr.bf16.mxu1 %v9679_v41  ;;  %v9687_v5 = vpack.c.bf16 %v9685_v15, %v9686_v38  ;;  %v9688_v41 = vld [vmem:[#allocation15_spill] sm:$0xff] }
 0x255   :  { %5408 = vmatprep.mubr.f32.mxu0 %v8493_v55  ;;  %6086 = vmatpush3.bf16.msra.mxu0 %v9675_v24  ;;  %v9694_v15 = vld [vmem:[#allocation71_spill] sm:$0xff] }
 0x256   :  { %2112 = vmatmul.mubr.f32.gmra.mrb[14].mxu1 %v8357_v18  ;;  %6088 = vmatprep.subr.bf16.mxu0 %v9680_v31  ;;  %v9704_v11 = vld [vmem:[#allocation47_spill] sm:$0xff] }
 0x257   :  { %2117 = vmatprep.mubr.f32.mxu1 %v9613_v36  ;;  %5866 = vmatpush1.bf16.msra.mxu1 %v9687_v5  ;;  %v9695_v5 = vld [vmem:[#allocation97_spill] sm:$0xff] }
 0x258   :  { %5409 = vmatmul.mubr.f32.gmra.mrb[30].mxu0 %v8484_v48  ;;  %5868 = vmatprep.subr.bf16.mxu1 %v9688_v41  ;;  %v9696_v41 = vld [vmem:[#allocation42_spill] sm:$0xff] }
 0x259   :  { %6090 = vmatpush3.bf16.msra.mxu0 %v9680_v31  ;;  %5443 = vmatprep.mubr.f32.mxu0 %v9689_v58  ;;  %v9697_v38 = vand.u32 4294901760, %v9696_v41  ;;  %v9699_v58 = vand.u32 4294901760, %v9698_v2  ;;  %v9706_v41 = vld [vmem:[#allocation98_spill] sm:$0xff] }
 0x25a   :  { %2119 = vmatmul.mubr.f32.gmra.mrb[16].mxu1 %v8403_v46  ;;  %6092 = vmatprep.subr.bf16.mxu0 %v6091_v29  ;;  %v9709_v2 = vld [vmem:[#allocation58_spill] sm:$0xff] }
 0x25b   :  { %2124 = vmatprep.mubr.f32.mxu1 %v9613_v36  ;;  %v6099_v51 = vpack.c.bf16 %v9699_v58, %v9697_v38  ;;  %v9707_v58 = vld [vmem:[#allocation57_spill] sm:$0xff]  ;;  %v9710_v38 = vand.u32 4294901760, %v9709_v2  ;;  %v9719_v2 = vld [vmem:[#allocation72_spill] sm:$0xff] }
 0x25c   :  { %5444 = vmatmul.mubr.f32.vlgmr.msra.gmra.mrb[16].mxu0 %v9694_v15 }
 0x25d   :  { %5446 = vmatprep.mubr.f32.mxu0 %v9695_v5  ;;  %6094 = vmatpush3.bf16.msra.mxu0 %v6091_v29  ;;  %v9703_v29 = vand.u32 4294901760, %v9702_v27  ;;  %v9705_v5 = vand.u32 4294901760, %v9704_v11  ;;  %v9711_v27 = vld [vmem:[#allocation45_spill] sm:$0xff] }
 0x25e   :  { %2126 = vmatmul.mubr.f32.gmra.mrb[18].mxu1 %v8385_v12  ;;  %6096 = vmatprep.subr.bf16.mxu0 %v6095_v50  ;;  %v9715_v11 = vld [vmem:[#allocation61_spill] sm:$0xff] }
 0x25f   :  { %2131 = vmatprep.mubr.f32.mxu1 %v9613_v36  ;;  %v6103_v15 = vpack.c.bf16 %v9705_v5, %v9703_v29  ;;  %v9712_v5 = vld [vmem:[#allocation59_spill] sm:$0xff]  ;;  %v9713_v29 = vld [vmem:[#allocation60_spill] sm:$0xff] }
 0x260   :  { %5447 = vmatmul.mubr.f32.gmra.mrb[18].mxu0 %v9700_v34 }
 0x261   :  { %5449 = vmatprep.mubr.f32.mxu0 %v9701_v9  ;;  %6098 = vmatpush3.bf16.msra.mxu0 %v6095_v50  ;;  %v9708_v50 = vand.u32 4294901760, %v9707_v58  ;;  %v9717_v58 = vld [vmem:[#allocation99_spill] sm:$0xff] }
 0x262   :  { %2133 = vmatmul.mubr.f32.gmra.mrb[20].mxu1 %v8430_v19  ;;  %6100 = vmatprep.subr.bf16.mxu0 %v6099_v51 }
 0x263   :  { %2138 = vmatprep.mubr.f32.mxu1 %v9613_v36  ;;  %v6107_v9 = vpack.c.bf16 %v9710_v38, %v9708_v50  ;;  %v9718_v50 = vld [vmem:[#allocation101_spill] sm:$0xff] }
 0x264   :  { %5450 = vmatmul.mubr.f32.gmra.mrb[20].mxu0 %v9706_v41  ;;  %v9721_v38 = vld [vmem:[#allocation73_spill] sm:$0xff] }
 0x265   :  { %5452 = vmatprep.mubr.f32.mxu0 %v8406_v43  ;;  %6102 = vmatpush3.bf16.msra.mxu0 %v6099_v51  ;;  %v9714_v51 = vand.u32 4294901760, %v9713_v29  ;;  %v9716_v43 = vand.u32 4294901760, %v9715_v11  ;;  %v9723_v29 = vld [vmem:[#allocation100_spill] sm:$0xff] }
 0x266   :  { %2140 = vmatmul.mubr.f32.gmra.mrb[22].mxu1 %v8408_v13  ;;  %6104 = vmatprep.subr.bf16.mxu0 %v6103_v15 }
 0x267   :  { %2145 = vmatprep.mubr.f32.mxu1 %v9613_v36  ;;  %v6111_v41 = vpack.c.bf16 %v9716_v43, %v9714_v51  ;;  %v9724_v43 = vld [vmem:[#allocation74_spill] sm:$0xff]  ;;  %v9726_v51 = vld [vmem:[#allocation75_spill] sm:$0xff] }
 0x268   :  { %5453 = vmatmul.mubr.f32.gmra.mrb[22].mxu0 %v9711_v27  ;;  %v9727_v11 = vand.u32 4294901760, %v9726_v51 }
 0x269   :  { %5455 = vmatprep.mubr.f32.mxu0 %v9712_v5  ;;  %6106 = vmatpush3.bf16.msra.mxu0 %v6103_v15  ;;  %v9720_v15 = vand.u32 4294901760, %v9719_v2  ;;  %v9722_v5 = vand.u32 4294901760, %v9721_v38  ;;  %v9743_v2 = vand.u32 4294901760, %v9599_v45  ;;  %v9746_v45 = vand.u32 4294901760, %v9632_v37  ;;  %v9755_v37 = vld [vmem:[#allocation52_spill] sm:$0xff] }
 0x26a   :  { %2147 = vmatmul.mubr.f32.gmra.mrb[24].mxu1 %v8453_v60  ;;  %6108 = vmatprep.subr.bf16.mxu0 %v6107_v9 }
 0x26b   :  { %2152 = vmatprep.mubr.f32.mxu1 %v9613_v36  ;;  %v6115_v27 = vpack.c.bf16 %v9722_v5, %v9720_v15  ;;  %v9731_v5 = vld [vmem:[#allocation22_spill] sm:$0xff] }
 0x26c   :  { %5456 = vmatmul.mubr.f32.gmra.mrb[24].mxu0 %v9717_v58 }
 0x26d   :  { %5458 = vmatprep.mubr.f32.mxu0 %v9718_v50  ;;  %6110 = vmatpush3.bf16.msra.mxu0 %v6107_v9  ;;  %v9725_v9 = vand.u32 4294901760, %v9724_v43 }
 0x26e   :  { %2154 = vmatmul.mubr.f32.gmra.mrb[26].mxu1 %v8437_v25  ;;  %6112 = vmatprep.subr.bf16.mxu0 %v6111_v41 }
 0x26f   :  { %2159 = vmatprep.mubr.f32.mxu1 %v9613_v36  ;;  %v6119_v50 = vpack.c.bf16 %v9727_v11, %v9725_v9  ;;  %v9760_v9 = vld [vmem:[#allocation54_spill] sm:$0xff]  ;;  %v9762_v11 = vld [vmem:[#allocation55_spill] sm:$0xff] }
 0x270   :  { %5459 = vmatmul.mubr.f32.gmra.mrb[26].mxu0 %v9723_v29  ;;  %v9761_v51 = vand.u32 4294901760, %v9760_v9 }
 0x271   :  { %5461 = vmatprep.mubr.f32.mxu0 %v8478_v40  ;;  %6114 = vmatpush3.bf16.msra.mxu0 %v6111_v41  ;;  %v9728_v41 = vld [vmem:[#allocation12_spill] sm:$0xff] }
 0x272   :  { %2161 = vmatmul.mubr.f32.gmra.mrb[28].mxu1 %v8480_v20  ;;  %6116 = vmatprep.subr.bf16.mxu0 %v6115_v27 }
 0x273   :  { %2166 = vmatprep.mubr.f32.mxu1 %v9613_v36 }
 0x274   :  { %5462 = vmatmul.mubr.f32.gmra.mrb[28].mxu0 %v8468_v7 }
 0x275   :  { %5464 = vmatprep.mubr.f32.mxu0 %v8501_v61  ;;  %6118 = vmatpush3.bf16.msra.mxu0 %v6115_v27  ;;  %v9729_v27 = vld [vmem:[#allocation19_spill] sm:$0xff] }
 0x276   :  { %2168 = vmatmul.mubr.f32.gmra.mrb[30].mxu1 %v8474_v42  ;;  %6120 = vmatprep.subr.bf16.mxu0 %v6119_v50 }
 0x277   :  { %2302 = vmatprep.mubr.f32.mxu1 %v9613_v36 }
 0x278   :  { %5465 = vmatmul.mubr.f32.gmra.mrb[30].mxu0 %v8498_v49 }
 0x279   :  { %6122 = vmatpush3.bf16.msra.mxu0 %v6119_v50  ;;  %5499 = vmatprep.mubr.f32.mxu0 %v8303_v53  ;;  %v9742_v50 = vand.u32 4294901760, %v9598_v57  ;;  %v9745_v57 = vand.u32 4294901760, %v9633_v30 }
 0x27a   :  { %2305 = vmatmul.mubr.f32.vlgmr.msra.gmra.mrb[0].mxu1 %v8311_v6  ;;  %6124 = vmatprep.subr.bf16.mxu0 %v9631_v23  ;;  %v9730_v6 = vld [vmem:[#allocation13_spill] sm:$0xff] }
 0x27b   :  { %5870 = vmatpush1.bf16.msra.mxu1 %v9728_v41  ;;  %2310 = vmatprep.mubr.f32.mxu1 %v9613_v36  ;;  %v5899_v15 = vpack.c.bf16 %v9743_v2, %v9742_v50  ;;  %v9763_v50 = vand.u32 4294901760, %v9762_v11 }
 0x27c   :  { %5500 = vmatmul.mubr.f32.vlgmr.msra.gmra.mrb[16].mxu0 %v8300_v52  ;;  %5872 = vmatprep.subr.bf16.mxu1 %v9729_v27 }
 0x27d   :  { %5502 = vmatprep.mubr.f32.mxu0 %v8319_v21  ;;  %6126 = vmatpush3.bf16.msra.mxu0 %v9631_v23  ;;  %v9732_v23 = vld [vmem:[#allocation14_spill] sm:$0xff]  ;;  %v5909_v2 = vpack.c.bf16 %v9763_v50, %v9761_v51  ;;  %v9781_v51 = vld [vmem:[#allocation76_spill] sm:$0xff]  ;;  %v9783_v50 = vld [vmem:[#allocation77_spill] sm:$0xff] }
 0x27e   :  { %2313 = vmatmul.mubr.f32.gmra.mrb[2].mxu1 %v9635_v0  ;;  %6128 = vmatprep.subr.bf16.mxu0 %v9639_v44  ;;  %v9733_v0 = vld [vmem:[#allocation26_spill] sm:$0xff]  ;;  %v9782_v11 = vand.u32 4294901760, %v9781_v51 }
 0x27f   :  { %2318 = vmatprep.mubr.f32.mxu1 %v9613_v36  ;;  %5874 = vmatpush1.bf16.msra.mxu1 %v9730_v6 }
 0x280   :  { %5503 = vmatmul.mubr.f32.gmra.mrb[18].mxu0 %v8317_v54  ;;  %5876 = vmatprep.subr.bf16.mxu1 %v9731_v5 }
 0x281   :  { %5505 = vmatprep.mubr.f32.mxu0 %v8341_v56  ;;  %6130 = vmatpush3.bf16.msra.mxu0 %v9639_v44  ;;  %v9735_v44 = vld [vmem:[#allocation28_spill] sm:$0xff] }
 0x282   :  { %2321 = vmatmul.mubr.f32.gmra.mrb[4].mxu1 %v8331_v47  ;;  %6132 = vmatprep.subr.bf16.mxu0 %v9647_v62  ;;  %v9734_v47 = vld [vmem:[#allocation16_spill] sm:$0xff] }
 0x283   :  { %2326 = vmatprep.mubr.f32.mxu1 %v9613_v36  ;;  %5878 = vmatpush1.bf16.msra.mxu1 %v9732_v23 }
 0x284   :  { %5506 = vmatmul.mubr.f32.gmra.mrb[20].mxu0 %v8336_v59  ;;  %5880 = vmatprep.subr.bf16.mxu1 %v9733_v0 }
 0x285   :  { %5508 = vmatprep.mubr.f32.mxu0 %v8379_v14  ;;  %6134 = vmatpush3.bf16.msra.mxu0 %v9647_v62  ;;  %v9737_v62 = vld [vmem:[#allocation30_spill] sm:$0xff] }
 0x286   :  { %2329 = vmatmul.mubr.f32.gmra.mrb[6].mxu1 %v9643_v39  ;;  %6136 = vmatprep.subr.bf16.mxu0 %v9654_v16  ;;  %v9736_v39 = vld [vmem:[#allocation18_spill] sm:$0xff] }
 0x287   :  { %2334 = vmatprep.mubr.f32.mxu1 %v9613_v36  ;;  %5882 = vmatpush1.bf16.msra.mxu1 %v9734_v47 }
 0x288   :  { %5509 = vmatmul.mubr.f32.gmra.mrb[22].mxu0 %v8357_v18  ;;  %5884 = vmatprep.subr.bf16.mxu1 %v9735_v44 }
 0x289   :  { %5511 = vmatprep.mubr.f32.mxu0 %v8403_v46  ;;  %6138 = vmatpush3.bf16.msra.mxu0 %v9654_v16  ;;  %v9739_v16 = vld [vmem:[#allocation25_spill] sm:$0xff] }
 0x28a   :  { %2337 = vmatmul.mubr.f32.gmra.mrb[8].mxu1 %v8353_v10  ;;  %6140 = vmatprep.subr.bf16.mxu0 %v9661_v17  ;;  %v9738_v10 = vld [vmem:[#allocation21_spill] sm:$0xff] }
 0x28b   :  { %2342 = vmatprep.mubr.f32.mxu1 %v9613_v36  ;;  %5886 = vmatpush1.bf16.msra.mxu1 %v9736_v39 }
 0x28c   :  { %5512 = vmatmul.mubr.f32.gmra.mrb[24].mxu0 %v8385_v12  ;;  %5888 = vmatprep.subr.bf16.mxu1 %v9737_v62 }
 0x28d   :  { %5514 = vmatprep.mubr.f32.mxu0 %v8430_v19  ;;  %6142 = vmatpush3.bf16.msra.mxu0 %v9661_v17  ;;  %v9741_v17 = vld [vmem:[#allocation35_spill] sm:$0xff] }
 0x28e   :  { %2345 = vmatmul.mubr.f32.gmra.mrb[10].mxu1 %v8347_v8  ;;  %6144 = vmatprep.subr.bf16.mxu0 %v9668_v63  ;;  %v9740_v8 = vld [vmem:[#allocation31_spill] sm:$0xff] }
 0x28f   :  { %2350 = vmatprep.mubr.f32.mxu1 %v9613_v36  ;;  %5890 = vmatpush1.bf16.msra.mxu1 %v9738_v10 }
 0x290   :  { %5515 = vmatmul.mubr.f32.gmra.mrb[26].mxu0 %v8408_v13  ;;  %5892 = vmatprep.subr.bf16.mxu1 %v9739_v16 }
 0x291   :  { %5517 = vmatprep.mubr.f32.mxu0 %v8453_v60  ;;  %6146 = vmatpush3.bf16.msra.mxu0 %v9668_v63 }
 0x292   :  { %2353 = vmatmul.mubr.f32.gmra.mrb[12].mxu1 %v8392_v4  ;;  %6148 = vmatprep.subr.bf16.mxu0 %v9675_v24  ;;  %v9744_v4 = vld [vmem:[#allocation36_spill] sm:$0xff] }
 0x293   :  { %2358 = vmatprep.mubr.f32.mxu1 %v9613_v36  ;;  %5894 = vmatpush1.bf16.msra.mxu1 %v9740_v8 }
 0x294   :  { %5518 = vmatmul.mubr.f32.gmra.mrb[28].mxu0 %v8437_v25  ;;  %5896 = vmatprep.subr.bf16.mxu1 %v9741_v17 }
 0x295   :  { %5520 = vmatprep.mubr.f32.mxu0 %v8480_v20  ;;  %6150 = vmatpush3.bf16.msra.mxu0 %v9675_v24  ;;  %v9756_v24 = vand.u32 4294901760, %v9755_v37 }
 0x296   :  { %2361 = vmatmul.mubr.f32.gmra.mrb[14].mxu1 %v8372_v28  ;;  %6152 = vmatprep.subr.bf16.mxu0 %v9680_v31  ;;  %v5901_v28 = vpack.c.bf16 %v9746_v45, %v9745_v57  ;;  %v9766_v45 = vld [vmem:[#allocation63_spill] sm:$0xff] }
 0x297   :  { %2366 = vmatprep.mubr.f32.mxu1 %v9613_v36  ;;  %5898 = vmatpush1.bf16.msra.mxu1 %v9744_v4 }
 0x298   :  { %5521 = vmatmul.mubr.f32.gmra.mrb[30].mxu0 %v8474_v42  ;;  %5900 = vmatprep.subr.bf16.mxu1 %v5899_v15  ;;  %v9764_v15 = vld [vmem:[#allocation62_spill] sm:$0xff] }
 0x299   :  { %6154 = vmatpush3.bf16.msra.mxu0 %v9680_v31  ;;  %5555 = vmatprep.mubr.f32.mxu0 %v8303_v53  ;;  %v9757_v31 = vld [vmem:[#allocation53_spill] sm:$0xff]  ;;  %v9765_v57 = vand.u32 4294901760, %v9764_v15 }
 0x29a   :  { %2369 = vmatmul.mubr.f32.gmra.mrb[16].mxu1 %v8417_v1  ;;  %v9748_v1 = vld [vmem:[#allocation49_spill] sm:$0xff]  ;;  %v9758_v38 = vand.u32 4294901760, %v9757_v31  ;;  %v9777_v31 = vld [vmem:[#allocation68_spill] sm:$0xff] }
 0x29b   :  { %2374 = vmatprep.mubr.f32.mxu1 %v9613_v36 }
 0x29c   :  { %5556 = vmatmul.mubr.f32.vlgmr.msra.gmra.mrb[16].mxu0 %v8300_v52  ;;  %v5907_v43 = vpack.c.bf16 %v9758_v38, %v9756_v24  ;;  %v9778_v38 = vand.u32 4294901760, %v9777_v31 }
 0x29d   :  { %5558 = vmatprep.mubr.f32.mxu0 %v8319_v21 }
 0x29e   :  { %2377 = vmatmul.mubr.f32.gmra.mrb[18].mxu1 %v8398_v32  ;;  %v9747_v32 = vand.u32 4294901760, %v9637_v33  ;;  %v9759_v33 = vld [vmem:[#allocation71_spill] sm:$0xff] }
 0x29f   :  { %2382 = vmatprep.mubr.f32.mxu1 %v9613_v36 }
 0x2a0   :  { %5559 = vmatmul.mubr.f32.gmra.mrb[18].mxu0 %v8317_v54 }
 0x2a1   :  { %5561 = vmatprep.mubr.f32.mxu0 %v8341_v56 }
 0x2a2   :  { %2385 = vmatmul.mubr.f32.gmra.mrb[20].mxu1 %v8445_v3 }
 0x2a3   :  { %2390 = vmatprep.mubr.f32.mxu1 %v9613_v36 }
 0x2a4   :  { %5562 = vmatmul.mubr.f32.gmra.mrb[20].mxu0 %v8336_v59 }
 0x2a5   :  { %5564 = vmatprep.mubr.f32.mxu0 %v8379_v14 }
 0x2a6   :  { %2393 = vmatmul.mubr.f32.gmra.mrb[22].mxu1 %v8425_v22  ;;  %v9749_v22 = vand.u32 4294901760, %v9748_v1  ;;  %v9768_v1 = vld [vmem:[#allocation97_spill] sm:$0xff] }
 0x2a7   :  { %2398 = vmatprep.mubr.f32.mxu1 %v9613_v36 }
 0x2a8   :  { %5565 = vmatmul.mubr.f32.gmra.mrb[22].mxu0 %v8357_v18  ;;  %v5903_v3 = vpack.c.bf16 %v9749_v22, %v9747_v32  ;;  %v9769_v22 = vld [vmem:[#allocation64_spill] sm:$0xff] }
 0x2a9   :  { %5567 = vmatprep.mubr.f32.mxu0 %v8403_v46 }
 0x2aa   :  { %2401 = vmatmul.mubr.f32.gmra.mrb[24].mxu1 %v8460_v35 }
 0x2ab   :  { %2406 = vmatprep.mubr.f32.mxu1 %v9613_v36 }
 0x2ac   :  { %5568 = vmatmul.mubr.f32.gmra.mrb[24].mxu0 %v8385_v12 }
 0x2ad   :  { %5570 = vmatprep.mubr.f32.mxu0 %v8430_v19 }
 0x2ae   :  { %2409 = vmatmul.mubr.f32.gmra.mrb[26].mxu1 %v8451_v26  ;;  %v9750_v26 = vld [vmem:[#allocation94_spill] sm:$0xff] }
 0x2af   :  { %2414 = vmatprep.mubr.f32.mxu1 %v9613_v36 }
 0x2b0   :  { %5571 = vmatmul.mubr.f32.gmra.mrb[26].mxu0 %v8408_v13 }
 0x2b1   :  { %5573 = vmatprep.mubr.f32.mxu0 %v8453_v60 }
 0x2b2   :  { %2417 = vmatmul.mubr.f32.gmra.mrb[28].mxu1 %v8493_v55  ;;  %v9751_v55 = vld [vmem:[#allocation50_spill] sm:$0xff] }
 0x2b3   :  { %2422 = vmatprep.mubr.f32.mxu1 %v9613_v36  ;;  %v9752_v35 = vand.u32 4294901760, %v9751_v55 }
 0x2b4   :  { %5574 = vmatmul.mubr.f32.gmra.mrb[28].mxu0 %v8437_v25 }
 0x2b5   :  { %5576 = vmatprep.mubr.f32.mxu0 %v8480_v20 }
 0x2b6   :  { %2425 = vmatmul.mubr.f32.gmra.mrb[30].mxu1 %v8484_v48  ;;  %v9753_v48 = vld [vmem:[#allocation51_spill] sm:$0xff] }
 0x2b7   :  { %2527 = vmatprep.mubr.f32.mxu1 %v9613_v36  ;;  %v9754_v63 = vand.u32 4294901760, %v9753_v48  ;;  %v9773_v48 = vld [vmem:[#allocation66_spill] sm:$0xff] }
 0x2b8   :  { %5577 = vmatmul.mubr.f32.gmra.mrb[30].mxu0 %v8474_v42 }
 0x2b9   :  { %v5905_v30 = vpack.c.bf16 %v9754_v63, %v9752_v35  ;;  %v9774_v63 = vand.u32 4294901760, %v9773_v48  ;;  %v9794_v48 = vld [vmem:[#allocation98_spill] sm:$0xff] }
 0x2ba   :  { %2531 = vmatmul.mubr.f32.vlgmr.msra.gmra.mrb[0].mxu1 %v9750_v26  ;;  %v9771_v26 = vld [vmem:[#allocation65_spill] sm:$0xff] }
 0x2bb   :  { %5902 = vmatpush1.bf16.msra.mxu1 %v5901_v28  ;;  %2536 = vmatprep.mubr.f32.mxu1 %v9613_v36  ;;  %v9767_v28 = vand.u32 4294901760, %v9766_v45  ;;  %v9772_v55 = vand.u32 4294901760, %v9771_v26  ;;  %v9792_v26 = vld [vmem:[#allocation81_spill] sm:$0xff] }
 0x2bc   :  { %5904 = vmatprep.subr.bf16.mxu1 %v5903_v3  ;;  %v9770_v3 = vand.u32 4294901760, %v9769_v22  ;;  %v9790_v22 = vld [vmem:[#allocation80_spill] sm:$0xff] }
 0x2bd   :  { %v5911_v32 = vpack.c.bf16 %v9767_v28, %v9765_v57  ;;  %v9785_v57 = vld [vmem:[#allocation44_spill] sm:$0xff]  ;;  %v9788_v28 = vld [vmem:[#allocation79_spill] sm:$0xff] }
 0x2be   :  { %2540 = vmatmul.mubr.f32.gmra.mrb[2].mxu1 %v9759_v33  ;;  %v5913_v35 = vpack.c.bf16 %v9772_v55, %v9770_v3  ;;  %v9791_v3 = vand.u32 4294901760, %v9790_v22  ;;  %v9793_v55 = vand.u32 4294901760, %v9792_v26 }
 0x2bf   :  { %2545 = vmatprep.mubr.f32.mxu1 %v9613_v36  ;;  %5906 = vmatpush1.bf16.msra.mxu1 %v5905_v30  ;;  %v9775_v30 = vld [vmem:[#allocation67_spill] sm:$0xff] }
 0x2c0   :  { %5908 = vmatprep.subr.bf16.mxu1 %v5907_v43  ;;  %v9776_v37 = vand.u32 4294901760, %v9775_v30  ;;  %v9779_v43 = vld [vmem:[#allocation69_spill] sm:$0xff] }
 0x2c1   :  { %v9780_v33 = vand.u32 4294901760, %v9779_v43 }
 0x2c2   :  { %2549 = vmatmul.mubr.f32.gmra.mrb[4].mxu1 %v9768_v1  ;;  %v5915_v24 = vpack.c.bf16 %v9776_v37, %v9774_v63  ;;  %v9795_v63 = vld [vmem:[#allocation82_spill] sm:$0xff]  ;;  %v9797_v37 = vld [vmem:[#allocation83_spill] sm:$0xff] }
 0x2c3   :  { %2554 = vmatprep.mubr.f32.mxu1 %v9613_v36  ;;  %5910 = vmatpush1.bf16.msra.mxu1 %v5909_v2  ;;  %v5917_v9 = vpack.c.bf16 %v9780_v33, %v9778_v38  ;;  %v9784_v2 = vand.u32 4294901760, %v9783_v50  ;;  %v9796_v30 = vand.u32 4294901760, %v9795_v63  ;;  %v9799_v38 = vld [vmem:[#allocation84_spill] sm:$0xff]  ;;  %v9801_v33 = vld [vmem:[#allocation85_spill] sm:$0xff]  ;;  %v9804_v50 = vld [vmem:[#allocation86_spill] sm:$0xff] }
 0x2c4   :  { %5912 = vmatprep.subr.bf16.mxu1 %v5911_v32  ;;  %v9789_v32 = vand.u32 4294901760, %v9788_v28  ;;  %v9800_v43 = vand.u32 4294901760, %v9799_v38  ;;  %v9809_v28 = vld [vmem:[#allocation15_spill] sm:$0xff] }
 0x2c5   :  { %v5919_v15 = vpack.c.bf16 %v9784_v2, %v9782_v11  ;;  %v9803_v11 = vld [vmem:[#allocation56_spill] sm:$0xff]  ;;  %v9805_v2 = vand.u32 4294901760, %v9804_v50 }
 0x2c6   :  { %2558 = vmatmul.mubr.f32.gmra.mrb[6].mxu1 %v9700_v34  ;;  %v9786_v34 = vld [vmem:[#allocation78_spill] sm:$0xff] }
 0x2c7   :  { %2563 = vmatprep.mubr.f32.mxu1 %v9613_v36  ;;  %5914 = vmatpush1.bf16.msra.mxu1 %v5913_v35  ;;  %v9787_v45 = vand.u32 4294901760, %v9786_v34  ;;  %v5923_v35 = vpack.c.bf16 %v9793_v55, %v9791_v3 }
 0x2c8   :  { %5916 = vmatprep.subr.bf16.mxu1 %v5915_v24  ;;  %v9798_v24 = vand.u32 4294901760, %v9797_v37 }
 0x2c9   :  { %v5921_v1 = vpack.c.bf16 %v9789_v32, %v9787_v45  ;;  %v9808_v45 = vld [vmem:[#allocation45_spill] sm:$0xff]  ;;  %v9810_v32 = vld [vmem:[#allocation59_spill] sm:$0xff] }
 0x2ca   :  { %2567 = vmatmul.mubr.f32.gmra.mrb[8].mxu1 %v9785_v57  ;;  %v5925_v31 = vpack.c.bf16 %v9798_v24, %v9796_v30 }
 0x2cb   :  { %2572 = vmatprep.mubr.f32.mxu1 %v9613_v36  ;;  %5918 = vmatpush1.bf16.msra.mxu1 %v5917_v9  ;;  %v9802_v9 = vand.u32 4294901760, %v9801_v33 }
 0x2cc   :  { %5920 = vmatprep.subr.bf16.mxu1 %v5919_v15  ;;  %v9806_v15 = vld [vmem:[#allocation87_spill] sm:$0xff] }
 0x2cd   :  { %v5927_v51 = vpack.c.bf16 %v9802_v9, %v9800_v43  ;;  %v9807_v57 = vand.u32 4294901760, %v9806_v15 }
 0x2ce   :  { %2576 = vmatmul.mubr.f32.gmra.mrb[10].mxu1 %v9794_v48 }
 0x2cf   :  { %2581 = vmatprep.mubr.f32.mxu1 %v9613_v36  ;;  %5922 = vmatpush1.bf16.msra.mxu1 %v5921_v1  ;;  %v5929_v34 = vpack.c.bf16 %v9807_v57, %v9805_v2  ;;  %v9811_v1 = vld [vmem:[#allocation101_spill] sm:$0xff] }
 0x2d0   :  { %5924 = vmatprep.subr.bf16.mxu1 %v5923_v35 }
 0x2d2   :  { %2585 = vmatmul.mubr.f32.gmra.mrb[12].mxu1 %v9803_v11 }
 0x2d3   :  { %2590 = vmatprep.mubr.f32.mxu1 %v9613_v36  ;;  %5926 = vmatpush1.bf16.msra.mxu1 %v5925_v31 }
 0x2d4   :  { %5928 = vmatprep.subr.bf16.mxu1 %v5927_v51 }
 0x2d6   :  { %2594 = vmatmul.mubr.f32.gmra.mrb[14].mxu1 %v9808_v45 }
 0x2d7   :  { %2599 = vmatprep.mubr.f32.mxu1 %v9613_v36  ;;  %5930 = vmatpush1.bf16.msra.mxu1 %v5929_v34 }
 0x2d8   :  { %5932 = vmatprep.subr.bf16.mxu1 %v9809_v28 }
 0x2da   :  { %2603 = vmatmul.mubr.f32.gmra.mrb[16].mxu1 %v9810_v32 }
 0x2db   :  { %2608 = vmatprep.mubr.f32.mxu1 %v9613_v36 }
 0x2de   :  { %2612 = vmatmul.mubr.f32.gmra.mrb[18].mxu1 %v9717_v58 }
 0x2df   :  { %2617 = vmatprep.mubr.f32.mxu1 %v9613_v36 }
 0x2e2   :  { %2621 = vmatmul.mubr.f32.gmra.mrb[20].mxu1 %v9811_v1 }
 0x2e3   :  { %2626 = vmatprep.mubr.f32.mxu1 %v9613_v36 }
 0x2e6   :  { %2630 = vmatmul.mubr.f32.gmra.mrb[22].mxu1 %v9723_v29 }
 0x2e7   :  { %2635 = vmatprep.mubr.f32.mxu1 %v9613_v36 }
 0x2ea   :  { %2639 = vmatmul.mubr.f32.gmra.mrb[24].mxu1 %v8478_v40 }
 0x2eb   :  { %2644 = vmatprep.mubr.f32.mxu1 %v9613_v36 }
 0x2ee   :  { %2648 = vmatmul.mubr.f32.gmra.mrb[26].mxu1 %v8468_v7 }
 0x2ef   :  { %2653 = vmatprep.mubr.f32.mxu1 %v9613_v36 }
 0x2f2   :  { %2657 = vmatmul.mubr.f32.gmra.mrb[28].mxu1 %v8501_v61 }
 0x2f3   :  { %2662 = vmatprep.mubr.f32.mxu1 %v9613_v36 }
 0x2f6   :  { %2666 = vmatmul.mubr.f32.gmra.mrb[30].mxu1 %v8498_v49 }
 0x2f7   :  { %2832 = vmatprep.mubr.f32.mxu1 %v9613_v36 }
 0x2fa   :  { %2834 = vmatmul.mubr.f32.vlgmr.msra.gmra.mrb[0].mxu1 %v8303_v53 }
 0x2fb   :  { %5934 = vmatpush1.bf16.msra.mxu1 %v9728_v41  ;;  %2839 = vmatprep.mubr.f32.mxu1 %v9613_v36 }
 0x2fc   :  { %5936 = vmatprep.subr.bf16.mxu1 %v9729_v27 }
 0x2fe   :  { %2841 = vmatmul.mubr.f32.gmra.mrb[2].mxu1 %v8300_v52 }
 0x2ff   :  { %2846 = vmatprep.mubr.f32.mxu1 %v9613_v36  ;;  %5938 = vmatpush1.bf16.msra.mxu1 %v9730_v6 }
 0x300   :  { %5940 = vmatprep.subr.bf16.mxu1 %v9731_v5 }
 0x302   :  { %2848 = vmatmul.mubr.f32.gmra.mrb[4].mxu1 %v8319_v21 }
 0x303   :  { %2853 = vmatprep.mubr.f32.mxu1 %v9613_v36  ;;  %5942 = vmatpush1.bf16.msra.mxu1 %v9732_v23 }
 0x304   :  { %5944 = vmatprep.subr.bf16.mxu1 %v9733_v0 }
 0x306   :  { %2855 = vmatmul.mubr.f32.gmra.mrb[6].mxu1 %v8317_v54 }
 0x307   :  { %2860 = vmatprep.mubr.f32.mxu1 %v9613_v36  ;;  %5946 = vmatpush1.bf16.msra.mxu1 %v9734_v47 }
 0x308   :  { %5948 = vmatprep.subr.bf16.mxu1 %v9735_v44 }
 0x30a   :  { %2862 = vmatmul.mubr.f32.gmra.mrb[8].mxu1 %v8341_v56 }
 0x30b   :  { %2867 = vmatprep.mubr.f32.mxu1 %v9613_v36  ;;  %5950 = vmatpush1.bf16.msra.mxu1 %v9736_v39 }
 0x30c   :  { %5952 = vmatprep.subr.bf16.mxu1 %v9737_v62 }
 0x30e   :  { %2869 = vmatmul.mubr.f32.gmra.mrb[10].mxu1 %v8336_v59 }
 0x30f   :  { %2874 = vmatprep.mubr.f32.mxu1 %v9613_v36  ;;  %5954 = vmatpush1.bf16.msra.mxu1 %v9738_v10 }
 0x310   :  { %5956 = vmatprep.subr.bf16.mxu1 %v9739_v16 }
 0x312   :  { %2876 = vmatmul.mubr.f32.gmra.mrb[12].mxu1 %v8379_v14 }
 0x313   :  { %2881 = vmatprep.mubr.f32.mxu1 %v9613_v36  ;;  %5958 = vmatpush1.bf16.msra.mxu1 %v9740_v8 }
 0x314   :  { %5960 = vmatprep.subr.bf16.mxu1 %v9741_v17 }
 0x316   :  { %2883 = vmatmul.mubr.f32.gmra.mrb[14].mxu1 %v8357_v18 }
 0x317   :  { %2888 = vmatprep.mubr.f32.mxu1 %v9613_v36  ;;  %5962 = vmatpush1.bf16.msra.mxu1 %v9744_v4 }
 0x31a   :  { %2890 = vmatmul.mubr.f32.gmra.mrb[16].mxu1 %v8403_v46 }
 0x31b   :  { %2895 = vmatprep.mubr.f32.mxu1 %v9613_v36 }
 0x31e   :  { %2897 = vmatmul.mubr.f32.gmra.mrb[18].mxu1 %v8385_v12 }
 0x31f   :  { %2902 = vmatprep.mubr.f32.mxu1 %v9613_v36 }
 0x322   :  { %2904 = vmatmul.mubr.f32.gmra.mrb[20].mxu1 %v8430_v19 }
 0x323   :  { %2909 = vmatprep.mubr.f32.mxu1 %v9613_v36 }
 0x326   :  { %2911 = vmatmul.mubr.f32.gmra.mrb[22].mxu1 %v8408_v13 }
 0x327   :  { %2916 = vmatprep.mubr.f32.mxu1 %v9613_v36 }
 0x32a   :  { %2918 = vmatmul.mubr.f32.gmra.mrb[24].mxu1 %v8453_v60 }
 0x32b   :  { %2923 = vmatprep.mubr.f32.mxu1 %v9613_v36 }
 0x32e   :  { %2925 = vmatmul.mubr.f32.gmra.mrb[26].mxu1 %v8437_v25 }
 0x32f   :  { %2930 = vmatprep.mubr.f32.mxu1 %v9613_v36 }
 0x332   :  { %2932 = vmatmul.mubr.f32.gmra.mrb[28].mxu1 %v8480_v20 }
 0x333   :  { %2937 = vmatprep.mubr.f32.mxu1 %v9613_v36 }
 0x336   :  { %2939 = vmatmul.mubr.f32.gmra.mrb[30].mxu1 %v8474_v42 }
 0x337   :  { %3041 = vmatprep.mubr.f32.mxu1 %v9613_v36 }
 0x33a   :  { %3043 = vmatmul.mubr.f32.vlgmr.msra.gmra.mrb[0].mxu1 %v8303_v53 }
 0x33b   :  { %3048 = vmatprep.mubr.f32.mxu1 %v9613_v36 }
 0x33e   :  { %3050 = vmatmul.mubr.f32.gmra.mrb[2].mxu1 %v8300_v52  ;;  %v1547_v52 = vld [vmem:[%s9052_s4] sm:$0x7]  ;;  %s6714_s4 = smov [#allocation8]  }
 0x33f   :  { %3055 = vmatprep.mubr.f32.mxu1 %v9613_v36  ;;  %s4493_s8 = sshll.u32 %s6714_s4, 4  ;;  %s4494_s8 = int_to_ptr.vmem [resolvable:$true] %s4493_s8 }
 0x340   :  { %s6678_s9 = scalar_lea.vmem %s4494_s8, 6144  ;;  %p6683_p11 = scmp.lt.s32.totalorder %s4494_s8, %s4494_s8 }
 0x341   :  { %p6679_p10 = scmp.ne.s32.totalorder %s4494_s8, %s6678_s9  ;;  %p6684_p12 = scmp.lt.s32.totalorder %s6678_s9, %s6678_s9 }
 0x342   :  { %3057 = vmatmul.mubr.f32.gmra.mrb[4].mxu1 %v8319_v21  ;;  %v1549_v21 = vlaneseq }
 0x343   :  { %3062 = vmatprep.mubr.f32.mxu1 %v9613_v36  ;;  %p6685_p13 = por %p6684_p12, %p6683_p11 }
 0x345   :  { %p6686_p0 = pnand %p6685_p13, %p6679_p10 }
 0x346   :  { %3064 = vmatmul.mubr.f32.gmra.mrb[6].mxu1 %v8317_v54 }
 0x347   :  { %3069 = vmatprep.mubr.f32.mxu1 %v9613_v36 }
 0x34a   :  { %3071 = vmatmul.mubr.f32.gmra.mrb[8].mxu1 %v8341_v56 }
 0x34b   :  { %3076 = vmatprep.mubr.f32.mxu1 %v9613_v36 }
 0x34e   :  { %3078 = vmatmul.mubr.f32.gmra.mrb[10].mxu1 %v8336_v59  ;;  %v8980_v59 = vshrl.u32 %v1549_v21, 7 }
 0x34f   :  { %3083 = vmatprep.mubr.f32.mxu1 %v9613_v36 }
 0x350   :  { %v1551_v4 = vsub.s32 0, %v8980_v59  ;;  %v1555_v22 = vsub.s32 1, %v8980_v59 }
 0x352   :  { %3085 = vmatmul.mubr.f32.gmra.mrb[12].mxu1 %v8379_v14  ;;  %v8997_v3 = vrot.slane %v1547_v52, %v1551_v4  ;;  %v8999_v26 = vrot.slane %v1547_v52, %v1555_v22 }
 0x353   :  { %3090 = vmatprep.mubr.f32.mxu1 %v9613_v36 }
 0x356   :  { %3092 = vmatmul.mubr.f32.gmra.mrb[14].mxu1 %v8357_v18  ;;  %v1559_v18 = vsub.s32 2, %v8980_v59 }
 0x357   :  { %3097 = vmatprep.mubr.f32.mxu1 %v9613_v36 }
 0x358   :  { %v1560_v53 = vrot.slane %v1547_v52, %v1559_v18 }
 0x35a   :  { %3099 = vmatmul.mubr.f32.gmra.mrb[16].mxu1 %v8403_v46 }
 0x35b   :  { %3104 = vmatprep.mubr.f32.mxu1 %v9613_v36 }
 0x35e   :  { %3106 = vmatmul.mubr.f32.gmra.mrb[18].mxu1 %v8385_v12 }
 0x35f   :  { %3111 = vmatprep.mubr.f32.mxu1 %v9613_v36 }
 0x362   :  { %3113 = vmatmul.mubr.f32.gmra.mrb[20].mxu1 %v8430_v19 }
 0x363   :  { %3118 = vmatprep.mubr.f32.mxu1 %v9613_v36 }
 0x366   :  { %3120 = vmatmul.mubr.f32.gmra.mrb[22].mxu1 %v8408_v13 }
 0x367   :  { %3125 = vmatprep.mubr.f32.mxu1 %v9613_v36 }
 0x36a   :  { %3127 = vmatmul.mubr.f32.gmra.mrb[24].mxu1 %v8453_v60 }
 0x36b   :  { %3132 = vmatprep.mubr.f32.mxu1 %v9613_v36 }
 0x36e   :  { %3134 = vmatmul.mubr.f32.gmra.mrb[26].mxu1 %v8437_v25 }
 0x36f   :  { %v5557_v54 = vpop.f32.mrb[16].mxu0  ;;  %3139 = vmatprep.mubr.f32.mxu1 %v9613_v36 }
 0x370   :  { %v6203_v56 = vadd.f32 %v5557_v54, %v1560_v53  ;;  %v4346_v14 = vpop.f32.mrb[17].mxu0 }
 0x371   :  { %v6204_v12 = vadd.f32 %v4346_v14, %v1560_v53 }
 0x372   :  { %4445 = vst [vmem:[#allocation8 + $0x28] sm:$0xff] %v6203_v56  ;;  %3141 = vmatmul.mubr.f32.gmra.mrb[28].mxu1 %v8480_v20 }
 0x373   :  { %4442 = vst [vmem:[#allocation8 + $0x10] sm:$0xff] %v6204_v12  ;;  %v5560_v46 = vpop.f32.mrb[18].mxu0  ;;  %3146 = vmatprep.mubr.f32.mxu1 %v9613_v36 }
 0x374   :  { %v6205_v13 = vadd.f32 %v5560_v46, %v1560_v53  ;;  %v4358_v60 = vpop.f32.mrb[19].mxu0 }
 0x375   :  { %v6206_v19 = vadd.f32 %v4358_v60, %v1560_v53 }
 0x376   :  { %4451 = vst [vmem:[#allocation8 + $0x58] sm:$0xff] %v6205_v13  ;;  %3148 = vmatmul.mubr.f32.gmra.mrb[30].mxu1 %v8474_v42 }
 0x377   :  { %4448 = vst [vmem:[#allocation8 + $0x40] sm:$0xff] %v6206_v19  ;;  %v5563_v25 = vpop.f32.mrb[20].mxu0 }
 0x378   :  { %v6207_v7 = vadd.f32 %v5563_v25, %v1560_v53  ;;  %v4370_v40 = vpop.f32.mrb[21].mxu0 }
 0x379   :  { %v6208_v49 = vadd.f32 %v4370_v40, %v1560_v53 }
 0x37a   :  { %4457 = vst [vmem:[#allocation8 + $0x88] sm:$0xff] %v6207_v7 }
 0x37b   :  { %4454 = vst [vmem:[#allocation8 + $0x70] sm:$0xff] %v6208_v49  ;;  %v5566_v61 = vpop.f32.mrb[22].mxu0 }
 0x37c   :  { %v6209_v58 = vadd.f32 %v5566_v61, %v1560_v53  ;;  %v4382_v20 = vpop.f32.mrb[23].mxu0 }
 0x37d   :  { %v6210_v29 = vadd.f32 %v4382_v20, %v1560_v53 }
 0x37e   :  { %4463 = vst [vmem:[#allocation8 + $0xb8] sm:$0xff] %v6209_v58 }
 0x37f   :  { %4460 = vst [vmem:[#allocation8 + $0xa0] sm:$0xff] %v6210_v29  ;;  %v5569_v36 = vpop.f32.mrb[24].mxu0 }
 0x380   :  { %v6211_v41 = vadd.f32 %v5569_v36, %v1560_v53  ;;  %v4394_v27 = vpop.f32.mrb[25].mxu0 }
 0x381   :  { %v6212_v6 = vadd.f32 %v4394_v27, %v1560_v53 }
 0x382   :  { %4469 = vst [vmem:[#allocation8 + $0xe8] sm:$0xff] %v6211_v41 }
 0x383   :  { %4466 = vst [vmem:[#allocation8 + $0xd0] sm:$0xff] %v6212_v6  ;;  %v5572_v42 = vpop.f32.mrb[26].mxu0 }
 0x384   :  { %v6213_v5 = vadd.f32 %v5572_v42, %v1560_v53  ;;  %v4406_v23 = vpop.f32.mrb[27].mxu0 }
 0x385   :  { %v6214_v0 = vadd.f32 %v4406_v23, %v1560_v53 }
 0x386   :  { %4475 = vst [vmem:[#allocation8 + $0x118] sm:$0xff] %v6213_v5 }
 0x387   :  { %4472 = vst [vmem:[#allocation8 + $0x100] sm:$0xff] %v6214_v0  ;;  %v5575_v47 = vpop.f32.mrb[28].mxu0 }
 0x388   :  { %v6215_v44 = vadd.f32 %v5575_v47, %v1560_v53  ;;  %v4418_v39 = vpop.f32.mrb[29].mxu0 }
 0x389   :  { %v6216_v62 = vadd.f32 %v4418_v39, %v1560_v53 }
 0x38a   :  { %4481 = vst [vmem:[#allocation8 + $0x148] sm:$0xff] %v6215_v44 }
 0x38b   :  { %4478 = vst [vmem:[#allocation8 + $0x130] sm:$0xff] %v6216_v62  ;;  %v5578_v10 = vpop.f32.mrb[30].mxu0 }
 0x38c   :  { %v6217_v16 = vadd.f32 %v5578_v10, %v1560_v53  ;;  %v4430_v8 = vpop.f32.mrb[31].mxu0 }
 0x38d   :  { %v6218_v17 = vadd.f32 %v4430_v8, %v1560_v53 }
 0x38e   :  { %4487 = vst [vmem:[#allocation8 + $0x178] sm:$0xff] %v6217_v16 }
 0x38f   :  { %4484 = vst [vmem:[#allocation8 + $0x160] sm:$0xff] %v6218_v17 }
 0x40d   :  { %v3044_v55 = vpop.f32.mrb[0].mxu1 }
 0x40e   :  { %v6171_v35 = vadd.f32 %v3044_v55, %v8997_v3  ;;  %v3046_v48 = vpop.f32.mrb[1].mxu1 }
 0x40f   :  { %v6172_v63 = vadd.f32 %v3046_v48, %v8999_v26 }
 0x410   :  { %4440 = vst [vmem:[#allocation8] sm:$0xff] %v6171_v35 }
 0x411   :  { %4441 = vst [vmem:[#allocation8 + $0x8] sm:$0xff] %v6172_v63  ;;  %v3051_v30 = vpop.f32.mrb[2].mxu1 }
 0x412   :  { %v6173_v37 = vadd.f32 %v3051_v30, %v8997_v3  ;;  %v3053_v24 = vpop.f32.mrb[3].mxu1 }
 0x413   :  { %v6174_v31 = vadd.f32 %v3053_v24, %v8999_v26 }
 0x414   :  { %4443 = vst [vmem:[#allocation8 + $0x18] sm:$0xff] %v6173_v37 }
 0x415   :  { %4444 = vst [vmem:[#allocation8 + $0x20] sm:$0xff] %v6174_v31  ;;  %v3058_v38 = vpop.f32.mrb[4].mxu1 }
 0x416   :  { %v6175_v43 = vadd.f32 %v3058_v38, %v8997_v3  ;;  %v3060_v33 = vpop.f32.mrb[5].mxu1 }
 0x417   :  { %v6176_v9 = vadd.f32 %v3060_v33, %v8999_v26 }
 0x418   :  { %4446 = vst [vmem:[#allocation8 + $0x30] sm:$0xff] %v6175_v43 }
 0x419   :  { %4447 = vst [vmem:[#allocation8 + $0x38] sm:$0xff] %v6176_v9  ;;  %v3065_v51 = vpop.f32.mrb[6].mxu1 }
 0x41a   :  { %v6177_v11 = vadd.f32 %v3065_v51, %v8997_v3  ;;  %v3067_v50 = vpop.f32.mrb[7].mxu1 }
 0x41b   :  { %v6178_v2 = vadd.f32 %v3067_v50, %v8999_v26 }
 0x41c   :  { %4449 = vst [vmem:[#allocation8 + $0x48] sm:$0xff] %v6177_v11 }
 0x41d   :  { %4450 = vst [vmem:[#allocation8 + $0x50] sm:$0xff] %v6178_v2  ;;  %v3072_v15 = vpop.f32.mrb[8].mxu1 }
 0x41e   :  { %v6179_v57 = vadd.f32 %v3072_v15, %v8997_v3  ;;  %v3074_v34 = vpop.f32.mrb[9].mxu1 }
 0x41f   :  { %v6180_v45 = vadd.f32 %v3074_v34, %v8999_v26 }
 0x420   :  { %4452 = vst [vmem:[#allocation8 + $0x60] sm:$0xff] %v6179_v57 }
 0x421   :  { %4453 = vst [vmem:[#allocation8 + $0x68] sm:$0xff] %v6180_v45  ;;  %v3079_v28 = vpop.f32.mrb[10].mxu1 }
 0x422   :  { %v6181_v32 = vadd.f32 %v3079_v28, %v8997_v3  ;;  %v3081_v1 = vpop.f32.mrb[11].mxu1 }
 0x423   :  { %v6182_v21 = vadd.f32 %v3081_v1, %v8999_v26 }
 0x424   :  { %4455 = vst [vmem:[#allocation8 + $0x78] sm:$0xff] %v6181_v32 }
 0x425   :  { %4456 = vst [vmem:[#allocation8 + $0x80] sm:$0xff] %v6182_v21  ;;  %v3086_v59 = vpop.f32.mrb[12].mxu1 }
 0x426   :  { %v6183_v18 = vadd.f32 %v3086_v59, %v8997_v3  ;;  %v3088_v52 = vpop.f32.mrb[13].mxu1 }
 0x427   :  { %v6184_v53 = vadd.f32 %v3088_v52, %v8999_v26 }
 0x428   :  { %4458 = vst [vmem:[#allocation8 + $0x90] sm:$0xff] %v6183_v18 }
 0x429   :  { %4459 = vst [vmem:[#allocation8 + $0x98] sm:$0xff] %v6184_v53  ;;  %v3093_v54 = vpop.f32.mrb[14].mxu1 }
 0x42a   :  { %v6185_v56 = vadd.f32 %v3093_v54, %v8997_v3  ;;  %v3095_v14 = vpop.f32.mrb[15].mxu1 }
 0x42b   :  { %v6186_v12 = vadd.f32 %v3095_v14, %v8999_v26 }
 0x42c   :  { %4461 = vst [vmem:[#allocation8 + $0xa8] sm:$0xff] %v6185_v56 }
 0x42d   :  { %4462 = vst [vmem:[#allocation8 + $0xb0] sm:$0xff] %v6186_v12  ;;  %v3100_v46 = vpop.f32.mrb[16].mxu1 }
 0x42e   :  { %v6187_v13 = vadd.f32 %v3100_v46, %v8997_v3  ;;  %v3102_v60 = vpop.f32.mrb[17].mxu1 }
 0x42f   :  { %v6188_v19 = vadd.f32 %v3102_v60, %v8999_v26 }
 0x430   :  { %4464 = vst [vmem:[#allocation8 + $0xc0] sm:$0xff] %v6187_v13 }
 0x431   :  { %4465 = vst [vmem:[#allocation8 + $0xc8] sm:$0xff] %v6188_v19  ;;  %v3107_v25 = vpop.f32.mrb[18].mxu1 }
 0x432   :  { %v6189_v7 = vadd.f32 %v3107_v25, %v8997_v3  ;;  %v3109_v40 = vpop.f32.mrb[19].mxu1 }
 0x433   :  { %v6190_v49 = vadd.f32 %v3109_v40, %v8999_v26 }
 0x434   :  { %4467 = vst [vmem:[#allocation8 + $0xd8] sm:$0xff] %v6189_v7 }
 0x435   :  { %4468 = vst [vmem:[#allocation8 + $0xe0] sm:$0xff] %v6190_v49  ;;  %v3114_v61 = vpop.f32.mrb[20].mxu1 }
 0x436   :  { %v6191_v58 = vadd.f32 %v3114_v61, %v8997_v3  ;;  %v3116_v20 = vpop.f32.mrb[21].mxu1 }
 0x437   :  { %v6192_v29 = vadd.f32 %v3116_v20, %v8999_v26 }
 0x438   :  { %4470 = vst [vmem:[#allocation8 + $0xf0] sm:$0xff] %v6191_v58 }
 0x439   :  { %4471 = vst [vmem:[#allocation8 + $0xf8] sm:$0xff] %v6192_v29  ;;  %v3121_v36 = vpop.f32.mrb[22].mxu1 }
 0x43a   :  { %v6193_v41 = vadd.f32 %v3121_v36, %v8997_v3  ;;  %v3123_v27 = vpop.f32.mrb[23].mxu1 }
 0x43b   :  { %v6194_v6 = vadd.f32 %v3123_v27, %v8999_v26 }
 0x43c   :  { %4473 = vst [vmem:[#allocation8 + $0x108] sm:$0xff] %v6193_v41 }
 0x43d   :  { %4474 = vst [vmem:[#allocation8 + $0x110] sm:$0xff] %v6194_v6  ;;  %v3128_v42 = vpop.f32.mrb[24].mxu1 }
 0x43e   :  { %v6195_v5 = vadd.f32 %v3128_v42, %v8997_v3  ;;  %v3130_v23 = vpop.f32.mrb[25].mxu1 }
 0x43f   :  { %v6196_v0 = vadd.f32 %v3130_v23, %v8999_v26 }
 0x440   :  { %4476 = vst [vmem:[#allocation8 + $0x120] sm:$0xff] %v6195_v5 }
 0x441   :  { %4477 = vst [vmem:[#allocation8 + $0x128] sm:$0xff] %v6196_v0  ;;  %v3135_v47 = vpop.f32.mrb[26].mxu1 }
 0x442   :  { %v6197_v44 = vadd.f32 %v3135_v47, %v8997_v3  ;;  %v3137_v39 = vpop.f32.mrb[27].mxu1 }
 0x443   :  { %v6198_v62 = vadd.f32 %v3137_v39, %v8999_v26 }
 0x444   :  { %4479 = vst [vmem:[#allocation8 + $0x138] sm:$0xff] %v6197_v44 }
 0x445   :  { %4480 = vst [vmem:[#allocation8 + $0x140] sm:$0xff] %v6198_v62  ;;  %v3142_v10 = vpop.f32.mrb[28].mxu1 }
 0x446   :  { %v6199_v16 = vadd.f32 %v3142_v10, %v8997_v3  ;;  %v3144_v8 = vpop.f32.mrb[29].mxu1 }
 0x447   :  { %v6200_v17 = vadd.f32 %v3144_v8, %v8999_v26 }
 0x448   :  { %4482 = vst [vmem:[#allocation8 + $0x150] sm:$0xff] %v6199_v16 }
 0x449   :  { %4483 = vst [vmem:[#allocation8 + $0x158] sm:$0xff] %v6200_v17  ;;  %v3149_v4 = vpop.f32.mrb[30].mxu1 }
 0x44a   :  { %v6201_v22 = vadd.f32 %v3149_v4, %v8997_v3  ;;  %v3151_v55 = vpop.f32.mrb[31].mxu1 }
 0x44b   :  { %v6202_v35 = vadd.f32 %v3151_v55, %v8999_v26 }
 0x44c   :  { %4485 = vst [vmem:[#allocation8 + $0x168] sm:$0xff] %v6201_v22 }
 0x44d   :  { %4486 = vst [vmem:[#allocation8 + $0x170] sm:$0xff] %v6202_v35 }
 0x44e   :  { %6689 = shalt.err (!%p6686_p0)
}
 0x44f   :  { %s6690_s12 = scalar_lea.hbm %s9053_s5, 6144 }
 0x450   :  { %p6691_p1 = scmp.ne.s32.totalorder %s9053_s5, %s6690_s12  ;;  %p6694_p2 = scmp.lt.u32.totalorder %s6690_s12, %s9053_s5 }
 0x452   :  { %p6696_p3 = pnand %p6694_p2, %p6691_p1 }
 0x454   :  { %6699 = shalt.err (!%p6696_p3)
}
 0x455   :  { %4499 = dma.vmem_to_hbm [thread:$0]  %s4494_s8, 6144, %s9053_s5, [#allocation4], %s6711_s0, %s6711_s0, %s6712_s21  }
 0x456   :  { %6704 = dma.done.wait [#allocation4], 6144  }
 0x457   :  { %6705 = vsyncadd [#allocation4], 4294961152 }
 0x458   :  { %4503 = vsyncpa [#allocation3], 1 }
 0x459   :  { %4504 = vsyncpa [#allocation6], 1 }
 0x45a   :  { %4505 = vsyncpa [#allocation4], 1 }

</bundles_post_ra>
